<compile_context>
chip_gen: v7x
topology: tpu7x:2x2x1
jax: 0.10.0
libtpu: 0.0.40
codegen_flags: <defaults>
</compile_context>

<pallas_src>
import numpy as np
import jax
import jax.numpy as jnp
from jax import lax
from jax.experimental import pallas as pl
from jax.experimental.pallas import tpu as pltpu

_GIS_ACTS = ("relu", "relu", "relu", "none")
_MLP_ACTS = ("relu", "leaky_relu", "relu", "none")
_MAX_ROW_TILE = 256   # keeps row_tile x 1984 f32 activations well inside v7x VMEM


# ------------------------------- helpers -----------------------------------

def _round_up(x, m):
    return (x + m - 1) // m * m


def _act(y, act):
    if act == "relu":
        return jnp.maximum(y, 0.0)
    if act == "leaky_relu":                       # PyTorch default slope 0.01
        return jnp.where(y >= 0.0, y, 0.01 * y)
    if act == "tanh":
        return jnp.tanh(y)
    return y


def _row_tiles(n):
    """Padded row count and row-block size (multiple of 8, <= _MAX_ROW_TILE)."""
    if n <= _MAX_ROW_TILE:
        rows = max(8, _round_up(n, 8))
        return rows, rows
    rows = _round_up(n, _MAX_ROW_TILE)
    return rows, _MAX_ROW_TILE


def _pad_rows(x, rows):
    return jnp.pad(x, ((0, rows - x.shape[0]), (0, 0)))


def _b2(b):
    return b.reshape(1, -1)


def _placement(width, offset, total):
    """[width, total] 0/1 matrix that places a width-wide value at lane offset."""
    p = np.zeros((width, total), np.float32)
    p[np.arange(width), offset + np.arange(width)] = 1.0
    return jnp.asarray(p)


def _constant_mats(cfg):
    """Constant 0/1 matrices that turn scatter/reduce ops into MXU matmuls."""
    H = cfg["rnn_hidden_dim"]
    heads = cfg["n_heads"]
    att = cfg["att_dim"]
    S = cfg["state_shape"]
    Hh = H * heads
    ntri = att * (att + 1) // 2
    # state expansion / grouped-sum for the per-row hypernet matvec
    grep = np.kron(np.eye(S, dtype=np.float32), np.ones((1, Hh), np.float32))  # [S, S*Hh]
    gsum = np.tile(np.eye(Hh, dtype=np.float32), (S, 1))                        # [S*Hh, Hh]
    # head merge (softmax weights folded in separately)
    hsum = np.tile(np.eye(H, dtype=np.float32), (heads, 1))                     # [Hh, H]
    # lower-triangular sample: zt = mu + (tri * (eps @ G)) @ R  ==  mu + L @ eps
    rows_idx, cols_idx = np.tril_indices(att)   # row-major == torch.tril_indices
    gmat = np.zeros((att, ntri), np.float32)
    gmat[cols_idx, np.arange(ntri)] = 1.0
    rmat = np.zeros((ntri, att), np.float32)
    rmat[np.arange(ntri), rows_idx] = 1.0
    return {k: jnp.asarray(v) for k, v in
            dict(grep=grep, gsum=gsum, hsum=hsum, gmat=gmat, rmat=rmat).items()}


def _chain(layers):
    out = []
    for w, b, _ in layers:
        out += [w, _b2(b)]
    return out


def _mlp_split_first(layers, split):
    """Final MLP: split first weight so cat((hh, zt)) @ W == hh @ W1 + zt @ W2."""
    (w1, b1, _), rest = layers[0], layers[1:]
    out = [w1[:split], w1[split:], _b2(b1)]
    for w, b, _ in rest:
        out += [w, _b2(b)]
    return out


# ------------------------- fused kernel weight lists ------------------------

def _train_weights(params, cfg, consts, out_w):
    H = cfg["rnn_hidden_dim"]
    heads = cfg["n_heads"]
    att = cfg["att_dim"]
    nact = cfg["n_actions"]
    m_flat = (jax.nn.softmax(params["merger_w"], axis=1).reshape(1, heads * H)
              if heads > 1 else jnp.ones((1, H), jnp.float32))
    wl = [params["zuhe_w"], _b2(params["zuhe_b"])]
    wl += _chain(params["GIS"])
    wl += [consts["grep"], consts["gsum"], m_flat, consts["hsum"]]
    wl += _chain(params["yingshe"])
    wl += [params["fc_mu_w"], _b2(params["fc_mu_b"]),
           params["fc_std_w"], _b2(params["fc_std_b"]),
           consts["gmat"], consts["rmat"]]
    wl += _chain(params["student"])
    wl += [params["gru_wih_t"], params["gru_whh_t"],
           _b2(params["gru_bih"]), _b2(params["gru_bhh"])]
    wl += _mlp_split_first(params["MLP"], H)
    # output packing placements: [hh | zt | di_zt | q | pad] -> lane-dense slab
    wl += [_placement(H, 0, out_w), _placement(att, H, out_w),
           _placement(att, H + att, out_w), _placement(nact, H + 2 * att, out_w)]
    return wl


def _test_weights(params, cfg, out_w):
    H = cfg["rnn_hidden_dim"]
    att = cfg["att_dim"]
    nact = cfg["n_actions"]
    wl = [params["zuhe_w"], _b2(params["zuhe_b"])]
    wl += _chain(params["student"])
    wl += [params["gru_wih_t"], params["gru_whh_t"],
           _b2(params["gru_bih"]), _b2(params["gru_bhh"])]
    wl += _mlp_split_first(params["MLP"], H)
    # output packing: [hh | zt | q | pad]
    wl += [_placement(H, 0, out_w), _placement(att, H, out_w),
           _placement(nact, H + att, out_w)]
    return wl


# ------------------------------ fused kernels -------------------------------

def _make_train_kernel(cfg, n_weights):
    H = cfg["rnn_hidden_dim"]
    heads = cfg["n_heads"]
    S = cfg["state_shape"]
    Hh = H * heads

    def kernel(di_ref, emb_ref, h_ref, st_ref, eps_ref, *rest):
        w_it = iter(rest[:n_weights])
        out_ref = rest[n_weights]

        def nxt():
            return next(w_it)[...]

        def dense(x, act):
            wv = nxt()
            bv = nxt()
            return _act(jnp.dot(x, wv, preferred_element_type=jnp.float32) + bv, act)

        def mm(a, b):
            return jnp.dot(a, b, preferred_element_type=jnp.float32)

        # obs embedding: zuhe linear + (agent-id + last-action) embedding adds
        x_obs = dense(di_ref[...], "none") + emb_ref[...]

        # GIS hypernetwork -> per-row weights/bias of the state embedding
        g = x_obs
        for a in _GIS_ACTS:
            g = dense(g, a)                                   # [TB, (S+1)*Hh]

        grep = nxt(); gsum = nxt(); m_flat = nxt(); hsum = nxt()
        s_exp = mm(st_ref[...], grep)                         # [TB, S*Hh]
        fc_w = g[:, :S * Hh]
        fc_b = g[:, S * Hh:]
        emb_state = mm(s_exp * fc_w, gsum) + fc_b             # state.unsqueeze(1) @ fc_w + fc_b
        merged = mm(emb_state * m_flat, hsum)                 # Merger (softmax precomputed)

        y = merged
        for a in _MLP_ACTS:
            y = dense(y, a)                                   # yingshe_state -> [TB, H]

        # distribution + MVN sample: zt = mu + L @ eps (1e-6 jitter intentionally dropped)
        w_mu = nxt(); b_mu = nxt()
        mu = jnp.tanh(mm(y, w_mu) + b_mu)
        w_std = nxt(); b_std = nxt()
        tri = mm(y, w_std) + b_std
        gmat = nxt(); rmat = nxt()
        zt = mu + mm(tri * mm(eps_ref[...], gmat), rmat)

        d = x_obs
        for a in _MLP_ACTS:
            d = dense(d, a)                                   # student -> di_zt [TB, att]

        # GRUCell (PyTorch gate order r, z, n)
        w_ih = nxt(); w_hh = nxt(); b_ih = nxt(); b_hh = nxt()
        gi = mm(x_obs, w_ih) + b_ih
        gh = mm(h_ref[...], w_hh) + b_hh
        r = jax.nn.sigmoid(gi[:, :H] + gh[:, :H])
        zg = jax.nn.sigmoid(gi[:, H:2 * H] + gh[:, H:2 * H])
        n = jnp.tanh(gi[:, 2 * H:] + r * gh[:, 2 * H:])
        hh = (1.0 - zg) * n + zg * h_ref[...]

        # final MLP on cat((hh, zt)) with the first weight pre-split
        w1h = nxt(); w1z = nxt(); b1 = nxt()
        q = _act(mm(hh, w1h) + mm(zt, w1z) + b1, "relu")
        for a in _MLP_ACTS[1:]:
            q = dense(q, a)                                   # [TB, n_actions]

        # pack into one lane-dense [TB, out_w] slab: [hh | zt | di_zt | q | 0pad]
        p_hh = nxt(); p_zt = nxt(); p_dz = nxt(); p_q = nxt()
        out_ref[...] = mm(hh, p_hh) + mm(zt, p_zt) + mm(d, p_dz) + mm(q, p_q)

    return kernel


def _make_test_kernel(cfg, n_weights):
    H = cfg["rnn_hidden_dim"]

    def kernel(di_ref, emb_ref, h_ref, *rest):
        w_it = iter(rest[:n_weights])
        out_ref = rest[n_weights]

        def nxt():
            return next(w_it)[...]

        def dense(x, act):
            wv = nxt()
            bv = nxt()
            return _act(jnp.dot(x, wv, preferred_element_type=jnp.float32) + bv, act)

        def mm(a, b):
            return jnp.dot(a, b, preferred_element_type=jnp.float32)

        x_obs = dense(di_ref[...], "none") + emb_ref[...]

        d = x_obs
        for a in _MLP_ACTS:
            d = dense(d, a)                                   # student -> zt [TB, att]

        w_ih = nxt(); w_hh = nxt(); b_ih = nxt(); b_hh = nxt()
        gi = mm(x_obs, w_ih) + b_ih
        gh = mm(h_ref[...], w_hh) + b_hh
        r = jax.nn.sigmoid(gi[:, :H] + gh[:, :H])
        zg = jax.nn.sigmoid(gi[:, H:2 * H] + gh[:, H:2 * H])
        n = jnp.tanh(gi[:, 2 * H:] + r * gh[:, 2 * H:])
        hh = (1.0 - zg) * n + zg * h_ref[...]

        w1h = nxt(); w1z = nxt(); b1 = nxt()
        q = _act(mm(hh, w1h) + mm(d, w1z) + b1, "relu")
        for a in _MLP_ACTS[1:]:
            q = dense(q, a)

        p_hh = nxt(); p_zt = nxt(); p_q = nxt()
        out_ref[...] = mm(hh, p_hh) + mm(d, p_zt) + mm(q, p_q)

    return kernel


def _fused_call(kernel, data, weights, rows, tile, out_w):
    in_specs = ([pl.BlockSpec((tile, d.shape[1]), lambda i: (i, 0)) for d in data]
                + [pl.BlockSpec(w.shape, lambda i: (0, 0)) for w in weights])
    return pl.pallas_call(
        kernel,
        out_shape=jax.ShapeDtypeStruct((rows, out_w), jnp.float32),
        grid=(rows // tile,),
        in_specs=in_specs,
        out_specs=pl.BlockSpec((tile, out_w), lambda i: (i, 0)),
        compiler_params=pltpu.CompilerParams(
            dimension_semantics=("parallel",)),
    )(*data, *weights)


# ----------------------------- model forward --------------------------------

def forward(params, cfg, inputs, hidden_state, state_inputs=None,
            sample_key=None, test_mode=False):
    bs, own_feats_t, enemy_feats_t, ally_feats_t, embedding_indices = inputs
    H = cfg["rnn_hidden_dim"]
    nA = cfg["n_agents"]
    att = cfg["att_dim"]
    nact = cfg["n_actions"]
    B = bs * nA

    h_in = hidden_state.reshape(-1, H)
    di_ally = ally_feats_t.reshape(B, -1)
    di_enemy = enemy_feats_t.reshape(B, -1)
    di_input = jnp.concatenate([own_feats_t, di_ally, di_enemy], axis=-1)

    # embedding lookups stay in plain JAX (tiny gathers); result is added in-kernel
    emb_add = jnp.zeros((B, H), jnp.float32)
    if cfg["obs_agent_id"]:
        emb_add = emb_add + jnp.take(params["agent_emb"],
                                     embedding_indices[0].reshape(-1), axis=0)
    if cfg["obs_last_action"]:
        la_idx = embedding_indices[-1]
        if la_idx is not None:
            emb_add = emb_add + jnp.take(params["action_emb"],
                                         la_idx.reshape(-1), axis=0)

    rows, tile = _row_tiles(B)

    if test_mode:
        out_w = _round_up(H + att + nact, 128)
        weights = _test_weights(params, cfg, out_w)
        data = [_pad_rows(di_input, rows), _pad_rows(emb_add, rows),
                _pad_rows(h_in, rows)]
        kernel = _make_test_kernel(cfg, len(weights))
        out = _fused_call(kernel, data, weights, rows, tile, out_w)
        hh = out[:B, :H]
        q = out[:B, H + att:H + att + nact]
        di_loss = None
    else:
        out_w = _round_up(H + 2 * att + nact, 128)
        consts = _constant_mats(cfg)
        weights = _train_weights(params, cfg, consts, out_w)

        ally_state_t, enemy_state_t = state_inputs
        ally_state_feats = jnp.repeat(ally_state_t[:, None, :], nA, axis=1).reshape(B, -1)
        enemy_state_feats = jnp.repeat(enemy_state_t[:, None, :], nA, axis=1).reshape(B, -1)
        state = jnp.concatenate([ally_state_feats, enemy_state_feats], axis=-1)
        eps = jax.random.normal(sample_key, (B, att), jnp.float32)

        data = [_pad_rows(di_input, rows), _pad_rows(emb_add, rows),
                _pad_rows(h_in, rows), _pad_rows(state, rows), _pad_rows(eps, rows)]
        kernel = _make_train_kernel(cfg, len(weights))
        out = _fused_call(kernel, data, weights, rows, tile, out_w)
        hh = out[:B, :H]
        zt = out[:B, H:H + att]
        di_zt = out[:B, H + att:H + 2 * att]
        q = out[:B, H + 2 * att:H + 2 * att + nact]
        di_loss = jnp.mean((di_zt - lax.stop_gradient(zt)) ** 2)

    return q.reshape(bs, nA, -1), hh.reshape(bs, nA, -1), di_loss


# ----------------------------- parameter init -------------------------------

def init_params(cfg, key):
    keys = iter(jax.random.split(key, 80))
    H = cfg["rnn_hidden_dim"]
    hyp = cfg["hpn_hyper_dim"]
    att = cfg["att_dim"]
    heads = cfg["n_heads"]
    S = cfg["state_shape"]

    def lin(kin, kout):
        w = jax.random.normal(next(keys), (kin, kout), jnp.float32) * (0.2 / jnp.sqrt(kin))
        b = jax.random.normal(next(keys), (kout,), jnp.float32) * 0.01
        return w, b

    def seq(dims, acts):
        return [lin(i, o) + (a,) for (i, o), a in zip(zip(dims[:-1], dims[1:]), acts)]

    p = {}
    p["zuhe_w"], p["zuhe_b"] = lin(cfg["obs_shape"], H)
    p["agent_emb"] = jax.random.normal(next(keys), (cfg["n_agents"], H), jnp.float32) * 0.1
    p["action_emb"] = jax.random.normal(next(keys), (cfg["n_actions"], H), jnp.float32) * 0.1

    p["GIS"] = seq([H, hyp, 256, hyp, (S + 1) * H * heads], _GIS_ACTS)
    p["merger_w"] = jnp.ones((1, heads, H), jnp.float32)          # Parameter.fill_(1.0)
    p["yingshe"] = seq([H, hyp, hyp * 2, hyp, H], _MLP_ACTS)
    p["MLP"] = seq([H + att, hyp, hyp * 2, hyp, cfg["n_actions"]], _MLP_ACTS)
    p["student"] = seq([H, hyp, hyp * 2, hyp, att], _MLP_ACTS)

    p["fc_mu_w"], p["fc_mu_b"] = lin(H, att)
    p["fc_std_w"], p["fc_std_b"] = lin(H, att * (att + 1) // 2)

    # GRUCell weights, stored transposed as [H, 3H] with gate order (r, z, n)
    p["gru_wih_t"] = jax.random.normal(next(keys), (H, 3 * H), jnp.float32) * (0.2 / jnp.sqrt(H))
    p["gru_whh_t"] = jax.random.normal(next(keys), (H, 3 * H), jnp.float32) * (0.2 / jnp.sqrt(H))
    p["gru_bih"] = jax.random.normal(next(keys), (3 * H,), jnp.float32) * 0.01
    p["gru_bhh"] = jax.random.normal(next(keys), (3 * H,), jnp.float32) * 0.01
    return p


# ----------------------------------- main -----------------------------------

if __name__ == "__main__":
    cfg = dict(
        n_agents=2, n_allies=1, n_enemies=2, n_actions=6,
        n_heads=2, rnn_hidden_dim=32, hpn_hyper_dim=32, att_dim=16,
        obs_agent_id=True, obs_last_action=True,
        own_feats_dim=8, ally_feats_dim=8, enemy_feats_dim=7,
        state_ally_feats_size=5, state_enemy_feats_size=4,
    )
    cfg["obs_shape"] = (cfg["own_feats_dim"]
                        + cfg["n_allies"] * cfg["ally_feats_dim"]
                        + cfg["n_enemies"] * cfg["enemy_feats_dim"])
    cfg["state_shape"] = (cfg["n_agents"] * (cfg["state_ally_feats_size"] + cfg["n_actions"])
                          + cfg["n_enemies"] * cfg["state_enemy_feats_size"])

    key = jax.random.PRNGKey(0)
    pkey, dkey, skey = jax.random.split(key, 3)
    params = init_params(cfg, pkey)

    bs = 2
    nA = cfg["n_agents"]
    ks = jax.random.split(dkey, 8)
    own_feats = jax.random.normal(ks[0], (bs * nA, cfg["own_feats_dim"]), jnp.float32)
    ally_feats = jax.random.normal(ks[1], (bs * nA, cfg["n_allies"], cfg["ally_feats_dim"]), jnp.float32)
    enemy_feats = jax.random.normal(ks[2], (bs * nA, cfg["n_enemies"], cfg["enemy_feats_dim"]), jnp.float32)
    agent_idx = jnp.tile(jnp.arange(nA, dtype=jnp.int32), bs)
    last_act_idx = jax.random.randint(ks[3], (bs * nA,), 0, cfg["n_actions"], dtype=jnp.int32)
    hidden = jnp.zeros((bs * nA, cfg["rnn_hidden_dim"]), jnp.float32)
    ally_state = jax.random.normal(
        ks[4], (bs, nA * (cfg["state_ally_feats_size"] + cfg["n_actions"])), jnp.float32)
    enemy_state = jax.random.normal(
        ks[5], (bs, cfg["n_enemies"] * cfg["state_enemy_feats_size"]), jnp.float32)

    inputs = (bs, own_feats, enemy_feats, ally_feats, [agent_idx, last_act_idx])

    # training path (test_mode=False): returns q, hh, di_loss
    q, hh, di_loss = forward(params, cfg, inputs, hidden,
                             state_inputs=(ally_state, enemy_state),
                             sample_key=skey, test_mode=False)
    jax.block_until_ready((q, hh, di_loss))
    assert q.shape == (bs, nA, cfg["n_actions"])
    assert hh.shape == (bs, nA, cfg["rnn_hidden_dim"])
    assert bool(jnp.all(jnp.isfinite(q))) and bool(jnp.isfinite(di_loss))

    # inference path (test_mode=True)
    q2, hh2, none_loss = forward(params, cfg, inputs, hidden,
                                 state_inputs=None, sample_key=None, test_mode=True)
    jax.block_until_ready((q2, hh2))
    assert q2.shape == (bs, nA, cfg["n_actions"])
    assert none_loss is None

    print("KERNEL_OK")
</pallas_src>

<mosaic_0001>
module attributes {stable_mosaic.version = 11 : i64} {
  func.func @kernel(%arg0: i32, %arg1: memref<8x30xf32, #tpu.memory_space<vmem>>, %arg2: memref<8x32xf32, #tpu.memory_space<vmem>>, %arg3: memref<8x32xf32, #tpu.memory_space<vmem>>, %arg4: memref<8x30xf32, #tpu.memory_space<vmem>>, %arg5: memref<8x16xf32, #tpu.memory_space<vmem>>, %arg6: memref<30x32xf32, #tpu.memory_space<vmem>>, %arg7: memref<1x32xf32, #tpu.memory_space<vmem>>, %arg8: memref<32x32xf32, #tpu.memory_space<vmem>>, %arg9: memref<1x32xf32, #tpu.memory_space<vmem>>, %arg10: memref<32x256xf32, #tpu.memory_space<vmem>>, %arg11: memref<1x256xf32, #tpu.memory_space<vmem>>, %arg12: memref<256x32xf32, #tpu.memory_space<vmem>>, %arg13: memref<1x32xf32, #tpu.memory_space<vmem>>, %arg14: memref<32x1984xf32, #tpu.memory_space<vmem>>, %arg15: memref<1x1984xf32, #tpu.memory_space<vmem>>, %arg16: memref<30x1920xf32, #tpu.memory_space<vmem>>, %arg17: memref<1920x64xf32, #tpu.memory_space<vmem>>, %arg18: memref<1x64xf32, #tpu.memory_space<vmem>>, %arg19: memref<64x32xf32, #tpu.memory_space<vmem>>, %arg20: memref<32x32xf32, #tpu.memory_space<vmem>>, %arg21: memref<1x32xf32, #tpu.memory_space<vmem>>, %arg22: memref<32x64xf32, #tpu.memory_space<vmem>>, %arg23: memref<1x64xf32, #tpu.memory_space<vmem>>, %arg24: memref<64x32xf32, #tpu.memory_space<vmem>>, %arg25: memref<1x32xf32, #tpu.memory_space<vmem>>, %arg26: memref<32x32xf32, #tpu.memory_space<vmem>>, %arg27: memref<1x32xf32, #tpu.memory_space<vmem>>, %arg28: memref<32x16xf32, #tpu.memory_space<vmem>>, %arg29: memref<1x16xf32, #tpu.memory_space<vmem>>, %arg30: memref<32x136xf32, #tpu.memory_space<vmem>>, %arg31: memref<1x136xf32, #tpu.memory_space<vmem>>, %arg32: memref<16x136xf32, #tpu.memory_space<vmem>>, %arg33: memref<136x16xf32, #tpu.memory_space<vmem>>, %arg34: memref<32x32xf32, #tpu.memory_space<vmem>>, %arg35: memref<1x32xf32, #tpu.memory_space<vmem>>, %arg36: memref<32x64xf32, #tpu.memory_space<vmem>>, %arg37: memref<1x64xf32, #tpu.memory_space<vmem>>, %arg38: memref<64x32xf32, #tpu.memory_space<vmem>>, %arg39: memref<1x32xf32, #tpu.memory_space<vmem>>, %arg40: memref<32x16xf32, #tpu.memory_space<vmem>>, %arg41: memref<1x16xf32, #tpu.memory_space<vmem>>, %arg42: memref<32x96xf32, #tpu.memory_space<vmem>>, %arg43: memref<32x96xf32, #tpu.memory_space<vmem>>, %arg44: memref<1x96xf32, #tpu.memory_space<vmem>>, %arg45: memref<1x96xf32, #tpu.memory_space<vmem>>, %arg46: memref<32x32xf32, #tpu.memory_space<vmem>>, %arg47: memref<16x32xf32, #tpu.memory_space<vmem>>, %arg48: memref<1x32xf32, #tpu.memory_space<vmem>>, %arg49: memref<32x64xf32, #tpu.memory_space<vmem>>, %arg50: memref<1x64xf32, #tpu.memory_space<vmem>>, %arg51: memref<64x32xf32, #tpu.memory_space<vmem>>, %arg52: memref<1x32xf32, #tpu.memory_space<vmem>>, %arg53: memref<32x6xf32, #tpu.memory_space<vmem>>, %arg54: memref<1x6xf32, #tpu.memory_space<vmem>>, %arg55: memref<32x128xf32, #tpu.memory_space<vmem>>, %arg56: memref<16x128xf32, #tpu.memory_space<vmem>>, %arg57: memref<16x128xf32, #tpu.memory_space<vmem>>, %arg58: memref<6x128xf32, #tpu.memory_space<vmem>>, %arg59: memref<8x128xf32, #tpu.memory_space<vmem>>) attributes {dimension_semantics = [#tpu.dimension_semantics<parallel>], iteration_bounds = array<i64: 1>, scalar_prefetch = 0 : i64, scratch_operands = 0 : i64, tpu.core_type = #tpu.core_type<tc>, window_params = [{transform_indices = @transform_0, window_bounds = array<i64: 8, 30>}, {transform_indices = @transform_1, window_bounds = array<i64: 8, 32>}, {transform_indices = @transform_2, window_bounds = array<i64: 8, 32>}, {transform_indices = @transform_3, window_bounds = array<i64: 8, 30>}, {transform_indices = @transform_4, window_bounds = array<i64: 8, 16>}, {pipeline_mode = #tpu.pipeline_mode<synchronous>, transform_indices = @transform_5, window_bounds = array<i64: 30, 32>}, {pipeline_mode = #tpu.pipeline_mode<synchronous>, transform_indices = @transform_6, window_bounds = array<i64: 1, 32>}, {pipeline_mode = #tpu.pipeline_mode<synchronous>, transform_indices = @transform_7, window_bounds = array<i64: 32, 32>}, {pipeline_mode = #tpu.pipeline_mode<synchronous>, transform_indices = @transform_8, window_bounds = array<i64: 1, 32>}, {pipeline_mode = #tpu.pipeline_mode<synchronous>, transform_indices = @transform_9, window_bounds = array<i64: 32, 256>}, {pipeline_mode = #tpu.pipeline_mode<synchronous>, transform_indices = @transform_10, window_bounds = array<i64: 1, 256>}, {pipeline_mode = #tpu.pipeline_mode<synchronous>, transform_indices = @transform_11, window_bounds = array<i64: 256, 32>}, {pipeline_mode = #tpu.pipeline_mode<synchronous>, transform_indices = @transform_12, window_bounds = array<i64: 1, 32>}, {pipeline_mode = #tpu.pipeline_mode<synchronous>, transform_indices = @transform_13, window_bounds = array<i64: 32, 1984>}, {pipeline_mode = #tpu.pipeline_mode<synchronous>, transform_indices = @transform_14, window_bounds = array<i64: 1, 1984>}, {pipeline_mode = #tpu.pipeline_mode<synchronous>, transform_indices = @transform_15, window_bounds = array<i64: 30, 1920>}, {pipeline_mode = #tpu.pipeline_mode<synchronous>, transform_indices = @transform_16, window_bounds = array<i64: 1920, 64>}, {pipeline_mode = #tpu.pipeline_mode<synchronous>, transform_indices = @transform_17, window_bounds = array<i64: 1, 64>}, {pipeline_mode = #tpu.pipeline_mode<synchronous>, transform_indices = @transform_18, window_bounds = array<i64: 64, 32>}, {pipeline_mode = #tpu.pipeline_mode<synchronous>, transform_indices = @transform_19, window_bounds = array<i64: 32, 32>}, {pipeline_mode = #tpu.pipeline_mode<synchronous>, transform_indices = @transform_20, window_bounds = array<i64: 1, 32>}, {pipeline_mode = #tpu.pipeline_mode<synchronous>, transform_indices = @transform_21, window_bounds = array<i64: 32, 64>}, {pipeline_mode = #tpu.pipeline_mode<synchronous>, transform_indices = @transform_22, window_bounds = array<i64: 1, 64>}, {pipeline_mode = #tpu.pipeline_mode<synchronous>, transform_indices = @transform_23, window_bounds = array<i64: 64, 32>}, {pipeline_mode = #tpu.pipeline_mode<synchronous>, transform_indices = @transform_24, window_bounds = array<i64: 1, 32>}, {pipeline_mode = #tpu.pipeline_mode<synchronous>, transform_indices = @transform_25, window_bounds = array<i64: 32, 32>}, {pipeline_mode = #tpu.pipeline_mode<synchronous>, transform_indices = @transform_26, window_bounds = array<i64: 1, 32>}, {pipeline_mode = #tpu.pipeline_mode<synchronous>, transform_indices = @transform_27, window_bounds = array<i64: 32, 16>}, {pipeline_mode = #tpu.pipeline_mode<synchronous>, transform_indices = @transform_28, window_bounds = array<i64: 1, 16>}, {pipeline_mode = #tpu.pipeline_mode<synchronous>, transform_indices = @transform_29, window_bounds = array<i64: 32, 136>}, {pipeline_mode = #tpu.pipeline_mode<synchronous>, transform_indices = @transform_30, window_bounds = array<i64: 1, 136>}, {pipeline_mode = #tpu.pipeline_mode<synchronous>, transform_indices = @transform_31, window_bounds = array<i64: 16, 136>}, {pipeline_mode = #tpu.pipeline_mode<synchronous>, transform_indices = @transform_32, window_bounds = array<i64: 136, 16>}, {pipeline_mode = #tpu.pipeline_mode<synchronous>, transform_indices = @transform_33, window_bounds = array<i64: 32, 32>}, {pipeline_mode = #tpu.pipeline_mode<synchronous>, transform_indices = @transform_34, window_bounds = array<i64: 1, 32>}, {pipeline_mode = #tpu.pipeline_mode<synchronous>, transform_indices = @transform_35, window_bounds = array<i64: 32, 64>}, {pipeline_mode = #tpu.pipeline_mode<synchronous>, transform_indices = @transform_36, window_bounds = array<i64: 1, 64>}, {pipeline_mode = #tpu.pipeline_mode<synchronous>, transform_indices = @transform_37, window_bounds = array<i64: 64, 32>}, {pipeline_mode = #tpu.pipeline_mode<synchronous>, transform_indices = @transform_38, window_bounds = array<i64: 1, 32>}, {pipeline_mode = #tpu.pipeline_mode<synchronous>, transform_indices = @transform_39, window_bounds = array<i64: 32, 16>}, {pipeline_mode = #tpu.pipeline_mode<synchronous>, transform_indices = @transform_40, window_bounds = array<i64: 1, 16>}, {pipeline_mode = #tpu.pipeline_mode<synchronous>, transform_indices = @transform_41, window_bounds = array<i64: 32, 96>}, {pipeline_mode = #tpu.pipeline_mode<synchronous>, transform_indices = @transform_42, window_bounds = array<i64: 32, 96>}, {pipeline_mode = #tpu.pipeline_mode<synchronous>, transform_indices = @transform_43, window_bounds = array<i64: 1, 96>}, {pipeline_mode = #tpu.pipeline_mode<synchronous>, transform_indices = @transform_44, window_bounds = array<i64: 1, 96>}, {pipeline_mode = #tpu.pipeline_mode<synchronous>, transform_indices = @transform_45, window_bounds = array<i64: 32, 32>}, {pipeline_mode = #tpu.pipeline_mode<synchronous>, transform_indices = @transform_46, window_bounds = array<i64: 16, 32>}, {pipeline_mode = #tpu.pipeline_mode<synchronous>, transform_indices = @transform_47, window_bounds = array<i64: 1, 32>}, {pipeline_mode = #tpu.pipeline_mode<synchronous>, transform_indices = @transform_48, window_bounds = array<i64: 32, 64>}, {pipeline_mode = #tpu.pipeline_mode<synchronous>, transform_indices = @transform_49, window_bounds = array<i64: 1, 64>}, {pipeline_mode = #tpu.pipeline_mode<synchronous>, transform_indices = @transform_50, window_bounds = array<i64: 64, 32>}, {pipeline_mode = #tpu.pipeline_mode<synchronous>, transform_indices = @transform_51, window_bounds = array<i64: 1, 32>}, {pipeline_mode = #tpu.pipeline_mode<synchronous>, transform_indices = @transform_52, window_bounds = array<i64: 32, 6>}, {pipeline_mode = #tpu.pipeline_mode<synchronous>, transform_indices = @transform_53, window_bounds = array<i64: 1, 6>}, {pipeline_mode = #tpu.pipeline_mode<synchronous>, transform_indices = @transform_54, window_bounds = array<i64: 32, 128>}, {pipeline_mode = #tpu.pipeline_mode<synchronous>, transform_indices = @transform_55, window_bounds = array<i64: 16, 128>}, {pipeline_mode = #tpu.pipeline_mode<synchronous>, transform_indices = @transform_56, window_bounds = array<i64: 16, 128>}, {pipeline_mode = #tpu.pipeline_mode<synchronous>, transform_indices = @transform_57, window_bounds = array<i64: 6, 128>}, {transform_indices = @transform_58, window_bounds = array<i64: 8, 128>}]} {
    %c0 = arith.constant 0 : index
    %c0_0 = arith.constant 0 : index
    %0 = vector.load %arg1[%c0, %c0_0] : memref<8x30xf32, #tpu.memory_space<vmem>>, vector<8x30xf32>
    %c0_1 = arith.constant 0 : index
    %c0_2 = arith.constant 0 : index
    %1 = vector.load %arg6[%c0_1, %c0_2] : memref<30x32xf32, #tpu.memory_space<vmem>>, vector<30x32xf32>
    %c0_3 = arith.constant 0 : index
    %c0_4 = arith.constant 0 : index
    %2 = vector.load %arg7[%c0_3, %c0_4] : memref<1x32xf32, #tpu.memory_space<vmem>>, vector<1x32xf32>
    %cst = arith.constant dense<0.000000e+00> : vector<8x32xf32>
    %3 = tpu.matmul %0, %1, %cst {dimension_numbers = #tpu.dot_dimension_numbers<[1], [0], [0], [1], [0, 0, 1, 1], [], []>} : vector<8x30xf32>, vector<30x32xf32>, vector<8x32xf32> -> vector<8x32xf32>
    %4 = vector.broadcast %2 : vector<1x32xf32> to vector<8x32xf32>
    %5 = arith.addf %3, %4 : vector<8x32xf32>
    %c0_5 = arith.constant 0 : index
    %c0_6 = arith.constant 0 : index
    %6 = vector.load %arg2[%c0_5, %c0_6] : memref<8x32xf32, #tpu.memory_space<vmem>>, vector<8x32xf32>
    %7 = arith.addf %5, %6 : vector<8x32xf32>
    %c0_7 = arith.constant 0 : index
    %c0_8 = arith.constant 0 : index
    %8 = vector.load %arg8[%c0_7, %c0_8] : memref<32x32xf32, #tpu.memory_space<vmem>>, vector<32x32xf32>
    %c0_9 = arith.constant 0 : index
    %c0_10 = arith.constant 0 : index
    %9 = vector.load %arg9[%c0_9, %c0_10] : memref<1x32xf32, #tpu.memory_space<vmem>>, vector<1x32xf32>
    %cst_11 = arith.constant dense<0.000000e+00> : vector<8x32xf32>
    %10 = tpu.matmul %7, %8, %cst_11 {dimension_numbers = #tpu.dot_dimension_numbers<[1], [0], [0], [1], [0, 0, 1, 1], [], []>} : vector<8x32xf32>, vector<32x32xf32>, vector<8x32xf32> -> vector<8x32xf32>
    %11 = vector.broadcast %9 : vector<1x32xf32> to vector<8x32xf32>
    %12 = arith.addf %10, %11 : vector<8x32xf32>
    %cst_12 = arith.constant 0.000000e+00 : f32
    %13 = vector.broadcast %cst_12 : f32 to vector<8x32xf32>
    %14 = arith.maximumf %12, %13 : vector<8x32xf32>
    %c0_13 = arith.constant 0 : index
    %c0_14 = arith.constant 0 : index
    %15 = vector.load %arg10[%c0_13, %c0_14] : memref<32x256xf32, #tpu.memory_space<vmem>>, vector<32x256xf32>
    %c0_15 = arith.constant 0 : index
    %c0_16 = arith.constant 0 : index
    %16 = vector.load %arg11[%c0_15, %c0_16] : memref<1x256xf32, #tpu.memory_space<vmem>>, vector<1x256xf32>
    %cst_17 = arith.constant dense<0.000000e+00> : vector<8x256xf32>
    %17 = tpu.matmul %14, %15, %cst_17 {dimension_numbers = #tpu.dot_dimension_numbers<[1], [0], [0], [1], [0, 0, 1, 1], [], []>} : vector<8x32xf32>, vector<32x256xf32>, vector<8x256xf32> -> vector<8x256xf32>
    %18 = vector.broadcast %16 : vector<1x256xf32> to vector<8x256xf32>
    %19 = arith.addf %17, %18 : vector<8x256xf32>
    %cst_18 = arith.constant 0.000000e+00 : f32
    %20 = vector.broadcast %cst_18 : f32 to vector<8x256xf32>
    %21 = arith.maximumf %19, %20 : vector<8x256xf32>
    %c0_19 = arith.constant 0 : index
    %c0_20 = arith.constant 0 : index
    %22 = vector.load %arg12[%c0_19, %c0_20] : memref<256x32xf32, #tpu.memory_space<vmem>>, vector<256x32xf32>
    %c0_21 = arith.constant 0 : index
    %c0_22 = arith.constant 0 : index
    %23 = vector.load %arg13[%c0_21, %c0_22] : memref<1x32xf32, #tpu.memory_space<vmem>>, vector<1x32xf32>
    %cst_23 = arith.constant dense<0.000000e+00> : vector<8x32xf32>
    %24 = tpu.matmul %21, %22, %cst_23 {dimension_numbers = #tpu.dot_dimension_numbers<[1], [0], [0], [1], [0, 0, 1, 1], [], []>} : vector<8x256xf32>, vector<256x32xf32>, vector<8x32xf32> -> vector<8x32xf32>
    %25 = vector.broadcast %23 : vector<1x32xf32> to vector<8x32xf32>
    %26 = arith.addf %24, %25 : vector<8x32xf32>
    %cst_24 = arith.constant 0.000000e+00 : f32
    %27 = vector.broadcast %cst_24 : f32 to vector<8x32xf32>
    %28 = arith.maximumf %26, %27 : vector<8x32xf32>
    %c0_25 = arith.constant 0 : index
    %c0_26 = arith.constant 0 : index
    %29 = vector.load %arg14[%c0_25, %c0_26] : memref<32x1984xf32, #tpu.memory_space<vmem>>, vector<32x1984xf32>
    %c0_27 = arith.constant 0 : index
    %c0_28 = arith.constant 0 : index
    %30 = vector.load %arg15[%c0_27, %c0_28] : memref<1x1984xf32, #tpu.memory_space<vmem>>, vector<1x1984xf32>
    %cst_29 = arith.constant dense<0.000000e+00> : vector<8x1984xf32>
    %31 = tpu.matmul %28, %29, %cst_29 {dimension_numbers = #tpu.dot_dimension_numbers<[1], [0], [0], [1], [0, 0, 1, 1], [], []>} : vector<8x32xf32>, vector<32x1984xf32>, vector<8x1984xf32> -> vector<8x1984xf32>
    %32 = vector.broadcast %30 : vector<1x1984xf32> to vector<8x1984xf32>
    %33 = arith.addf %31, %32 : vector<8x1984xf32>
    %c0_30 = arith.constant 0 : index
    %c0_31 = arith.constant 0 : index
    %34 = vector.load %arg16[%c0_30, %c0_31] : memref<30x1920xf32, #tpu.memory_space<vmem>>, vector<30x1920xf32>
    %c0_32 = arith.constant 0 : index
    %c0_33 = arith.constant 0 : index
    %35 = vector.load %arg17[%c0_32, %c0_33] : memref<1920x64xf32, #tpu.memory_space<vmem>>, vector<1920x64xf32>
    %c0_34 = arith.constant 0 : index
    %c0_35 = arith.constant 0 : index
    %36 = vector.load %arg18[%c0_34, %c0_35] : memref<1x64xf32, #tpu.memory_space<vmem>>, vector<1x64xf32>
    %c0_36 = arith.constant 0 : index
    %c0_37 = arith.constant 0 : index
    %37 = vector.load %arg19[%c0_36, %c0_37] : memref<64x32xf32, #tpu.memory_space<vmem>>, vector<64x32xf32>
    %c0_38 = arith.constant 0 : index
    %c0_39 = arith.constant 0 : index
    %38 = vector.load %arg4[%c0_38, %c0_39] : memref<8x30xf32, #tpu.memory_space<vmem>>, vector<8x30xf32>
    %cst_40 = arith.constant dense<0.000000e+00> : vector<8x1920xf32>
    %39 = tpu.matmul %38, %34, %cst_40 {dimension_numbers = #tpu.dot_dimension_numbers<[1], [0], [0], [1], [0, 0, 1, 1], [], []>} : vector<8x30xf32>, vector<30x1920xf32>, vector<8x1920xf32> -> vector<8x1920xf32>
    %40 = vector.extract_strided_slice %33 {offsets = [0, 0], sizes = [8, 1920], strides = [1, 1]} : vector<8x1984xf32> to vector<8x1920xf32>
    %41 = vector.extract_strided_slice %33 {offsets = [0, 1920], sizes = [8, 64], strides = [1, 1]} : vector<8x1984xf32> to vector<8x64xf32>
    %42 = arith.mulf %39, %40 : vector<8x1920xf32>
    %cst_41 = arith.constant dense<0.000000e+00> : vector<8x64xf32>
    %43 = tpu.matmul %42, %35, %cst_41 {dimension_numbers = #tpu.dot_dimension_numbers<[1], [0], [0], [1], [0, 0, 1, 1], [], []>} : vector<8x1920xf32>, vector<1920x64xf32>, vector<8x64xf32> -> vector<8x64xf32>
    %44 = arith.addf %43, %41 : vector<8x64xf32>
    %45 = vector.broadcast %36 : vector<1x64xf32> to vector<8x64xf32>
    %46 = arith.mulf %44, %45 : vector<8x64xf32>
    %cst_42 = arith.constant dense<0.000000e+00> : vector<8x32xf32>
    %47 = tpu.matmul %46, %37, %cst_42 {dimension_numbers = #tpu.dot_dimension_numbers<[1], [0], [0], [1], [0, 0, 1, 1], [], []>} : vector<8x64xf32>, vector<64x32xf32>, vector<8x32xf32> -> vector<8x32xf32>
    %c0_43 = arith.constant 0 : index
    %c0_44 = arith.constant 0 : index
    %48 = vector.load %arg20[%c0_43, %c0_44] : memref<32x32xf32, #tpu.memory_space<vmem>>, vector<32x32xf32>
    %c0_45 = arith.constant 0 : index
    %c0_46 = arith.constant 0 : index
    %49 = vector.load %arg21[%c0_45, %c0_46] : memref<1x32xf32, #tpu.memory_space<vmem>>, vector<1x32xf32>
    %cst_47 = arith.constant dense<0.000000e+00> : vector<8x32xf32>
    %50 = tpu.matmul %47, %48, %cst_47 {dimension_numbers = #tpu.dot_dimension_numbers<[1], [0], [0], [1], [0, 0, 1, 1], [], []>} : vector<8x32xf32>, vector<32x32xf32>, vector<8x32xf32> -> vector<8x32xf32>
    %51 = vector.broadcast %49 : vector<1x32xf32> to vector<8x32xf32>
    %52 = arith.addf %50, %51 : vector<8x32xf32>
    %cst_48 = arith.constant 0.000000e+00 : f32
    %53 = vector.broadcast %cst_48 : f32 to vector<8x32xf32>
    %54 = arith.maximumf %52, %53 : vector<8x32xf32>
    %c0_49 = arith.constant 0 : index
    %c0_50 = arith.constant 0 : index
    %55 = vector.load %arg22[%c0_49, %c0_50] : memref<32x64xf32, #tpu.memory_space<vmem>>, vector<32x64xf32>
    %c0_51 = arith.constant 0 : index
    %c0_52 = arith.constant 0 : index
    %56 = vector.load %arg23[%c0_51, %c0_52] : memref<1x64xf32, #tpu.memory_space<vmem>>, vector<1x64xf32>
    %cst_53 = arith.constant dense<0.000000e+00> : vector<8x64xf32>
    %57 = tpu.matmul %54, %55, %cst_53 {dimension_numbers = #tpu.dot_dimension_numbers<[1], [0], [0], [1], [0, 0, 1, 1], [], []>} : vector<8x32xf32>, vector<32x64xf32>, vector<8x64xf32> -> vector<8x64xf32>
    %58 = vector.broadcast %56 : vector<1x64xf32> to vector<8x64xf32>
    %59 = arith.addf %57, %58 : vector<8x64xf32>
    %cst_54 = arith.constant 0.000000e+00 : f32
    %60 = vector.broadcast %cst_54 : f32 to vector<8x64xf32>
    %61 = arith.cmpf oge, %59, %60 : vector<8x64xf32>
    %cst_55 = arith.constant 0.00999999977 : f32
    %62 = vector.broadcast %cst_55 : f32 to vector<8x64xf32>
    %63 = arith.mulf %62, %59 : vector<8x64xf32>
    %64 = arith.select %61, %59, %63 : vector<8x64xi1>, vector<8x64xf32>
    %c0_56 = arith.constant 0 : index
    %c0_57 = arith.constant 0 : index
    %65 = vector.load %arg24[%c0_56, %c0_57] : memref<64x32xf32, #tpu.memory_space<vmem>>, vector<64x32xf32>
    %c0_58 = arith.constant 0 : index
    %c0_59 = arith.constant 0 : index
    %66 = vector.load %arg25[%c0_58, %c0_59] : memref<1x32xf32, #tpu.memory_space<vmem>>, vector<1x32xf32>
    %cst_60 = arith.constant dense<0.000000e+00> : vector<8x32xf32>
    %67 = tpu.matmul %64, %65, %cst_60 {dimension_numbers = #tpu.dot_dimension_numbers<[1], [0], [0], [1], [0, 0, 1, 1], [], []>} : vector<8x64xf32>, vector<64x32xf32>, vector<8x32xf32> -> vector<8x32xf32>
    %68 = vector.broadcast %66 : vector<1x32xf32> to vector<8x32xf32>
    %69 = arith.addf %67, %68 : vector<8x32xf32>
    %cst_61 = arith.constant 0.000000e+00 : f32
    %70 = vector.broadcast %cst_61 : f32 to vector<8x32xf32>
    %71 = arith.maximumf %69, %70 : vector<8x32xf32>
    %c0_62 = arith.constant 0 : index
    %c0_63 = arith.constant 0 : index
    %72 = vector.load %arg26[%c0_62, %c0_63] : memref<32x32xf32, #tpu.memory_space<vmem>>, vector<32x32xf32>
    %c0_64 = arith.constant 0 : index
    %c0_65 = arith.constant 0 : index
    %73 = vector.load %arg27[%c0_64, %c0_65] : memref<1x32xf32, #tpu.memory_space<vmem>>, vector<1x32xf32>
    %cst_66 = arith.constant dense<0.000000e+00> : vector<8x32xf32>
    %74 = tpu.matmul %71, %72, %cst_66 {dimension_numbers = #tpu.dot_dimension_numbers<[1], [0], [0], [1], [0, 0, 1, 1], [], []>} : vector<8x32xf32>, vector<32x32xf32>, vector<8x32xf32> -> vector<8x32xf32>
    %75 = vector.broadcast %73 : vector<1x32xf32> to vector<8x32xf32>
    %76 = arith.addf %74, %75 : vector<8x32xf32>
    %c0_67 = arith.constant 0 : index
    %c0_68 = arith.constant 0 : index
    %77 = vector.load %arg28[%c0_67, %c0_68] : memref<32x16xf32, #tpu.memory_space<vmem>>, vector<32x16xf32>
    %c0_69 = arith.constant 0 : index
    %c0_70 = arith.constant 0 : index
    %78 = vector.load %arg29[%c0_69, %c0_70] : memref<1x16xf32, #tpu.memory_space<vmem>>, vector<1x16xf32>
    %cst_71 = arith.constant dense<0.000000e+00> : vector<8x16xf32>
    %79 = tpu.matmul %76, %77, %cst_71 {dimension_numbers = #tpu.dot_dimension_numbers<[1], [0], [0], [1], [0, 0, 1, 1], [], []>} : vector<8x32xf32>, vector<32x16xf32>, vector<8x16xf32> -> vector<8x16xf32>
    %80 = vector.broadcast %78 : vector<1x16xf32> to vector<8x16xf32>
    %81 = arith.addf %79, %80 : vector<8x16xf32>
    %82 = math.tanh %81 : vector<8x16xf32>
    %c0_72 = arith.constant 0 : index
    %c0_73 = arith.constant 0 : index
    %83 = vector.load %arg30[%c0_72, %c0_73] : memref<32x136xf32, #tpu.memory_space<vmem>>, vector<32x136xf32>
    %c0_74 = arith.constant 0 : index
    %c0_75 = arith.constant 0 : index
    %84 = vector.load %arg31[%c0_74, %c0_75] : memref<1x136xf32, #tpu.memory_space<vmem>>, vector<1x136xf32>
    %cst_76 = arith.constant dense<0.000000e+00> : vector<8x136xf32>
    %85 = tpu.matmul %76, %83, %cst_76 {dimension_numbers = #tpu.dot_dimension_numbers<[1], [0], [0], [1], [0, 0, 1, 1], [], []>} : vector<8x32xf32>, vector<32x136xf32>, vector<8x136xf32> -> vector<8x136xf32>
    %86 = vector.broadcast %84 : vector<1x136xf32> to vector<8x136xf32>
    %87 = arith.addf %85, %86 : vector<8x136xf32>
    %c0_77 = arith.constant 0 : index
    %c0_78 = arith.constant 0 : index
    %88 = vector.load %arg32[%c0_77, %c0_78] : memref<16x136xf32, #tpu.memory_space<vmem>>, vector<16x136xf32>
    %c0_79 = arith.constant 0 : index
    %c0_80 = arith.constant 0 : index
    %89 = vector.load %arg33[%c0_79, %c0_80] : memref<136x16xf32, #tpu.memory_space<vmem>>, vector<136x16xf32>
    %c0_81 = arith.constant 0 : index
    %c0_82 = arith.constant 0 : index
    %90 = vector.load %arg5[%c0_81, %c0_82] : memref<8x16xf32, #tpu.memory_space<vmem>>, vector<8x16xf32>
    %cst_83 = arith.constant dense<0.000000e+00> : vector<8x136xf32>
    %91 = tpu.matmul %90, %88, %cst_83 {dimension_numbers = #tpu.dot_dimension_numbers<[1], [0], [0], [1], [0, 0, 1, 1], [], []>} : vector<8x16xf32>, vector<16x136xf32>, vector<8x136xf32> -> vector<8x136xf32>
    %92 = arith.mulf %87, %91 : vector<8x136xf32>
    %cst_84 = arith.constant dense<0.000000e+00> : vector<8x16xf32>
    %93 = tpu.matmul %92, %89, %cst_84 {dimension_numbers = #tpu.dot_dimension_numbers<[1], [0], [0], [1], [0, 0, 1, 1], [], []>} : vector<8x136xf32>, vector<136x16xf32>, vector<8x16xf32> -> vector<8x16xf32>
    %94 = arith.addf %82, %93 : vector<8x16xf32>
    %c0_85 = arith.constant 0 : index
    %c0_86 = arith.constant 0 : index
    %95 = vector.load %arg34[%c0_85, %c0_86] : memref<32x32xf32, #tpu.memory_space<vmem>>, vector<32x32xf32>
    %c0_87 = arith.constant 0 : index
    %c0_88 = arith.constant 0 : index
    %96 = vector.load %arg35[%c0_87, %c0_88] : memref<1x32xf32, #tpu.memory_space<vmem>>, vector<1x32xf32>
    %cst_89 = arith.constant dense<0.000000e+00> : vector<8x32xf32>
    %97 = tpu.matmul %7, %95, %cst_89 {dimension_numbers = #tpu.dot_dimension_numbers<[1], [0], [0], [1], [0, 0, 1, 1], [], []>} : vector<8x32xf32>, vector<32x32xf32>, vector<8x32xf32> -> vector<8x32xf32>
    %98 = vector.broadcast %96 : vector<1x32xf32> to vector<8x32xf32>
    %99 = arith.addf %97, %98 : vector<8x32xf32>
    %cst_90 = arith.constant 0.000000e+00 : f32
    %100 = vector.broadcast %cst_90 : f32 to vector<8x32xf32>
    %101 = arith.maximumf %99, %100 : vector<8x32xf32>
    %c0_91 = arith.constant 0 : index
    %c0_92 = arith.constant 0 : index
    %102 = vector.load %arg36[%c0_91, %c0_92] : memref<32x64xf32, #tpu.memory_space<vmem>>, vector<32x64xf32>
    %c0_93 = arith.constant 0 : index
    %c0_94 = arith.constant 0 : index
    %103 = vector.load %arg37[%c0_93, %c0_94] : memref<1x64xf32, #tpu.memory_space<vmem>>, vector<1x64xf32>
    %cst_95 = arith.constant dense<0.000000e+00> : vector<8x64xf32>
    %104 = tpu.matmul %101, %102, %cst_95 {dimension_numbers = #tpu.dot_dimension_numbers<[1], [0], [0], [1], [0, 0, 1, 1], [], []>} : vector<8x32xf32>, vector<32x64xf32>, vector<8x64xf32> -> vector<8x64xf32>
    %105 = vector.broadcast %103 : vector<1x64xf32> to vector<8x64xf32>
    %106 = arith.addf %104, %105 : vector<8x64xf32>
    %cst_96 = arith.constant 0.000000e+00 : f32
    %107 = vector.broadcast %cst_96 : f32 to vector<8x64xf32>
    %108 = arith.cmpf oge, %106, %107 : vector<8x64xf32>
    %cst_97 = arith.constant 0.00999999977 : f32
    %109 = vector.broadcast %cst_97 : f32 to vector<8x64xf32>
    %110 = arith.mulf %109, %106 : vector<8x64xf32>
    %111 = arith.select %108, %106, %110 : vector<8x64xi1>, vector<8x64xf32>
    %c0_98 = arith.constant 0 : index
    %c0_99 = arith.constant 0 : index
    %112 = vector.load %arg38[%c0_98, %c0_99] : memref<64x32xf32, #tpu.memory_space<vmem>>, vector<64x32xf32>
    %c0_100 = arith.constant 0 : index
    %c0_101 = arith.constant 0 : index
    %113 = vector.load %arg39[%c0_100, %c0_101] : memref<1x32xf32, #tpu.memory_space<vmem>>, vector<1x32xf32>
    %cst_102 = arith.constant dense<0.000000e+00> : vector<8x32xf32>
    %114 = tpu.matmul %111, %112, %cst_102 {dimension_numbers = #tpu.dot_dimension_numbers<[1], [0], [0], [1], [0, 0, 1, 1], [], []>} : vector<8x64xf32>, vector<64x32xf32>, vector<8x32xf32> -> vector<8x32xf32>
    %115 = vector.broadcast %113 : vector<1x32xf32> to vector<8x32xf32>
    %116 = arith.addf %114, %115 : vector<8x32xf32>
    %cst_103 = arith.constant 0.000000e+00 : f32
    %117 = vector.broadcast %cst_103 : f32 to vector<8x32xf32>
    %118 = arith.maximumf %116, %117 : vector<8x32xf32>
    %c0_104 = arith.constant 0 : index
    %c0_105 = arith.constant 0 : index
    %119 = vector.load %arg40[%c0_104, %c0_105] : memref<32x16xf32, #tpu.memory_space<vmem>>, vector<32x16xf32>
    %c0_106 = arith.constant 0 : index
    %c0_107 = arith.constant 0 : index
    %120 = vector.load %arg41[%c0_106, %c0_107] : memref<1x16xf32, #tpu.memory_space<vmem>>, vector<1x16xf32>
    %cst_108 = arith.constant dense<0.000000e+00> : vector<8x16xf32>
    %121 = tpu.matmul %118, %119, %cst_108 {dimension_numbers = #tpu.dot_dimension_numbers<[1], [0], [0], [1], [0, 0, 1, 1], [], []>} : vector<8x32xf32>, vector<32x16xf32>, vector<8x16xf32> -> vector<8x16xf32>
    %122 = vector.broadcast %120 : vector<1x16xf32> to vector<8x16xf32>
    %123 = arith.addf %121, %122 : vector<8x16xf32>
    %c0_109 = arith.constant 0 : index
    %c0_110 = arith.constant 0 : index
    %124 = vector.load %arg42[%c0_109, %c0_110] : memref<32x96xf32, #tpu.memory_space<vmem>>, vector<32x96xf32>
    %c0_111 = arith.constant 0 : index
    %c0_112 = arith.constant 0 : index
    %125 = vector.load %arg43[%c0_111, %c0_112] : memref<32x96xf32, #tpu.memory_space<vmem>>, vector<32x96xf32>
    %c0_113 = arith.constant 0 : index
    %c0_114 = arith.constant 0 : index
    %126 = vector.load %arg44[%c0_113, %c0_114] : memref<1x96xf32, #tpu.memory_space<vmem>>, vector<1x96xf32>
    %c0_115 = arith.constant 0 : index
    %c0_116 = arith.constant 0 : index
    %127 = vector.load %arg45[%c0_115, %c0_116] : memref<1x96xf32, #tpu.memory_space<vmem>>, vector<1x96xf32>
    %cst_117 = arith.constant dense<0.000000e+00> : vector<8x96xf32>
    %128 = tpu.matmul %7, %124, %cst_117 {dimension_numbers = #tpu.dot_dimension_numbers<[1], [0], [0], [1], [0, 0, 1, 1], [], []>} : vector<8x32xf32>, vector<32x96xf32>, vector<8x96xf32> -> vector<8x96xf32>
    %129 = vector.broadcast %126 : vector<1x96xf32> to vector<8x96xf32>
    %130 = arith.addf %128, %129 : vector<8x96xf32>
    %c0_118 = arith.constant 0 : index
    %c0_119 = arith.constant 0 : index
    %131 = vector.load %arg3[%c0_118, %c0_119] : memref<8x32xf32, #tpu.memory_space<vmem>>, vector<8x32xf32>
    %cst_120 = arith.constant dense<0.000000e+00> : vector<8x96xf32>
    %132 = tpu.matmul %131, %125, %cst_120 {dimension_numbers = #tpu.dot_dimension_numbers<[1], [0], [0], [1], [0, 0, 1, 1], [], []>} : vector<8x32xf32>, vector<32x96xf32>, vector<8x96xf32> -> vector<8x96xf32>
    %133 = vector.broadcast %127 : vector<1x96xf32> to vector<8x96xf32>
    %134 = arith.addf %132, %133 : vector<8x96xf32>
    %135 = vector.extract_strided_slice %130 {offsets = [0, 0], sizes = [8, 32], strides = [1, 1]} : vector<8x96xf32> to vector<8x32xf32>
    %136 = vector.extract_strided_slice %134 {offsets = [0, 0], sizes = [8, 32], strides = [1, 1]} : vector<8x96xf32> to vector<8x32xf32>
    %137 = arith.addf %135, %136 : vector<8x32xf32>
    %138 = arith.negf %137 : vector<8x32xf32>
    %139 = math.exp %138 : vector<8x32xf32>
    %cst_121 = arith.constant 1.000000e+00 : f32
    %140 = vector.broadcast %cst_121 : f32 to vector<8x32xf32>
    %141 = arith.addf %140, %139 : vector<8x32xf32>
    %142 = arith.divf %140, %141 : vector<8x32xf32>
    %143 = vector.extract_strided_slice %130 {offsets = [0, 32], sizes = [8, 32], strides = [1, 1]} : vector<8x96xf32> to vector<8x32xf32>
    %144 = vector.extract_strided_slice %134 {offsets = [0, 32], sizes = [8, 32], strides = [1, 1]} : vector<8x96xf32> to vector<8x32xf32>
    %145 = arith.addf %143, %144 : vector<8x32xf32>
    %146 = arith.negf %145 : vector<8x32xf32>
    %147 = math.exp %146 : vector<8x32xf32>
    %cst_122 = arith.constant 1.000000e+00 : f32
    %148 = vector.broadcast %cst_122 : f32 to vector<8x32xf32>
    %149 = arith.addf %148, %147 : vector<8x32xf32>
    %150 = arith.divf %148, %149 : vector<8x32xf32>
    %151 = vector.extract_strided_slice %130 {offsets = [0, 64], sizes = [8, 32], strides = [1, 1]} : vector<8x96xf32> to vector<8x32xf32>
    %152 = vector.extract_strided_slice %134 {offsets = [0, 64], sizes = [8, 32], strides = [1, 1]} : vector<8x96xf32> to vector<8x32xf32>
    %153 = arith.mulf %142, %152 : vector<8x32xf32>
    %154 = arith.addf %151, %153 : vector<8x32xf32>
    %155 = math.tanh %154 : vector<8x32xf32>
    %cst_123 = arith.constant 1.000000e+00 : f32
    %156 = vector.broadcast %cst_123 : f32 to vector<8x32xf32>
    %157 = arith.subf %156, %150 : vector<8x32xf32>
    %158 = arith.mulf %157, %155 : vector<8x32xf32>
    %c0_124 = arith.constant 0 : index
    %c0_125 = arith.constant 0 : index
    %159 = vector.load %arg3[%c0_124, %c0_125] : memref<8x32xf32, #tpu.memory_space<vmem>>, vector<8x32xf32>
    %160 = arith.mulf %150, %159 : vector<8x32xf32>
    %161 = arith.addf %158, %160 : vector<8x32xf32>
    %c0_126 = arith.constant 0 : index
    %c0_127 = arith.constant 0 : index
    %162 = vector.load %arg46[%c0_126, %c0_127] : memref<32x32xf32, #tpu.memory_space<vmem>>, vector<32x32xf32>
    %c0_128 = arith.constant 0 : index
    %c0_129 = arith.constant 0 : index
    %163 = vector.load %arg47[%c0_128, %c0_129] : memref<16x32xf32, #tpu.memory_space<vmem>>, vector<16x32xf32>
    %c0_130 = arith.constant 0 : index
    %c0_131 = arith.constant 0 : index
    %164 = vector.load %arg48[%c0_130, %c0_131] : memref<1x32xf32, #tpu.memory_space<vmem>>, vector<1x32xf32>
    %cst_132 = arith.constant dense<0.000000e+00> : vector<8x32xf32>
    %165 = tpu.matmul %161, %162, %cst_132 {dimension_numbers = #tpu.dot_dimension_numbers<[1], [0], [0], [1], [0, 0, 1, 1], [], []>} : vector<8x32xf32>, vector<32x32xf32>, vector<8x32xf32> -> vector<8x32xf32>
    %cst_133 = arith.constant dense<0.000000e+00> : vector<8x32xf32>
    %166 = tpu.matmul %94, %163, %cst_133 {dimension_numbers = #tpu.dot_dimension_numbers<[1], [0], [0], [1], [0, 0, 1, 1], [], []>} : vector<8x16xf32>, vector<16x32xf32>, vector<8x32xf32> -> vector<8x32xf32>
    %167 = arith.addf %165, %166 : vector<8x32xf32>
    %168 = vector.broadcast %164 : vector<1x32xf32> to vector<8x32xf32>
    %169 = arith.addf %167, %168 : vector<8x32xf32>
    %cst_134 = arith.constant 0.000000e+00 : f32
    %170 = vector.broadcast %cst_134 : f32 to vector<8x32xf32>
    %171 = arith.maximumf %169, %170 : vector<8x32xf32>
    %c0_135 = arith.constant 0 : index
    %c0_136 = arith.constant 0 : index
    %172 = vector.load %arg49[%c0_135, %c0_136] : memref<32x64xf32, #tpu.memory_space<vmem>>, vector<32x64xf32>
    %c0_137 = arith.constant 0 : index
    %c0_138 = arith.constant 0 : index
    %173 = vector.load %arg50[%c0_137, %c0_138] : memref<1x64xf32, #tpu.memory_space<vmem>>, vector<1x64xf32>
    %cst_139 = arith.constant dense<0.000000e+00> : vector<8x64xf32>
    %174 = tpu.matmul %171, %172, %cst_139 {dimension_numbers = #tpu.dot_dimension_numbers<[1], [0], [0], [1], [0, 0, 1, 1], [], []>} : vector<8x32xf32>, vector<32x64xf32>, vector<8x64xf32> -> vector<8x64xf32>
    %175 = vector.broadcast %173 : vector<1x64xf32> to vector<8x64xf32>
    %176 = arith.addf %174, %175 : vector<8x64xf32>
    %cst_140 = arith.constant 0.000000e+00 : f32
    %177 = vector.broadcast %cst_140 : f32 to vector<8x64xf32>
    %178 = arith.cmpf oge, %176, %177 : vector<8x64xf32>
    %cst_141 = arith.constant 0.00999999977 : f32
    %179 = vector.broadcast %cst_141 : f32 to vector<8x64xf32>
    %180 = arith.mulf %179, %176 : vector<8x64xf32>
    %181 = arith.select %178, %176, %180 : vector<8x64xi1>, vector<8x64xf32>
    %c0_142 = arith.constant 0 : index
    %c0_143 = arith.constant 0 : index
    %182 = vector.load %arg51[%c0_142, %c0_143] : memref<64x32xf32, #tpu.memory_space<vmem>>, vector<64x32xf32>
    %c0_144 = arith.constant 0 : index
    %c0_145 = arith.constant 0 : index
    %183 = vector.load %arg52[%c0_144, %c0_145] : memref<1x32xf32, #tpu.memory_space<vmem>>, vector<1x32xf32>
    %cst_146 = arith.constant dense<0.000000e+00> : vector<8x32xf32>
    %184 = tpu.matmul %181, %182, %cst_146 {dimension_numbers = #tpu.dot_dimension_numbers<[1], [0], [0], [1], [0, 0, 1, 1], [], []>} : vector<8x64xf32>, vector<64x32xf32>, vector<8x32xf32> -> vector<8x32xf32>
    %185 = vector.broadcast %183 : vector<1x32xf32> to vector<8x32xf32>
    %186 = arith.addf %184, %185 : vector<8x32xf32>
    %cst_147 = arith.constant 0.000000e+00 : f32
    %187 = vector.broadcast %cst_147 : f32 to vector<8x32xf32>
    %188 = arith.maximumf %186, %187 : vector<8x32xf32>
    %c0_148 = arith.constant 0 : index
    %c0_149 = arith.constant 0 : index
    %189 = vector.load %arg53[%c0_148, %c0_149] : memref<32x6xf32, #tpu.memory_space<vmem>>, vector<32x6xf32>
    %c0_150 = arith.constant 0 : index
    %c0_151 = arith.constant 0 : index
    %190 = vector.load %arg54[%c0_150, %c0_151] : memref<1x6xf32, #tpu.memory_space<vmem>>, vector<1x6xf32>
    %cst_152 = arith.constant dense<0.000000e+00> : vector<8x6xf32>
    %191 = tpu.matmul %188, %189, %cst_152 {dimension_numbers = #tpu.dot_dimension_numbers<[1], [0], [0], [1], [0, 0, 1, 1], [], []>} : vector<8x32xf32>, vector<32x6xf32>, vector<8x6xf32> -> vector<8x6xf32>
    %192 = vector.broadcast %190 : vector<1x6xf32> to vector<8x6xf32>
    %193 = arith.addf %191, %192 : vector<8x6xf32>
    %c0_153 = arith.constant 0 : index
    %c0_154 = arith.constant 0 : index
    %194 = vector.load %arg55[%c0_153, %c0_154] : memref<32x128xf32, #tpu.memory_space<vmem>>, vector<32x128xf32>
    %c0_155 = arith.constant 0 : index
    %c0_156 = arith.constant 0 : index
    %195 = vector.load %arg56[%c0_155, %c0_156] : memref<16x128xf32, #tpu.memory_space<vmem>>, vector<16x128xf32>
    %c0_157 = arith.constant 0 : index
    %c0_158 = arith.constant 0 : index
    %196 = vector.load %arg57[%c0_157, %c0_158] : memref<16x128xf32, #tpu.memory_space<vmem>>, vector<16x128xf32>
    %c0_159 = arith.constant 0 : index
    %c0_160 = arith.constant 0 : index
    %197 = vector.load %arg58[%c0_159, %c0_160] : memref<6x128xf32, #tpu.memory_space<vmem>>, vector<6x128xf32>
    %cst_161 = arith.constant dense<0.000000e+00> : vector<8x128xf32>
    %198 = tpu.matmul %161, %194, %cst_161 {dimension_numbers = #tpu.dot_dimension_numbers<[1], [0], [0], [1], [0, 0, 1, 1], [], []>} : vector<8x32xf32>, vector<32x128xf32>, vector<8x128xf32> -> vector<8x128xf32>
    %cst_162 = arith.constant dense<0.000000e+00> : vector<8x128xf32>
    %199 = tpu.matmul %94, %195, %cst_162 {dimension_numbers = #tpu.dot_dimension_numbers<[1], [0], [0], [1], [0, 0, 1, 1], [], []>} : vector<8x16xf32>, vector<16x128xf32>, vector<8x128xf32> -> vector<8x128xf32>
    %200 = arith.addf %198, %199 : vector<8x128xf32>
    %cst_163 = arith.constant dense<0.000000e+00> : vector<8x128xf32>
    %201 = tpu.matmul %123, %196, %cst_163 {dimension_numbers = #tpu.dot_dimension_numbers<[1], [0], [0], [1], [0, 0, 1, 1], [], []>} : vector<8x16xf32>, vector<16x128xf32>, vector<8x128xf32> -> vector<8x128xf32>
    %202 = arith.addf %200, %201 : vector<8x128xf32>
    %cst_164 = arith.constant dense<0.000000e+00> : vector<8x128xf32>
    %203 = tpu.matmul %193, %197, %cst_164 {dimension_numbers = #tpu.dot_dimension_numbers<[1], [0], [0], [1], [0, 0, 1, 1], [], []>} : vector<8x6xf32>, vector<6x128xf32>, vector<8x128xf32> -> vector<8x128xf32>
    %204 = arith.addf %202, %203 : vector<8x128xf32>
    %c0_165 = arith.constant 0 : index
    %c0_166 = arith.constant 0 : index
    %205 = vector.load %arg59[%c0_165, %c0_166] : memref<8x128xf32, #tpu.memory_space<vmem>>, vector<8x128xf32>
    tpu.vector_store %arg59[%c0_165, %c0_166], %204 {strides = array<i32>} : memref<8x128xf32, #tpu.memory_space<vmem>>, vector<8x128xf32>,
    return
  }
  func.func @transform_0(%arg0: i32) -> (i32, i32) {
    %c0_i32 = arith.constant 0 : i32
    %c0_i32_0 = arith.constant 0 : i32
    return %arg0, %c0_i32 : i32, i32
  }
  func.func @transform_1(%arg0: i32) -> (i32, i32) {
    %c0_i32 = arith.constant 0 : i32
    %c0_i32_0 = arith.constant 0 : i32
    return %arg0, %c0_i32 : i32, i32
  }
  func.func @transform_2(%arg0: i32) -> (i32, i32) {
    %c0_i32 = arith.constant 0 : i32
    %c0_i32_0 = arith.constant 0 : i32
    return %arg0, %c0_i32 : i32, i32
  }
  func.func @transform_3(%arg0: i32) -> (i32, i32) {
    %c0_i32 = arith.constant 0 : i32
    %c0_i32_0 = arith.constant 0 : i32
    return %arg0, %c0_i32 : i32, i32
  }
  func.func @transform_4(%arg0: i32) -> (i32, i32) {
    %c0_i32 = arith.constant 0 : i32
    %c0_i32_0 = arith.constant 0 : i32
    return %arg0, %c0_i32 : i32, i32
  }
  func.func @transform_5(%arg0: i32) -> (i32, i32) {
    %c0_i32 = arith.constant 0 : i32
    %c0_i32_0 = arith.constant 0 : i32
    %c0_i32_1 = arith.constant 0 : i32
    return %c0_i32, %c0_i32_0 : i32, i32
  }
  func.func @transform_6(%arg0: i32) -> (i32, i32) {
    %c0_i32 = arith.constant 0 : i32
    %c0_i32_0 = arith.constant 0 : i32
    %c0_i32_1 = arith.constant 0 : i32
    return %c0_i32, %c0_i32_0 : i32, i32
  }
  func.func @transform_7(%arg0: i32) -> (i32, i32) {
    %c0_i32 = arith.constant 0 : i32
    %c0_i32_0 = arith.constant 0 : i32
    %c0_i32_1 = arith.constant 0 : i32
    return %c0_i32, %c0_i32_0 : i32, i32
  }
  func.func @transform_8(%arg0: i32) -> (i32, i32) {
    %c0_i32 = arith.constant 0 : i32
    %c0_i32_0 = arith.constant 0 : i32
    %c0_i32_1 = arith.constant 0 : i32
    return %c0_i32, %c0_i32_0 : i32, i32
  }
  func.func @transform_9(%arg0: i32) -> (i32, i32) {
    %c0_i32 = arith.constant 0 : i32
    %c0_i32_0 = arith.constant 0 : i32
    %c0_i32_1 = arith.constant 0 : i32
    return %c0_i32, %c0_i32_0 : i32, i32
  }
  func.func @transform_10(%arg0: i32) -> (i32, i32) {
    %c0_i32 = arith.constant 0 : i32
    %c0_i32_0 = arith.constant 0 : i32
    %c0_i32_1 = arith.constant 0 : i32
    return %c0_i32, %c0_i32_0 : i32, i32
  }
  func.func @transform_11(%arg0: i32) -> (i32, i32) {
    %c0_i32 = arith.constant 0 : i32
    %c0_i32_0 = arith.constant 0 : i32
    %c0_i32_1 = arith.constant 0 : i32
    return %c0_i32, %c0_i32_0 : i32, i32
  }
  func.func @transform_12(%arg0: i32) -> (i32, i32) {
    %c0_i32 = arith.constant 0 : i32
    %c0_i32_0 = arith.constant 0 : i32
    %c0_i32_1 = arith.constant 0 : i32
    return %c0_i32, %c0_i32_0 : i32, i32
  }
  func.func @transform_13(%arg0: i32) -> (i32, i32) {
    %c0_i32 = arith.constant 0 : i32
    %c0_i32_0 = arith.constant 0 : i32
    %c0_i32_1 = arith.constant 0 : i32
    return %c0_i32, %c0_i32_0 : i32, i32
  }
  func.func @transform_14(%arg0: i32) -> (i32, i32) {
    %c0_i32 = arith.constant 0 : i32
    %c0_i32_0 = arith.constant 0 : i32
    %c0_i32_1 = arith.constant 0 : i32
    return %c0_i32, %c0_i32_0 : i32, i32
  }
  func.func @transform_15(%arg0: i32) -> (i32, i32) {
    %c0_i32 = arith.constant 0 : i32
    %c0_i32_0 = arith.constant 0 : i32
    %c0_i32_1 = arith.constant 0 : i32
    return %c0_i32, %c0_i32_0 : i32, i32
  }
  func.func @transform_16(%arg0: i32) -> (i32, i32) {
    %c0_i32 = arith.constant 0 : i32
    %c0_i32_0 = arith.constant 0 : i32
    %c0_i32_1 = arith.constant 0 : i32
    return %c0_i32, %c0_i32_0 : i32, i32
  }
  func.func @transform_17(%arg0: i32) -> (i32, i32) {
    %c0_i32 = arith.constant 0 : i32
    %c0_i32_0 = arith.constant 0 : i32
    %c0_i32_1 = arith.constant 0 : i32
    return %c0_i32, %c0_i32_0 : i32, i32
  }
  func.func @transform_18(%arg0: i32) -> (i32, i32) {
    %c0_i32 = arith.constant 0 : i32
    %c0_i32_0 = arith.constant 0 : i32
    %c0_i32_1 = arith.constant 0 : i32
    return %c0_i32, %c0_i32_0 : i32, i32
  }
  func.func @transform_19(%arg0: i32) -> (i32, i32) {
    %c0_i32 = arith.constant 0 : i32
    %c0_i32_0 = arith.constant 0 : i32
    %c0_i32_1 = arith.constant 0 : i32
    return %c0_i32, %c0_i32_0 : i32, i32
  }
  func.func @transform_20(%arg0: i32) -> (i32, i32) {
    %c0_i32 = arith.constant 0 : i32
    %c0_i32_0 = arith.constant 0 : i32
    %c0_i32_1 = arith.constant 0 : i32
    return %c0_i32, %c0_i32_0 : i32, i32
  }
  func.func @transform_21(%arg0: i32) -> (i32, i32) {
    %c0_i32 = arith.constant 0 : i32
    %c0_i32_0 = arith.constant 0 : i32
    %c0_i32_1 = arith.constant 0 : i32
    return %c0_i32, %c0_i32_0 : i32, i32
  }
  func.func @transform_22(%arg0: i32) -> (i32, i32) {
    %c0_i32 = arith.constant 0 : i32
    %c0_i32_0 = arith.constant 0 : i32
    %c0_i32_1 = arith.constant 0 : i32
    return %c0_i32, %c0_i32_0 : i32, i32
  }
  func.func @transform_23(%arg0: i32) -> (i32, i32) {
    %c0_i32 = arith.constant 0 : i32
    %c0_i32_0 = arith.constant 0 : i32
    %c0_i32_1 = arith.constant 0 : i32
    return %c0_i32, %c0_i32_0 : i32, i32
  }
  func.func @transform_24(%arg0: i32) -> (i32, i32) {
    %c0_i32 = arith.constant 0 : i32
    %c0_i32_0 = arith.constant 0 : i32
    %c0_i32_1 = arith.constant 0 : i32
    return %c0_i32, %c0_i32_0 : i32, i32
  }
  func.func @transform_25(%arg0: i32) -> (i32, i32) {
    %c0_i32 = arith.constant 0 : i32
    %c0_i32_0 = arith.constant 0 : i32
    %c0_i32_1 = arith.constant 0 : i32
    return %c0_i32, %c0_i32_0 : i32, i32
  }
  func.func @transform_26(%arg0: i32) -> (i32, i32) {
    %c0_i32 = arith.constant 0 : i32
    %c0_i32_0 = arith.constant 0 : i32
    %c0_i32_1 = arith.constant 0 : i32
    return %c0_i32, %c0_i32_0 : i32, i32
  }
  func.func @transform_27(%arg0: i32) -> (i32, i32) {
    %c0_i32 = arith.constant 0 : i32
    %c0_i32_0 = arith.constant 0 : i32
    %c0_i32_1 = arith.constant 0 : i32
    return %c0_i32, %c0_i32_0 : i32, i32
  }
  func.func @transform_28(%arg0: i32) -> (i32, i32) {
    %c0_i32 = arith.constant 0 : i32
    %c0_i32_0 = arith.constant 0 : i32
    %c0_i32_1 = arith.constant 0 : i32
    return %c0_i32, %c0_i32_0 : i32, i32
  }
  func.func @transform_29(%arg0: i32) -> (i32, i32) {
    %c0_i32 = arith.constant 0 : i32
    %c0_i32_0 = arith.constant 0 : i32
    %c0_i32_1 = arith.constant 0 : i32
    return %c0_i32, %c0_i32_0 : i32, i32
  }
  func.func @transform_30(%arg0: i32) -> (i32, i32) {
    %c0_i32 = arith.constant 0 : i32
    %c0_i32_0 = arith.constant 0 : i32
    %c0_i32_1 = arith.constant 0 : i32
    return %c0_i32, %c0_i32_0 : i32, i32
  }
  func.func @transform_31(%arg0: i32) -> (i32, i32) {
    %c0_i32 = arith.constant 0 : i32
    %c0_i32_0 = arith.constant 0 : i32
    %c0_i32_1 = arith.constant 0 : i32
    return %c0_i32, %c0_i32_0 : i32, i32
  }
  func.func @transform_32(%arg0: i32) -> (i32, i32) {
    %c0_i32 = arith.constant 0 : i32
    %c0_i32_0 = arith.constant 0 : i32
    %c0_i32_1 = arith.constant 0 : i32
    return %c0_i32, %c0_i32_0 : i32, i32
  }
  func.func @transform_33(%arg0: i32) -> (i32, i32) {
    %c0_i32 = arith.constant 0 : i32
    %c0_i32_0 = arith.constant 0 : i32
    %c0_i32_1 = arith.constant 0 : i32
    return %c0_i32, %c0_i32_0 : i32, i32
  }
  func.func @transform_34(%arg0: i32) -> (i32, i32) {
    %c0_i32 = arith.constant 0 : i32
    %c0_i32_0 = arith.constant 0 : i32
    %c0_i32_1 = arith.constant 0 : i32
    return %c0_i32, %c0_i32_0 : i32, i32
  }
  func.func @transform_35(%arg0: i32) -> (i32, i32) {
    %c0_i32 = arith.constant 0 : i32
    %c0_i32_0 = arith.constant 0 : i32
    %c0_i32_1 = arith.constant 0 : i32
    return %c0_i32, %c0_i32_0 : i32, i32
  }
  func.func @transform_36(%arg0: i32) -> (i32, i32) {
    %c0_i32 = arith.constant 0 : i32
    %c0_i32_0 = arith.constant 0 : i32
    %c0_i32_1 = arith.constant 0 : i32
    return %c0_i32, %c0_i32_0 : i32, i32
  }
  func.func @transform_37(%arg0: i32) -> (i32, i32) {
    %c0_i32 = arith.constant 0 : i32
    %c0_i32_0 = arith.constant 0 : i32
    %c0_i32_1 = arith.constant 0 : i32
    return %c0_i32, %c0_i32_0 : i32, i32
  }
  func.func @transform_38(%arg0: i32) -> (i32, i32) {
    %c0_i32 = arith.constant 0 : i32
    %c0_i32_0 = arith.constant 0 : i32
    %c0_i32_1 = arith.constant 0 : i32
    return %c0_i32, %c0_i32_0 : i32, i32
  }
  func.func @transform_39(%arg0: i32) -> (i32, i32) {
    %c0_i32 = arith.constant 0 : i32
    %c0_i32_0 = arith.constant 0 : i32
    %c0_i32_1 = arith.constant 0 : i32
    return %c0_i32, %c0_i32_0 : i32, i32
  }
  func.func @transform_40(%arg0: i32) -> (i32, i32) {
    %c0_i32 = arith.constant 0 : i32
    %c0_i32_0 = arith.constant 0 : i32
    %c0_i32_1 = arith.constant 0 : i32
    return %c0_i32, %c0_i32_0 : i32, i32
  }
  func.func @transform_41(%arg0: i32) -> (i32, i32) {
    %c0_i32 = arith.constant 0 : i32
    %c0_i32_0 = arith.constant 0 : i32
    %c0_i32_1 = arith.constant 0 : i32
    return %c0_i32, %c0_i32_0 : i32, i32
  }
  func.func @transform_42(%arg0: i32) -> (i32, i32) {
    %c0_i32 = arith.constant 0 : i32
    %c0_i32_0 = arith.constant 0 : i32
    %c0_i32_1 = arith.constant 0 : i32
    return %c0_i32, %c0_i32_0 : i32, i32
  }
  func.func @transform_43(%arg0: i32) -> (i32, i32) {
    %c0_i32 = arith.constant 0 : i32
    %c0_i32_0 = arith.constant 0 : i32
    %c0_i32_1 = arith.constant 0 : i32
    return %c0_i32, %c0_i32_0 : i32, i32
  }
  func.func @transform_44(%arg0: i32) -> (i32, i32) {
    %c0_i32 = arith.constant 0 : i32
    %c0_i32_0 = arith.constant 0 : i32
    %c0_i32_1 = arith.constant 0 : i32
    return %c0_i32, %c0_i32_0 : i32, i32
  }
  func.func @transform_45(%arg0: i32) -> (i32, i32) {
    %c0_i32 = arith.constant 0 : i32
    %c0_i32_0 = arith.constant 0 : i32
    %c0_i32_1 = arith.constant 0 : i32
    return %c0_i32, %c0_i32_0 : i32, i32
  }
  func.func @transform_46(%arg0: i32) -> (i32, i32) {
    %c0_i32 = arith.constant 0 : i32
    %c0_i32_0 = arith.constant 0 : i32
    %c0_i32_1 = arith.constant 0 : i32
    return %c0_i32, %c0_i32_0 : i32, i32
  }
  func.func @transform_47(%arg0: i32) -> (i32, i32) {
    %c0_i32 = arith.constant 0 : i32
    %c0_i32_0 = arith.constant 0 : i32
    %c0_i32_1 = arith.constant 0 : i32
    return %c0_i32, %c0_i32_0 : i32, i32
  }
  func.func @transform_48(%arg0: i32) -> (i32, i32) {
    %c0_i32 = arith.constant 0 : i32
    %c0_i32_0 = arith.constant 0 : i32
    %c0_i32_1 = arith.constant 0 : i32
    return %c0_i32, %c0_i32_0 : i32, i32
  }
  func.func @transform_49(%arg0: i32) -> (i32, i32) {
    %c0_i32 = arith.constant 0 : i32
    %c0_i32_0 = arith.constant 0 : i32
    %c0_i32_1 = arith.constant 0 : i32
    return %c0_i32, %c0_i32_0 : i32, i32
  }
  func.func @transform_50(%arg0: i32) -> (i32, i32) {
    %c0_i32 = arith.constant 0 : i32
    %c0_i32_0 = arith.constant 0 : i32
    %c0_i32_1 = arith.constant 0 : i32
    return %c0_i32, %c0_i32_0 : i32, i32
  }
  func.func @transform_51(%arg0: i32) -> (i32, i32) {
    %c0_i32 = arith.constant 0 : i32
    %c0_i32_0 = arith.constant 0 : i32
    %c0_i32_1 = arith.constant 0 : i32
    return %c0_i32, %c0_i32_0 : i32, i32
  }
  func.func @transform_52(%arg0: i32) -> (i32, i32) {
    %c0_i32 = arith.constant 0 : i32
    %c0_i32_0 = arith.constant 0 : i32
    %c0_i32_1 = arith.constant 0 : i32
    return %c0_i32, %c0_i32_0 : i32, i32
  }
  func.func @transform_53(%arg0: i32) -> (i32, i32) {
    %c0_i32 = arith.constant 0 : i32
    %c0_i32_0 = arith.constant 0 : i32
    %c0_i32_1 = arith.constant 0 : i32
    return %c0_i32, %c0_i32_0 : i32, i32
  }
  func.func @transform_54(%arg0: i32) -> (i32, i32) {
    %c0_i32 = arith.constant 0 : i32
    %c0_i32_0 = arith.constant 0 : i32
    %c0_i32_1 = arith.constant 0 : i32
    return %c0_i32, %c0_i32_0 : i32, i32
  }
  func.func @transform_55(%arg0: i32) -> (i32, i32) {
    %c0_i32 = arith.constant 0 : i32
    %c0_i32_0 = arith.constant 0 : i32
    %c0_i32_1 = arith.constant 0 : i32
    return %c0_i32, %c0_i32_0 : i32, i32
  }
  func.func @transform_56(%arg0: i32) -> (i32, i32) {
    %c0_i32 = arith.constant 0 : i32
    %c0_i32_0 = arith.constant 0 : i32
    %c0_i32_1 = arith.constant 0 : i32
    return %c0_i32, %c0_i32_0 : i32, i32
  }
  func.func @transform_57(%arg0: i32) -> (i32, i32) {
    %c0_i32 = arith.constant 0 : i32
    %c0_i32_0 = arith.constant 0 : i32
    %c0_i32_1 = arith.constant 0 : i32
    return %c0_i32, %c0_i32_0 : i32, i32
  }
  func.func @transform_58(%arg0: i32) -> (i32, i32) {
    %c0_i32 = arith.constant 0 : i32
    %c0_i32_0 = arith.constant 0 : i32
    return %arg0, %c0_i32 : i32, i32
  }
}

</mosaic_0001>

<bundles_post_ra>
// kernel: tpu_custom_call.1
= control target key start
LH: loop header
LB: loop body
LE: loop exit
PB: predicated region body
PF: predicated region fallthrough
CT: control target
= control target key end

     0   :  { %s6812_s6 = smov 1   ;;  %s6813_s10 = smov 2   ;;  %s8160_s0 = inlined_call_operand.smem [shape: u32[59], index: -1, kind: input, shape index: {}] }
   0x1   :  { %s6895_s5 = sld [smem:[%s8160_s0]]   ;;  %s6814_s14 = smov 3  }
   0x2   :  { %s6900_s9 = sld [smem:[%s8160_s0 + %s6812_s6]]   ;;  %s6815_s18 = smov 4  }
   0x3   :  { %s6905_s13 = sld [smem:[%s8160_s0 + %s6813_s10]]   ;;  %s6816_s22 = smov 5  }
   0x4   :  { %s6910_s17 = sld [smem:[%s8160_s0 + %s6814_s14]]   ;;  %s6817_s26 = smov 6  }
   0x5   :  { %s6915_s21 = sld [smem:[%s8160_s0 + %s6815_s18]]   ;;  %s6818_s30 = smov 7  }
   0x6   :  { %s6920_s25 = sld [smem:[%s8160_s0 + %s6816_s22]]   ;;  %s6819_s4 = smov 8  }
   0x7   :  { %s6925_s29 = sld [smem:[%s8160_s0 + %s6817_s26]]   ;;  %s6820_s10 = smov 9  }
   0x8   :  { %8187 = sst [smem:[#allocation24_spill]] %s6900_s9  ;;  %s6821_s15 = smov 10  }
   0x9   :  { %8188 = sst [smem:[#allocation25_spill]] %s6905_s13  ;;  %s6822_s20 = smov 11  }
   0xa   :  { %8189 = sst [smem:[#allocation26_spill]] %s6910_s17  ;;  %s6823_s26 = smov 12  }
   0xb   :  { %8190 = sst [smem:[#allocation27_spill]] %s6915_s21  ;;  %s6824_s1 = smov 13  }
   0xc   :  { %s6930_s3 = sld [smem:[%s8160_s0 + %s6818_s30]]   ;;  %s6825_s7 = smov 14  }
   0xd   :  { %s6935_s8 = sld [smem:[%s8160_s0 + %s6819_s4]]   ;;  %s6827_s22 = smov 16  }
   0xe   :  { %s6940_s14 = sld [smem:[%s8160_s0 + %s6820_s10]]   ;;  %s6828_s28 = smov 17  }
   0xf   :  { %s6945_s19 = sld [smem:[%s8160_s0 + %s6821_s15]]   ;;  %s6826_s15 = smov 15  }
  0x10   :  { %s6950_s24 = sld [smem:[%s8160_s0 + %s6822_s20]]  }
  0x11   :  { %s6955_s30 = sld [smem:[%s8160_s0 + %s6823_s26]]  }
  0x12   :  { %s6960_s6 = sld [smem:[%s8160_s0 + %s6824_s1]]  }
  0x13   :  { %8191 = sst [smem:[#allocation28_spill]] %s6935_s8 }
  0x14   :  { %s6965_s12 = sld [smem:[%s8160_s0 + %s6825_s7]]   ;;  %s6829_s7 = smov 18  }
  0x15   :  { %8192 = sst [smem:[#allocation29_spill]] %s6945_s19 }
  0x16   :  { %8193 = sst [smem:[#allocation30_spill]] %s6950_s24 }
  0x17   :  { %8194 = sst [smem:[#allocation31_spill]] %s6955_s30 }
  0x18   :  { %8195 = sst [smem:[#allocation32_spill]] %s6960_s6 }
  0x19   :  { %s6970_s20 = sld [smem:[%s8160_s0 + %s6826_s15]]   ;;  %s6830_s15 = smov 19  }
  0x1a   :  { %8196 = sst [smem:[#allocation33_spill]] %s6965_s12 }
  0x1b   :  { %s6975_s27 = sld [smem:[%s8160_s0 + %s6827_s22]]   ;;  %s6831_s22 = smov 20  }
  0x1c   :  { %s6980_s4 = sld [smem:[%s8160_s0 + %s6828_s28]]   ;;  %s6832_s28 = smov 21  }
  0x1d   :  { %s6985_s13 = sld [smem:[%s8160_s0 + %s6829_s7]]   ;;  %s6833_s7 = smov 22  }
  0x1e   :  { %s6990_s21 = sld [smem:[%s8160_s0 + %s6830_s15]]   ;;  %s6834_s15 = smov 23  }
  0x1f   :  { %8197 = sst [smem:[#allocation34_spill]] %s6970_s20 }
  0x20   :  { %s6995_s12 = sld [smem:[%s8160_s0 + %s6831_s22]]   ;;  %s6835_s22 = smov 24  }
  0x21   :  { %8198 = sst [smem:[#allocation35_spill]] %s6975_s27 }
  0x22   :  { %8199 = sst [smem:[#allocation36_spill]] %s6980_s4 }
  0x23   :  { %8200 = sst [smem:[#allocation37_spill]] %s6985_s13 }
  0x24   :  { %8201 = sst [smem:[#allocation38_spill]] %s6990_s21 }
  0x25   :  { %s7000_s4 = sld [smem:[%s8160_s0 + %s6832_s28]]   ;;  %s6836_s28 = smov 25  }
  0x26   :  { %8202 = sst [smem:[#allocation39_spill]] %s6995_s12 }
  0x27   :  { %s7005_s13 = sld [smem:[%s8160_s0 + %s6833_s7]]   ;;  %s6837_s7 = smov 26  }
  0x28   :  { %s7010_s21 = sld [smem:[%s8160_s0 + %s6834_s15]]   ;;  %s6838_s15 = smov 27  }
  0x29   :  { %s7015_s12 = sld [smem:[%s8160_s0 + %s6835_s22]]   ;;  %s6839_s22 = smov 28  }
  0x2b   :  { %8203 = sst [smem:[#allocation40_spill]] %s7000_s4 }
  0x2c   :  { %s7020_s4 = sld [smem:[%s8160_s0 + %s6836_s28]]   ;;  %s6840_s28 = smov 29  }
  0x2d   :  { %8204 = sst [smem:[#allocation41_spill]] %s7005_s13 }
  0x2e   :  { %8205 = sst [smem:[#allocation42_spill]] %s7010_s21 }
  0x2f   :  { %8206 = sst [smem:[#allocation43_spill]] %s7015_s12 }
  0x30   :  { %s7025_s13 = sld [smem:[%s8160_s0 + %s6837_s7]]   ;;  %s6841_s7 = smov 30  }
  0x31   :  { %s7030_s21 = sld [smem:[%s8160_s0 + %s6838_s15]]   ;;  %s6842_s15 = smov 31  }
  0x32   :  { %8207 = sst [smem:[#allocation44_spill]] %s7020_s4 }
  0x33   :  { %s7035_s12 = sld [smem:[%s8160_s0 + %s6839_s22]]   ;;  %s6843_s22 = smov 32  }
  0x34   :  { %s7040_s4 = sld [smem:[%s8160_s0 + %s6840_s28]]   ;;  %s6844_s28 = smov 33  }
  0x36   :  { %8208 = sst [smem:[#allocation45_spill]] %s7025_s13 }
  0x37   :  { %8209 = sst [smem:[#allocation46_spill]] %s7030_s21 }
  0x38   :  { %s7045_s13 = sld [smem:[%s8160_s0 + %s6841_s7]]   ;;  %s6845_s7 = smov 34  }
  0x39   :  { %8210 = sst [smem:[#allocation47_spill]] %s7035_s12 }
  0x3a   :  { %8211 = sst [smem:[#allocation48_spill]] %s7040_s4 }
  0x3b   :  { %s7050_s21 = sld [smem:[%s8160_s0 + %s6842_s15]]   ;;  %s6846_s15 = smov 35  }
  0x3c   :  { %s7055_s12 = sld [smem:[%s8160_s0 + %s6843_s22]]   ;;  %s6847_s22 = smov 36  }
  0x3d   :  { %s7060_s4 = sld [smem:[%s8160_s0 + %s6844_s28]]   ;;  %s6848_s28 = smov 37  }
  0x3e   :  { %8212 = sst [smem:[#allocation49_spill]] %s7045_s13 }
  0x3f   :  { %s7065_s13 = sld [smem:[%s8160_s0 + %s6845_s7]]   ;;  %s6849_s7 = smov 38  }
  0x41   :  { %8213 = sst [smem:[#allocation50_spill]] %s7050_s21 }
  0x42   :  { %8214 = sst [smem:[#allocation51_spill]] %s7055_s12 }
  0x43   :  { %8215 = sst [smem:[#allocation52_spill]] %s7060_s4 }
  0x44   :  { %s7070_s21 = sld [smem:[%s8160_s0 + %s6846_s15]]   ;;  %s6850_s15 = smov 39  }
  0x45   :  { %8216 = sst [smem:[#allocation53_spill]] %s7065_s13 }
  0x46   :  { %s7075_s12 = sld [smem:[%s8160_s0 + %s6847_s22]]   ;;  %s6851_s22 = smov 40  }
  0x47   :  { %s7080_s4 = sld [smem:[%s8160_s0 + %s6848_s28]]   ;;  %s6852_s28 = smov 41  }
  0x48   :  { %s7085_s13 = sld [smem:[%s8160_s0 + %s6849_s7]]   ;;  %s6853_s7 = smov 42  }
  0x49   :  { %s7095_s27 = sld [smem:[%s8160_s0 + %s6851_s22]]   ;;  %s6855_s22 = smov 44  }
  0x4a   :  { %8217 = sst [smem:[#allocation54_spill]] %s7070_s21 }
  0x4b   :  { %s7090_s21 = sld [smem:[%s8160_s0 + %s6850_s15]]   ;;  %s6854_s15 = smov 43  }
  0x4c   :  { %s7105_s17 = sld [smem:[%s8160_s0 + %s6853_s7]]   ;;  %s6857_s7 = smov 46  }
  0x4d   :  { %8218 = sst [smem:[#allocation55_spill]] %s7080_s4 }
  0x4e   :  { %s7100_s4 = sld [smem:[%s8160_s0 + %s6852_s28]]   ;;  %s6856_s28 = smov 45  }
  0x4f   :  { %s7115_s20 = sld [smem:[%s8160_s0 + %s6855_s22]]   ;;  %s6859_s22 = smov 48  }
  0x50   :  { %s7135_s19 = sld [smem:[%s8160_s0 + %s6859_s22]]   ;;  %s6863_s22 = smov 52  }
  0x51   :  { %8219 = sst [smem:[#allocation56_spill]] %s7090_s21 }
  0x52   :  { %8221 = sst [smem:[#allocation58_spill]] %s7105_s17 }
  0x53   :  { %s7110_s21 = sld [smem:[%s8160_s0 + %s6854_s15]]   ;;  %s6858_s15 = smov 47  }
  0x54   :  { %8220 = sst [smem:[#allocation57_spill]] %s7100_s4 }
  0x55   :  { %s7120_s4 = sld [smem:[%s8160_s0 + %s6856_s28]]   ;;  %s6860_s28 = smov 49  }
  0x56   :  { %s7125_s17 = sld [smem:[%s8160_s0 + %s6857_s7]]   ;;  %s6861_s7 = smov 50  }
  0x57   :  { %s7130_s30 = sld [smem:[%s8160_s0 + %s6858_s15]]   ;;  %s6862_s15 = smov 51  }
  0x58   :  { %8224 = sst [smem:[#allocation61_spill]] %s7135_s19 }
  0x59   :  { %s7150_s6 = sld [smem:[%s8160_s0 + %s6862_s15]]   ;;  %s6866_s15 = smov 55  }
  0x5a   :  { %s7155_s19 = sld [smem:[%s8160_s0 + %s6863_s22]]   ;;  %s6867_s22 = smov 56  }
  0x5b   :  { %8222 = sst [smem:[#allocation59_spill]] %s7120_s4 }
  0x5c   :  { %8223 = sst [smem:[#allocation60_spill]] %s7125_s17 }
  0x5d   :  { %s7140_s4 = sld [smem:[%s8160_s0 + %s6860_s28]]   ;;  %s6864_s28 = smov 53  }
  0x5e   :  { %s7145_s17 = sld [smem:[%s8160_s0 + %s6861_s7]]   ;;  %s6865_s7 = smov 54  }
  0x5f   :  { %s7160_s8 = sld [smem:[%s8160_s0 + %s6864_s28]]   ;;  %s6868_s28 = smov 57  }
  0x60   :  { %8226 = sst [smem:[#allocation63_spill]] %s7155_s19 }
  0x61   :  { %s7170_s24 = sld [smem:[%s8160_s0 + %s6866_s15]]  }
  0x62   :  { %s7175_s19 = sld [smem:[%s8160_s0 + %s6867_s22]]  }
  0x63   :  { %s7180_s9 = sld [smem:[%s8160_s0 + %s6868_s28]]  }
  0x64   :  { %8225 = sst [smem:[#allocation62_spill]] %s7145_s17 }
  0x65   :  { %s7165_s17 = sld [smem:[%s8160_s0 + %s6865_s7]]   ;;  %s6869_s7 = smov 58  }
  0x6b   :  { %8227 = sst [smem:[#allocation64_spill]] %s7165_s17 }
  0x6c   :  { %s7185_s17 = sld [smem:[%s8160_s0 + %s6869_s7]]  }
  0x6d   :  { %122 = vsyncpa [#allocation3], 0 }
  0x6e   :  { %123 = vsyncpa [#allocation6], 0 }
  0x6f   :  { %124 = vsyncpa [#allocation9], 0 }
  0x70   :  { %125 = vsyncpa [#allocation12], 0 }
  0x71   :  { %126 = vsyncpa [#allocation15], 0 }
  0x72   :  { %127 = vsyncpa [#allocation4], 0  ;;  %s6870_s15 = smov [#allocation5]   ;;  %s6871_s18 = smov [#allocation8]  }
  0x73   :  { %s218_s16 = sshll.u32 %s6870_s15, 4  ;;  %s244_s22 = sshll.u32 %s6871_s18, 4  ;;  %s219_s16 = int_to_ptr.vmem [resolvable:$true] %s218_s16  ;;  %s245_s22 = int_to_ptr.vmem [resolvable:$true] %s244_s22 }
  0x74   :  { %s6580_s23 = scalar_lea.hbm %s7085_s13, 16 }
  0x75   :  { %p6581_p0 = scmp.ne.s32.totalorder %s7085_s13, %s6580_s23  ;;  %p6584_p1 = scmp.lt.u32.totalorder %s6580_s23, %s7085_s13 }
  0x77   :  { %p6586_p2 = pnand %p6584_p1, %p6581_p0 }
  0x79   :  { %6589 = shalt.err (!%p6586_p2)
}
  0x7a   :  { %s6590_s0 = scalar_lea.vmem %s219_s16, 16  ;;  %s6594_s26 = scalar_lea.vmem %s219_s16, 32 }
  0x7b   :  { %p6591_p3 = scmp.ne.s32.totalorder %s219_s16, %s6590_s0  ;;  %p6595_p4 = scmp.lt.s32.totalorder %s219_s16, %s219_s16 }
  0x7c   :  { %p6596_p5 = scmp.lt.s32.totalorder %s6594_s26, %s6590_s0 }
  0x7e   :  { %p6597_p6 = por %p6596_p5, %p6595_p4 }
  0x80   :  { %p6598_p7 = pnand %p6597_p6, %p6591_p3 }
  0x82   :  { %6601 = shalt.err (!%p6598_p7)
}
  0x83   :  { %221 = dma.hbm_to_vmem [thread:$0]  %s7085_s13, 16, %s219_s16, [#allocation6]  }
  0x84   :  { %s6602_s28 = scalar_lea.hbm %s7110_s21, 16 }
  0x85   :  { %p6603_p8 = scmp.ne.s32.totalorder %s7110_s21, %s6602_s28  ;;  %p6606_p9 = scmp.lt.u32.totalorder %s6602_s28, %s7110_s21 }
  0x87   :  { %p6608_p10 = pnand %p6606_p9, %p6603_p8 }
  0x89   :  { %6611 = shalt.err (!%p6608_p10)
}
  0x8a   :  { %s6612_s1 = scalar_lea.vmem %s245_s22, 16  ;;  %s6616_s2 = scalar_lea.vmem %s245_s22, 32 }
  0x8b   :  { %p6613_p11 = scmp.ne.s32.totalorder %s245_s22, %s6612_s1  ;;  %p6617_p12 = scmp.lt.s32.totalorder %s245_s22, %s245_s22 }
  0x8c   :  { %p6618_p13 = scmp.lt.s32.totalorder %s6616_s2, %s6612_s1 }
  0x8e   :  { %p6619_p0 = por %p6618_p13, %p6617_p12 }
  0x90   :  { %p6620_p1 = pnand %p6619_p0, %p6613_p11 }
  0x92   :  { %6623 = shalt.err (!%p6620_p1)
}
  0x93   :  { %247 = dma.hbm_to_vmem [thread:$0]  %s7110_s21, 16, %s245_s22, [#allocation9]  }
  0x94   :  { %s6872_s7 = smov [#allocation11]   ;;  %s6873_s10 = smov [#allocation14]  }
  0x95   :  { %s268_s13 = sshll.u32 %s6872_s7, 4  ;;  %s292_s11 = sshll.u32 %s6873_s10, 4  ;;  %s269_s13 = int_to_ptr.vmem [resolvable:$true] %s268_s13  ;;  %s293_s11 = int_to_ptr.vmem [resolvable:$true] %s292_s11 }
  0x96   :  { %s6624_s15 = scalar_lea.hbm %s7130_s30, 16 }
  0x97   :  { %p6625_p2 = scmp.ne.s32.totalorder %s7130_s30, %s6624_s15  ;;  %p6628_p3 = scmp.lt.u32.totalorder %s6624_s15, %s7130_s30 }
  0x99   :  { %p6630_p4 = pnand %p6628_p3, %p6625_p2 }
  0x9b   :  { %6633 = shalt.err (!%p6630_p4)
}
  0x9c   :  { %s6634_s16 = scalar_lea.vmem %s269_s13, 16  ;;  %s6638_s18 = scalar_lea.vmem %s269_s13, 32 }
  0x9d   :  { %p6635_p5 = scmp.ne.s32.totalorder %s269_s13, %s6634_s16  ;;  %p6639_p6 = scmp.lt.s32.totalorder %s269_s13, %s269_s13 }
  0x9e   :  { %p6640_p7 = scmp.lt.s32.totalorder %s6638_s18, %s6634_s16 }
  0xa0   :  { %p6641_p8 = por %p6640_p7, %p6639_p6 }
  0xa2   :  { %p6642_p9 = pnand %p6641_p8, %p6635_p5 }
  0xa4   :  { %6645 = shalt.err (!%p6642_p9)
}
  0xa5   :  { %271 = dma.hbm_to_vmem [thread:$0]  %s7130_s30, 16, %s269_s13, [#allocation12]  }
  0xa6   :  { %s6646_s21 = scalar_lea.hbm %s7150_s6, 16 }
  0xa7   :  { %p6647_p10 = scmp.ne.s32.totalorder %s7150_s6, %s6646_s21  ;;  %p6650_p11 = scmp.lt.u32.totalorder %s6646_s21, %s7150_s6 }
  0xa9   :  { %p6652_p12 = pnand %p6650_p11, %p6647_p10 }
  0xab   :  { %6655 = shalt.err (!%p6652_p12)
}
  0xac   :  { %s6656_s22 = scalar_lea.vmem %s293_s11, 16  ;;  %s6660_s23 = scalar_lea.vmem %s293_s11, 32 }
  0xad   :  { %p6657_p13 = scmp.ne.s32.totalorder %s293_s11, %s6656_s22  ;;  %p6661_p0 = scmp.lt.s32.totalorder %s293_s11, %s293_s11 }
  0xae   :  { %p6662_p1 = scmp.lt.s32.totalorder %s6660_s23, %s6656_s22 }
  0xb0   :  { %p6663_p2 = por %p6662_p1, %p6661_p0 }
  0xb2   :  { %p6664_p3 = pnand %p6663_p2, %p6657_p13 }
  0xb4   :  { %6667 = shalt.err (!%p6664_p3)
}
  0xb5   :  { %295 = dma.hbm_to_vmem [thread:$0]  %s7150_s6, 16, %s293_s11, [#allocation15]  }
  0xb6   :  { %s6874_s0 = smov [#allocation2]   ;;  %s6875_s26 = smov [#allocation7]  }
  0xb7   :  { %s206_s30 = sshll.u32 %s6874_s0, 4  ;;  %s230_s28 = sshll.u32 %s6875_s26, 4  ;;  %s207_s30 = int_to_ptr.vmem [resolvable:$true] %s206_s30  ;;  %s231_s28 = int_to_ptr.vmem [resolvable:$true] %s230_s28 }
  0xb8   :  { %s6668_s1 = scalar_lea.hbm %s7075_s12, 16 }
  0xb9   :  { %p6669_p4 = scmp.ne.s32.totalorder %s7075_s12, %s6668_s1  ;;  %p6672_p5 = scmp.lt.u32.totalorder %s6668_s1, %s7075_s12 }
  0xbb   :  { %p6674_p6 = pnand %p6672_p5, %p6669_p4 }
  0xbd   :  { %6677 = shalt.err (!%p6674_p6)
}
  0xbe   :  { %s6678_s2 = scalar_lea.vmem %s207_s30, 16  ;;  %s6682_s7 = scalar_lea.vmem %s207_s30, 32 }
  0xbf   :  { %p6679_p7 = scmp.ne.s32.totalorder %s207_s30, %s6678_s2  ;;  %p6683_p8 = scmp.lt.s32.totalorder %s207_s30, %s207_s30 }
  0xc0   :  { %p6684_p9 = scmp.lt.s32.totalorder %s6682_s7, %s6678_s2 }
  0xc2   :  { %p6685_p10 = por %p6684_p9, %p6683_p8 }
  0xc4   :  { %p6686_p11 = pnand %p6685_p10, %p6679_p7 }
  0xc6   :  { %6689 = shalt.err (!%p6686_p11)
}
  0xc7   :  { %209 = dma.hbm_to_vmem [thread:$0]  %s7075_s12, 16, %s207_s30, [#allocation3]  }
  0xc8   :  { %s6690_s6 = scalar_lea.hbm %s7095_s27, 16 }
  0xc9   :  { %p6691_p12 = scmp.ne.s32.totalorder %s7095_s27, %s6690_s6  ;;  %p6694_p13 = scmp.lt.u32.totalorder %s6690_s6, %s7095_s27 }
  0xcb   :  { %p6696_p0 = pnand %p6694_p13, %p6691_p12 }
  0xcd   :  { %6699 = shalt.err (!%p6696_p0)
}
  0xce   :  { %s6700_s13 = scalar_lea.vmem %s231_s28, 16  ;;  %s6704_s10 = scalar_lea.vmem %s231_s28, 32 }
  0xcf   :  { %p6701_p1 = scmp.ne.s32.totalorder %s231_s28, %s6700_s13  ;;  %p6705_p2 = scmp.lt.s32.totalorder %s231_s28, %s231_s28 }
  0xd0   :  { %p6706_p3 = scmp.lt.s32.totalorder %s6704_s10, %s6700_s13 }
  0xd2   :  { %p6707_p4 = por %p6706_p3, %p6705_p2 }
  0xd4   :  { %p6708_p5 = pnand %p6707_p4, %p6701_p1 }
  0xd6   :  { %6711 = shalt.err (!%p6708_p5)
}
  0xd7   :  { %233 = dma.hbm_to_vmem [thread:$0]  %s7095_s27, 16, %s231_s28, [#allocation6]  }
  0xd8   :  { %s6876_s11 = smov [#allocation10]   ;;  %s6877_s15 = smov [#allocation13]  }
  0xd9   :  { %s254_s12 = sshll.u32 %s6876_s11, 4  ;;  %s280_s16 = sshll.u32 %s6877_s15, 4  ;;  %s255_s12 = int_to_ptr.vmem [resolvable:$true] %s254_s12  ;;  %s281_s16 = int_to_ptr.vmem [resolvable:$true] %s280_s16 }
  0xda   :  { %s6712_s18 = scalar_lea.hbm %s7115_s20, 16 }
  0xdb   :  { %p6713_p6 = scmp.ne.s32.totalorder %s7115_s20, %s6712_s18  ;;  %p6716_p7 = scmp.lt.u32.totalorder %s6712_s18, %s7115_s20 }
  0xdd   :  { %p6718_p8 = pnand %p6716_p7, %p6713_p6 }
  0xdf   :  { %6721 = shalt.err (!%p6718_p8)
}
  0xe0   :  { %s6722_s21 = scalar_lea.vmem %s255_s12, 16  ;;  %s6726_s22 = scalar_lea.vmem %s255_s12, 32 }
  0xe1   :  { %p6723_p9 = scmp.ne.s32.totalorder %s255_s12, %s6722_s21  ;;  %p6727_p10 = scmp.lt.s32.totalorder %s255_s12, %s255_s12 }
  0xe2   :  { %p6728_p11 = scmp.lt.s32.totalorder %s6726_s22, %s6722_s21 }
  0xe4   :  { %p6729_p12 = por %p6728_p11, %p6727_p10 }
  0xe6   :  { %p6730_p13 = pnand %p6729_p12, %p6723_p9 }
  0xe8   :  { %6733 = shalt.err (!%p6730_p13)
}
  0xe9   :  { %257 = dma.hbm_to_vmem [thread:$0]  %s7115_s20, 16, %s255_s12, [#allocation9]  }
  0xea   :  { %s6734_s27 = scalar_lea.hbm %s7140_s4, 16 }
  0xeb   :  { %p6735_p0 = scmp.ne.s32.totalorder %s7140_s4, %s6734_s27  ;;  %p6738_p1 = scmp.lt.u32.totalorder %s6734_s27, %s7140_s4 }
  0xed   :  { %p6740_p2 = pnand %p6738_p1, %p6735_p0 }
  0xef   :  { %6743 = shalt.err (!%p6740_p2)
}
  0xf0   :  { %s6744_s23 = scalar_lea.vmem %s281_s16, 16  ;;  %s6748_s0 = scalar_lea.vmem %s281_s16, 32 }
  0xf1   :  { %p6745_p3 = scmp.ne.s32.totalorder %s281_s16, %s6744_s23  ;;  %p6749_p4 = scmp.lt.s32.totalorder %s281_s16, %s281_s16 }
  0xf2   :  { %p6750_p5 = scmp.lt.s32.totalorder %s6748_s0, %s6744_s23 }
  0xf4   :  { %p6751_p6 = por %p6750_p5, %p6749_p4 }
  0xf6   :  { %p6752_p7 = pnand %p6751_p6, %p6745_p3 }
  0xf8   :  { %6755 = shalt.err (!%p6752_p7)
}
  0xf9   :  { %283 = dma.hbm_to_vmem [thread:$0]  %s7140_s4, 16, %s281_s16, [#allocation12]  }
  0xfa   :  { %s6878_s30 = smov [#allocation16]   ;;  %s6756_s26 = scalar_lea.hbm %s7160_s8, 16 }
  0xfb   :  { %s304_s20 = sshll.u32 %s6878_s30, 4  ;;  %p6757_p8 = scmp.ne.s32.totalorder %s7160_s8, %s6756_s26  ;;  %s305_s20 = int_to_ptr.vmem [resolvable:$true] %s304_s20 }
  0xfc   :  { %p6760_p9 = scmp.lt.u32.totalorder %s6756_s26, %s7160_s8 }
  0xfe   :  { %p6762_p10 = pnand %p6760_p9, %p6757_p8 }
 0x100   :  { %6765 = shalt.err (!%p6762_p10)
}
 0x101   :  { %s6766_s28 = scalar_lea.vmem %s305_s20, 16  ;;  %s6770_s1 = scalar_lea.vmem %s305_s20, 32 }
 0x102   :  { %p6767_p11 = scmp.ne.s32.totalorder %s305_s20, %s6766_s28  ;;  %p6771_p12 = scmp.lt.s32.totalorder %s305_s20, %s305_s20 }
 0x103   :  { %p6772_p13 = scmp.lt.s32.totalorder %s6770_s1, %s6766_s28 }
 0x105   :  { %p6773_p0 = por %p6772_p13, %p6771_p12 }
 0x107   :  { %p6774_p1 = pnand %p6773_p0, %p6767_p11 }
 0x109   :  { %6777 = shalt.err (!%p6774_p1)
}
 0x10a   :  { %307 = dma.hbm_to_vmem [thread:$0]  %s7160_s8, 16, %s305_s20, [#allocation15]  }
 0x10b   :  { %6800 = dma.done.wait [#allocation3], 16  }
 0x10c   :  { %6801 = vsyncadd [#allocation3], 4294967280 }
 0x10d   :  { %6802 = dma.done.wait [#allocation6], 32  }
 0x10e   :  { %6803 = vsyncadd [#allocation6], 4294967264 }
 0x10f   :  { %6804 = dma.done.wait [#allocation9], 32  }
 0x110   :  { %6805 = vsyncadd [#allocation9], 4294967264 }
 0x111   :  { %6806 = dma.done.wait [#allocation12], 32  }
 0x112   :  { %6807 = vsyncadd [#allocation12], 4294967264 }
 0x113   :  { %6808 = dma.done.wait [#allocation15], 32  }
 0x114   :  { %6809 = vsyncadd [#allocation15], 4294967264  ;;  %v6879_v0 = vmov 0.0|0.0   ;;  %vm6880_vm0 = vmmov 0   ;;  %v6881_v1 = vmov 0.0   ;;  %v344_v2 = vld [vmem:[%s6920_s25] sm:$0xff] }
 0x115   :  { %5878 = vmatprep.subr.bf16.mxu0 %v6879_v0  ;;  %5573 = vmatprep.mubr.msk.f32.mxu0 %vm6880_vm0, %v6881_v1  ;;  %v345_v3 = vld [vmem:[%s6920_s25 + $0x8] sm:$0xff]  ;;  %v346_v4 = vld [vmem:[%s6920_s25 + $0x10] sm:$0xff]  ;;  %v347_v6 = vld [vmem:[%s6920_s25 + $0x18] sm:$0x3f]  ;;  %vm359_vm1 = vcmask 1045504   ;;  %vm6882_vm2 = vmmov 1  }
 0x116   :  { %v5879_v5 = vpack.c.bf16 %v345_v3, %v344_v2  ;;  %v5882_v7 = vpack.c.bf16 %v347_v6, %v346_v4  ;;  %vm7232_vm3 = vmpackc.low %vm359_vm1, %vm6882_vm2  ;;  %v435_v9 = vld [vmem:[%s6930_s3] sm:$0xff]  ;;  %v436_v10 = vld [vmem:[%s6930_s3 + $0x8] sm:$0xff]  ;;  %vm355_vm4 = vcmask 244736   ;;  %s8230_s25 = sld [smem:[#allocation24_spill]]  ;;  %vm446_vm5 = vcmask 261120   ;;  %s8234_s8 = sld [smem:[#allocation29_spill]] }
 0x117   :  { %v343_v11 = vld [vmem:[%s6895_s5] sm:$0xff]  ;;  %v5886_v12 = vpack.c.bf16 %v436_v10, %v435_v9  ;;  %v437_v13 = vld [vmem:[%s6930_s3 + $0x10] sm:$0xff]  ;;  %v438_v14 = vld [vmem:[%s6930_s3 + $0x18] sm:$0xff]  ;;  %s8231_s5 = sld [smem:[#allocation30_spill]]  ;;  %s8233_s3 = sld [smem:[#allocation32_spill]]  ;;  %vm2953_vm6 = vcmask 523264  }
 0x118   :  { %5880 = vmatpush3.bf16.msra.mxu0 %v5879_v5  ;;  %v5889_v15 = vpack.c.bf16 %v438_v14, %v437_v13  ;;  %v522_v16 = vld [vmem:[%s6940_s14 + $0x8] sm:$0xff]  ;;  %v524_v17 = vld [vmem:[%s6940_s14 + $0x18] sm:$0xff]  ;;  %v5061_v19 = vld [vmem:[%s6925_s29] ss:$0 sm:$0xff]  ;;  %s8232_s29 = sld [smem:[#allocation28_spill]]  ;;  %s8236_s4 = sld [smem:[#allocation34_spill]] }
 0x119   :  { %5881 = vmatprep.subr.bf16.mxu0 %v6879_v0  ;;  %v5891_v18 = vpack.c.bf16 %v524_v17, %v522_v16  ;;  %v521_v20 = vld [vmem:[%s6940_s14] sm:$0xff]  ;;  %v523_v21 = vld [vmem:[%s6940_s14 + $0x10] sm:$0xff]  ;;  %v526_v28 = vld [vmem:[%s6940_s14 + $0x28] sm:$0xff]  ;;  %s8237_s2 = sld [smem:[#allocation26_spill]]  ;;  %s8238_s7 = sld [smem:[#allocation35_spill]]  ;;  %vm3570_vm8 = vcmask 130048  }
 0x11a   :  { %v5893_v26 = vpack.c.bf16 %v523_v21, %v521_v20  ;;  %v528_v29 = vld [vmem:[%s6940_s14 + $0x38] sm:$0xff]  ;;  %v525_v31 = vld [vmem:[%s6940_s14 + $0x20] sm:$0xff]  ;;  %v527_v32 = vld [vmem:[%s6940_s14 + $0x30] sm:$0xff]  ;;  %s8235_s14 = sld [smem:[#allocation31_spill]]  ;;  %s8239_s6 = sld [smem:[#allocation33_spill]]  ;;  %vm3647_vm9 = vcmask 64512  }
 0x11b   :  { %v5895_v30 = vpack.c.bf16 %v528_v29, %v526_v28  ;;  %v5897_v33 = vpack.c.bf16 %v527_v32, %v525_v31  ;;  %s8240_s13 = sld [smem:[#allocation37_spill]]  ;;  %s8241_s10 = sld [smem:[#allocation38_spill]]  ;;  %vm4905_vm12 = vcmask 48128  }
 0x11c   :  { %5884 = vmatpush3.bf16.msk.msra.mxu0 %vm7232_vm3, %v5882_v7  ;;  %v433_v23 = vld [vmem:[%s8230_s25] sm:$0xff]  ;;  %s8242_s11 = sld [smem:[#allocation36_spill]]  ;;  %s8243_s12 = sld [smem:[#allocation40_spill]] }
 0x11d   :  { %5885 = vmatprep.subr.bf16.mxu0 %v6879_v0  ;;  %v633_v34 = vld [vmem:[%s8231_s5 + $0x80] sm:$0xff]  ;;  %v634_v35 = vld [vmem:[%s8231_s5 + $0x88] sm:$0xff]  ;;  %v635_v39 = vld [vmem:[%s8231_s5 + $0x90] sm:$0xff]  ;;  %s8244_s15 = sld [smem:[#allocation42_spill]]  ;;  %s8245_s16 = sld [smem:[#allocation39_spill]] }
 0x11e   :  { %v617_v36 = vld [vmem:[%s8231_s5] sm:$0xff]  ;;  %v5899_v37 = vpack.c.bf16 %v634_v35, %v633_v34  ;;  %v618_v38 = vld [vmem:[%s8231_s5 + $0x8] sm:$0xff]  ;;  %v636_v40 = vld [vmem:[%s8231_s5 + $0x98] sm:$0xff]  ;;  %s8246_s18 = sld [smem:[#allocation44_spill]]  ;;  %s8247_s21 = sld [smem:[#allocation41_spill]] }
 0x11f   :  { %5574 = vmatmul.mubr.msk.f32.vlgmr.msra.gmra.mrb[0].mxu0 %vm355_vm4, %v343_v11  ;;  %v5901_v41 = vpack.c.bf16 %v618_v38, %v617_v36  ;;  %v5903_v42 = vpack.c.bf16 %v636_v40, %v635_v39  ;;  %v619_v43 = vld [vmem:[%s8231_s5 + $0x10] sm:$0xff]  ;;  %v620_v44 = vld [vmem:[%s8231_s5 + $0x18] sm:$0xff]  ;;  %v637_v45 = vld [vmem:[%s8231_s5 + $0xa0] sm:$0xff]  ;;  %s8248_s22 = sld [smem:[#allocation48_spill]]  ;;  %s8249_s27 = sld [smem:[#allocation43_spill]] }
 0x120   :  { %5887 = vmatpush3.bf16.msra.mxu0 %v5886_v12  ;;  %5584 = vmatprep.mubr.msk.f32.mxu0 %vm6880_vm0, %v6881_v1  ;;  %v638_v46 = vld [vmem:[%s8231_s5 + $0xa8] sm:$0xff]  ;;  %v5905_v47 = vpack.c.bf16 %v620_v44, %v619_v43  ;;  %v621_v49 = vld [vmem:[%s8231_s5 + $0x20] sm:$0xff]  ;;  %v639_v51 = vld [vmem:[%s8231_s5 + $0xb0] sm:$0xff]  ;;  %s8250_s23 = sld [smem:[#allocation46_spill]]  ;;  %s8251_s0 = sld [smem:[#allocation50_spill]] }
 0x121   :  { %5888 = vmatprep.subr.bf16.mxu0 %v6879_v0  ;;  %5900 = vmatprep.subr.bf16.mxu1 %v5899_v37  ;;  %v5907_v48 = vpack.c.bf16 %v638_v46, %v637_v45  ;;  %v622_v50 = vld [vmem:[%s8231_s5 + $0x28] sm:$0xff]  ;;  %v640_v52 = vld [vmem:[%s8231_s5 + $0xb8] sm:$0xff]  ;;  %v623_v55 = vld [vmem:[%s8231_s5 + $0x30] sm:$0xff]  ;;  %s8252_s30 = sld [smem:[#allocation45_spill]]  ;;  %s8253_s20 = sld [smem:[#allocation51_spill]] }
 0x122   :  { %5902 = vmatpush3.bf16.msra.mxu1 %v5901_v41  ;;  %v5909_v53 = vpack.c.bf16 %v622_v50, %v621_v49  ;;  %v5911_v54 = vpack.c.bf16 %v640_v52, %v639_v51  ;;  %v624_v56 = vld [vmem:[%s8231_s5 + $0x38] sm:$0xff]  ;;  %v641_v57 = vld [vmem:[%s8231_s5 + $0xc0] sm:$0xff]  ;;  %v642_v58 = vld [vmem:[%s8231_s5 + $0xc8] sm:$0xff]  ;;  %s8254_s26 = sld [smem:[#allocation52_spill]]  ;;  %s8255_s28 = sld [smem:[#allocation27_spill]] }
 0x123   :  { %5904 = vmatprep.subr.bf16.mxu1 %v5903_v42  ;;  %v5913_v59 = vpack.c.bf16 %v624_v56, %v623_v55  ;;  %v5915_v60 = vpack.c.bf16 %v642_v58, %v641_v57  ;;  %v625_v61 = vld [vmem:[%s8231_s5 + $0x40] sm:$0xff]  ;;  %v626_v62 = vld [vmem:[%s8231_s5 + $0x48] sm:$0xff]  ;;  %v643_v63 = vld [vmem:[%s8231_s5 + $0xd0] sm:$0xff]  ;;  %s8256_s1 = sld [smem:[#allocation54_spill]]  ;;  %s8257_s25 = sld [smem:[#allocation49_spill]] }
 0x124   :  { %5890 = vmatpush3.bf16.msra.mxu0 %v5889_v15  ;;  %v644_v2 = vld [vmem:[%s8231_s5 + $0xd8] sm:$0xff]  ;;  %v5917_v3 = vpack.c.bf16 %v626_v62, %v625_v61  ;;  %v627_v5 = vld [vmem:[%s8231_s5 + $0x50] sm:$0xff]  ;;  %v645_v7 = vld [vmem:[%s8231_s5 + $0xe0] sm:$0xff] }
 0x125   :  { %5892 = vmatprep.subr.bf16.mxu0 %v5891_v18  ;;  %v5919_v4 = vpack.c.bf16 %v644_v2, %v643_v63  ;;  %v628_v6 = vld [vmem:[%s8231_s5 + $0x58] sm:$0xff]  ;;  %v646_v9 = vld [vmem:[%s8231_s5 + $0xe8] sm:$0xff]  ;;  %v5064_v12 = vld [vmem:[%s8232_s29] ss:$0 sm:$0xff]  ;;  %s8259_s29 = sld [smem:[#allocation55_spill]] }
 0x126   :  { %5906 = vmatpush3.bf16.msra.mxu1 %v5905_v47  ;;  %v5921_v10 = vpack.c.bf16 %v628_v6, %v627_v5  ;;  %v5923_v11 = vpack.c.bf16 %v646_v9, %v645_v7  ;;  %v629_v17 = vld [vmem:[%s8231_s5 + $0x60] sm:$0xff]  ;;  %v630_v18 = vld [vmem:[%s8231_s5 + $0x68] sm:$0xff]  ;;  %v647_v20 = vld [vmem:[%s8231_s5 + $0xf0] sm:$0xff] }
 0x127   :  { %5908 = vmatprep.subr.bf16.mxu1 %v5907_v48  ;;  %v648_v21 = vld [vmem:[%s8231_s5 + $0xf8] sm:$0xff]  ;;  %v744_v28 = vld [vmem:[%s8233_s3 + $0x88] sm:$0xff]  ;;  %v529_v36 = vld [vmem:[%s8234_s8] sm:$0x3]  ;;  %s8261_s8 = sld [smem:[#allocation47_spill]] }
 0x128   :  { %v736_v29 = vld [vmem:[%s8233_s3 + $0x48] sm:$0xff]  ;;  %v727_v46 = vld [vmem:[%s8233_s3] sm:$0xff]  ;;  %v730_v2 = vld [vmem:[%s8233_s3 + $0x18] sm:$0xff] }
 0x129   :  { %v752_v31 = vld [vmem:[%s8233_s3 + $0xc8] sm:$0xff]  ;;  %v743_v47 = vld [vmem:[%s8233_s3 + $0x80] sm:$0xff] }
 0x12a   :  { %5910 = vmatpush3.bf16.msra.mxu1 %v5909_v53  ;;  %v5963_v32 = vpack.c.bf16 %v752_v31, %v736_v29  ;;  %v735_v48 = vld [vmem:[%s8233_s3 + $0x40] sm:$0xff]  ;;  %v5933_v49 = vpack.c.bf16 %v743_v47, %v727_v46  ;;  %v760_v52 = vld [vmem:[%s8233_s3 + $0x108] sm:$0xff]  ;;  %v1461_v46 = vld [vmem:[%s8236_s4 + $0x78] sm:$0xff] }
 0x12b   :  { %5912 = vmatprep.subr.bf16.mxu1 %v5911_v54  ;;  %v751_v50 = vld [vmem:[%s8233_s3 + $0xc0] sm:$0xff]  ;;  %v776_v53 = vld [vmem:[%s8233_s3 + $0x188] sm:$0xff] }
 0x12c   :  { %v5965_v51 = vpack.c.bf16 %v751_v50, %v735_v48  ;;  %v5935_v54 = vpack.c.bf16 %v776_v53, %v760_v52  ;;  %v768_v55 = vld [vmem:[%s8233_s3 + $0x148] sm:$0xff]  ;;  %v759_v57 = vld [vmem:[%s8233_s3 + $0x100] sm:$0xff]  ;;  %v1492_v50 = vld [vmem:[%s8236_s4 + $0x170] sm:$0x3f] }
 0x12d   :  { %v784_v56 = vld [vmem:[%s8233_s3 + $0x1c8] sm:$0xff]  ;;  %v783_v61 = vld [vmem:[%s8233_s3 + $0x1c0] sm:$0xff] }
 0x12e   :  { %5914 = vmatpush3.bf16.msra.mxu1 %v5913_v59  ;;  %v5967_v58 = vpack.c.bf16 %v784_v56, %v768_v55  ;;  %v775_v59 = vld [vmem:[%s8233_s3 + $0x180] sm:$0xff]  ;;  %v756_v6 = vld [vmem:[%s8233_s3 + $0xe8] sm:$0xff] }
 0x12f   :  { %5916 = vmatprep.subr.bf16.mxu1 %v5915_v60  ;;  %v767_v60 = vld [vmem:[%s8233_s3 + $0x140] sm:$0xff]  ;;  %v5937_v62 = vpack.c.bf16 %v775_v59, %v759_v57  ;;  %v764_v47 = vld [vmem:[%s8233_s3 + $0x128] sm:$0xff]  ;;  %v1476_v57 = vld [vmem:[%s8236_s4 + $0xf0] sm:$0xff] }
 0x130   :  { %v5969_v63 = vpack.c.bf16 %v783_v61, %v767_v60  ;;  %v787_v31 = vld [vmem:[%s8233_s3 + $0x1e0] sm:$0xff]  ;;  %v780_v48 = vld [vmem:[%s8233_s3 + $0x1a8] sm:$0xff]  ;;  %v734_v59 = vld [vmem:[%s8233_s3 + $0x38] sm:$0xff] }
 0x131   :  { %v763_v53 = vld [vmem:[%s8233_s3 + $0x120] sm:$0xff]  ;;  %v5951_v55 = vpack.c.bf16 %v780_v48, %v764_v47  ;;  %v750_v60 = vld [vmem:[%s8233_s3 + $0xb8] sm:$0xff]  ;;  %v1451_v61 = vld [vmem:[%s8236_s4 + $0x28] sm:$0xff] }
 0x132   :  { %5918 = vmatpush3.bf16.msra.mxu1 %v5917_v3  ;;  %v746_v3 = vld [vmem:[%s8233_s3 + $0x98] sm:$0xff]  ;;  %v785_v47 = vld [vmem:[%s8233_s3 + $0x1d0] sm:$0xff] }
 0x133   :  { %5920 = vmatprep.subr.bf16.mxu1 %v5919_v4  ;;  %v740_v4 = vld [vmem:[%s8233_s3 + $0x68] sm:$0xff]  ;;  %v5939_v5 = vpack.c.bf16 %v746_v3, %v730_v2  ;;  %v733_v3 = vld [vmem:[%s8233_s3 + $0x30] sm:$0xff] }
 0x134   :  { %v5979_v7 = vpack.c.bf16 %v756_v6, %v740_v4  ;;  %v749_v4 = vld [vmem:[%s8233_s3 + $0xb0] sm:$0xff] }
 0x136   :  { %5922 = vmatpush3.bf16.msra.mxu1 %v5921_v10  ;;  %v5067_v10 = vld [vmem:[%s8235_s14] ss:$0 sm:$0xff]  ;;  %s8262_s14 = sld [smem:[#allocation57_spill]] }
 0x137   :  { %5924 = vmatprep.subr.bf16.mxu1 %v5923_v11 }
 0x1f2   :  { %v429_v22 = vpop.f32.mrb[0].mxu0 }
 0x1f3   :  { %v430_v24 = vadd.f32 %v5061_v19, %v429_v22  ;;  %v5575_v25 = vpop.f32.mrb[1].mxu0  ;;  %v5925_v19 = vpack.c.bf16 %v630_v18, %v629_v17  ;;  %v5927_v22 = vpack.c.bf16 %v648_v21, %v647_v20  ;;  %v762_v17 = vld [vmem:[%s8233_s3 + $0x118] sm:$0xff]  ;;  %v788_v20 = vld [vmem:[%s8233_s3 + $0x1e8] sm:$0xff] }
 0x1f4   :  { %v778_v18 = vld [vmem:[%s8233_s3 + $0x198] sm:$0xff] }
 0x1f5   :  { %v7254_v27 = vadd.f32 %v433_v23, %v430_v24  ;;  %5926 = vmatpush3.bf16.msra.mxu1 %v5925_v19  ;;  %v631_v23 = vld [vmem:[%s8231_s5 + $0x70] sm:$0xff]  ;;  %v632_v24 = vld [vmem:[%s8231_s5 + $0x78] sm:$0xff]  ;;  %v772_v19 = vld [vmem:[%s8233_s3 + $0x168] sm:$0xff]  ;;  %s8258_s5 = sld [smem:[#allocation53_spill]] }
 0x1f6   :  { %v5929_v25 = vpack.c.bf16 %v632_v24, %v631_v23  ;;  %5928 = vmatprep.subr.bf16.mxu1 %v5927_v22  ;;  %v761_v24 = vld [vmem:[%s8233_s3 + $0x110] sm:$0xff]  ;;  %v5983_v29 = vpack.c.bf16 %v788_v20, %v772_v19 }
 0x1f7   :  { %5585 = vmatmul.mubr.msk.f32.vlgmr.msra.gmra.mrb[2].mxu0 %vm446_vm5, %v7254_v27 }
 0x1f8   :  { %5894 = vmatpush1.bf16.msra.mxu0 %v5893_v26  ;;  %608 = vmatprep.mubr.f32.mxu0 %v6881_v1  ;;  %v728_v26 = vld [vmem:[%s8233_s3 + $0x8] sm:$0xff] }
 0x1f9   :  { %5896 = vmatprep.subr.bf16.mxu0 %v5895_v30  ;;  %5930 = vmatpush3.bf16.msra.mxu1 %v5929_v25  ;;  %v5931_v30 = vpack.c.bf16 %v744_v28, %v728_v26  ;;  %v777_v25 = vld [vmem:[%s8233_s3 + $0x190] sm:$0xff]  ;;  %v5943_v28 = vpack.c.bf16 %v778_v18, %v762_v17 }
 0x1fa   :  { %5964 = vmatprep.subr.bf16.mxu1 %v5963_v32  ;;  %v732_v32 = vld [vmem:[%s8233_s3 + $0x28] sm:$0xff]  ;;  %v765_v17 = vld [vmem:[%s8233_s3 + $0x130] sm:$0xff] }
 0x1fb   :  { %v781_v18 = vld [vmem:[%s8233_s3 + $0x1b0] sm:$0xff] }
 0x1fc   :  { %5898 = vmatpush1.bf16.msra.mxu0 %v5897_v33  ;;  %v531_v33 = vlaneseq }
 0x1fd   :  { %5932 = vmatprep.subr.bf16.mxu0 %v5931_v30  ;;  %v771_v30 = vld [vmem:[%s8233_s3 + $0x160] sm:$0xff] }
 0x1fe   :  { %v7302_v34 = vshrl.u32 %v531_v33, 7  ;;  %v748_v33 = vld [vmem:[%s8233_s3 + $0xa8] sm:$0xff] }
 0x200   :  { %v7305_v35 = vsub.s32 0, %v7302_v34  ;;  %v7309_v37 = vsub.s32 1, %v7302_v34 }
 0x202   :  { %v534_v38 = vrot.slane %v529_v36, %v7305_v35  ;;  %v538_v39 = vrot.slane %v529_v36, %v7309_v37  ;;  %v1447_v36 = vld [vmem:[%s8236_s4 + $0x8] sm:$0xff] }
 0x2ca   :  { %v516_v13 = vpop.f32.mrb[2].mxu0 }
 0x2cb   :  { %v517_v14 = vadd.f32 %v5064_v12, %v516_v13  ;;  %v5586_v15 = vpop.f32.mrb[3].mxu0  ;;  %v729_v12 = vld [vmem:[%s8233_s3 + $0x10] sm:$0xff] }
 0x2cc   :  { %v745_v13 = vld [vmem:[%s8233_s3 + $0x90] sm:$0xff]  ;;  %v739_v15 = vld [vmem:[%s8233_s3 + $0x60] sm:$0xff] }
 0x2cd   :  { %v520_v16 = vmax.f32 %v517_v14, 0.0  ;;  %v5941_v22 = vpack.c.bf16 %v745_v13, %v729_v12  ;;  %v1481_v12 = vld [vmem:[%s8236_s4 + $0x118] sm:$0xff]  ;;  %v1496_v13 = vld [vmem:[%s8236_s4 + $0x190] sm:$0x3f] }
 0x2ce   :  { %v6019_v20 = vpack.c.bf16 %v1496_v13, %v1481_v12  ;;  %v1488_v13 = vld [vmem:[%s8236_s4 + $0x150] sm:$0xff] }
 0x2cf   :  { %5066 = vmatmul.mubr.msk.f32.vlgmr.msra.gmra.mrb[4].mxu0 %vm446_vm5, %v520_v16  ;;  %v755_v16 = vld [vmem:[%s8233_s3 + $0xe0] sm:$0xff] }
 0x2d0   :  { %942 = vmatprep.mubr.f32.mxu0 %v6881_v1  ;;  %5934 = vmatpush1.bf16.msra.mxu0 %v5933_v49  ;;  %v5981_v23 = vpack.c.bf16 %v755_v16, %v739_v15  ;;  %v1477_v49 = vld [vmem:[%s8236_s4 + $0xf8] sm:$0xff]  ;;  %v5957_v15 = vpack.c.bf16 %v749_v4, %v733_v3 }
 0x2d1   :  { %5936 = vmatprep.subr.bf16.mxu0 %v5935_v54  ;;  %v779_v54 = vld [vmem:[%s8233_s3 + $0x1a0] sm:$0xff]  ;;  %v5999_v56 = vpack.c.bf16 %v1492_v50, %v1477_v49  ;;  %v1484_v50 = vld [vmem:[%s8236_s4 + $0x130] sm:$0xff]  ;;  %v790_v3 = vld [vmem:[%s8233_s3 + $0x1f8] sm:$0xff] }
 0x2d2   :  { %v1489_v4 = vld [vmem:[%s8236_s4 + $0x158] sm:$0xff] }
 0x2d4   :  { %5938 = vmatpush1.bf16.msra.mxu0 %v5937_v62  ;;  %v1466_v62 = vld [vmem:[%s8236_s4 + $0xa0] sm:$0xff] }
 0x2d5   :  { %5940 = vmatprep.subr.bf16.mxu0 %v5939_v5  ;;  %v5955_v5 = vpack.c.bf16 %v750_v60, %v734_v59  ;;  %v6015_v6 = vpack.c.bf16 %v1466_v62, %v1451_v61  ;;  %v757_v59 = vld [vmem:[%s8233_s3 + $0xf0] sm:$0xff]  ;;  %v1458_v62 = vld [vmem:[%s8236_s4 + $0x60] sm:$0xff] }
 0x3a2   :  { %v610_v40 = vpop.f32.mrb[4].mxu0 }
 0x3a3   :  { %v611_v41 = vadd.f32 %v610_v40, %v534_v38  ;;  %v612_v42 = vpop.f32.mrb[5].mxu0  ;;  %v1462_v38 = vld [vmem:[%s8236_s4 + $0x80] sm:$0xff]  ;;  %v5985_v40 = vpack.c.bf16 %v787_v31, %v771_v30  ;;  %v737_v31 = vld [vmem:[%s8233_s3 + $0x50] sm:$0xff] }
 0x3a4   :  { %v613_v43 = vadd.f32 %v612_v42, %v538_v39  ;;  %v5945_v39 = vpack.c.bf16 %v777_v25, %v761_v24  ;;  %v747_v42 = vld [vmem:[%s8233_s3 + $0xa0] sm:$0xff]  ;;  %v754_v24 = vld [vmem:[%s8233_s3 + $0xd8] sm:$0xff]  ;;  %v1455_v25 = vld [vmem:[%s8236_s4 + $0x48] sm:$0xff] }
 0x3a5   :  { %v615_v45 = vmax.f32 %v611_v41, 0.0  ;;  %v731_v41 = vld [vmem:[%s8233_s3 + $0x20] sm:$0xff] }
 0x3a6   :  { %v616_v44 = vmax.f32 %v613_v43, 0.0  ;;  %v5947_v43 = vpack.c.bf16 %v748_v33, %v732_v32  ;;  %v753_v32 = vld [vmem:[%s8233_s3 + $0xd0] sm:$0xff] }
 0x3a8   :  { %720 = vmatprep.mubr.f32.mxu1 %v616_v44  ;;  %v5995_v44 = vpack.c.bf16 %v1462_v38, %v1447_v36  ;;  %v1454_v38 = vld [vmem:[%s8236_s4 + $0x40] sm:$0xff] }
 0x3a9   :  { %721 = vmatmul.mubr.f32.vlgmr.msra.gmra.mrb[0].mxu1 %v615_v45  ;;  %v1446_v45 = vld [vmem:[%s8236_s4] sm:$0xff] }
 0x3aa   :  { %1226 = vmatprep.mubr.f32.mxu1 %v6881_v1  ;;  %5966 = vmatpush1.bf16.msra.mxu1 %v5965_v51  ;;  %v5949_v51 = vpack.c.bf16 %v747_v42, %v731_v41  ;;  %v5997_v52 = vpack.c.bf16 %v1461_v46, %v1446_v45  ;;  %v786_v41 = vld [vmem:[%s8233_s3 + $0x1d8] sm:$0xff]  ;;  %v769_v46 = vld [vmem:[%s8233_s3 + $0x150] sm:$0xff] }
 0x3ab   :  { %5968 = vmatprep.subr.bf16.mxu1 %v5967_v58  ;;  %v1491_v58 = vld [vmem:[%s8236_s4 + $0x168] sm:$0x3f]  ;;  %v1485_v42 = vld [vmem:[%s8236_s4 + $0x138] sm:$0xff] }
 0x3ac   :  { %v6002_v2 = vpack.c.bf16 %v1491_v58, %v1476_v57  ;;  %v741_v58 = vld [vmem:[%s8233_s3 + $0x70] sm:$0xff] }
 0x3ae   :  { %5970 = vmatpush1.bf16.msra.mxu1 %v5969_v63  ;;  %v5953_v63 = vpack.c.bf16 %v779_v54, %v763_v53  ;;  %v758_v53 = vld [vmem:[%s8233_s3 + $0xf8] sm:$0xff]  ;;  %v1459_v54 = vld [vmem:[%s8236_s4 + $0x68] sm:$0xff] }
 0x3af   :  { %5980 = vmatprep.subr.bf16.mxu1 %v5979_v7  ;;  %v1450_v7 = vld [vmem:[%s8236_s4 + $0x20] sm:$0xff] }
 0x47c   :  { %v5183_v9 = vpop.f32.mrb[0].mxu1 }
 0x47d   :  { %v5184_v11 = vpop.f32.mrb[1].mxu1 }
 0x47e   :  { %v5185_v14 = vadd.f32 %v5184_v11, %v5183_v9  ;;  %v1465_v9 = vld [vmem:[%s8236_s4 + $0x98] sm:$0xff] }
 0x47f   :  { %v782_v11 = vld [vmem:[%s8233_s3 + $0x1b8] sm:$0xff]  ;;  %v6017_v16 = vpack.c.bf16 %v1465_v9, %v1450_v7  ;;  %v773_v9 = vld [vmem:[%s8233_s3 + $0x170] sm:$0xff] }
 0x480   :  { %v723_v21 = vadd.f32 %v5185_v14, %v5067_v10  ;;  %v766_v10 = vld [vmem:[%s8233_s3 + $0x138] sm:$0xff]  ;;  %v7390_v14 = vld [vmem:[%s8237_s2] sm:$0xff]  ;;  %s8264_s2 = sld [smem:[#allocation58_spill]] }
 0x481   :  { %v5959_v19 = vpack.c.bf16 %v782_v11, %v766_v10  ;;  %v789_v10 = vld [vmem:[%s8233_s3 + $0x1f0] sm:$0xff] }
 0x482   :  { %v7341_v26 = vmax.f32 %v723_v21, 0.0  ;;  %v1480_v21 = vld [vmem:[%s8236_s4 + $0x110] sm:$0xff] }
 0x484   :  { %5068 = vmatmul.mubr.msk.f32.vlgmr.msra.gmra.mrb[6].mxu0 %vm446_vm5, %v7341_v26  ;;  %5072 = vmatmul.mubr.msk.f32.vlgmr.msra.gmra.mrb[2].mxu1 %vm446_vm5, %v7341_v26 }
 0x485   :  { %5942 = vmatpush1.bf16.msra.mxu0 %v5941_v22  ;;  %5982 = vmatpush1.bf16.msra.mxu1 %v5981_v23  ;;  %v1495_v22 = vld [vmem:[%s8236_s4 + $0x188] sm:$0x3f]  ;;  %v738_v23 = vld [vmem:[%s8233_s3 + $0x58] sm:$0xff] }
 0x486   :  { %5944 = vmatprep.subr.bf16.mxu0 %v5943_v28  ;;  %5984 = vmatprep.subr.bf16.mxu1 %v5983_v29  ;;  %v1470_v28 = vld [vmem:[%s8236_s4 + $0xc0] sm:$0xff]  ;;  %v5961_v29 = vpack.c.bf16 %v781_v18, %v765_v17  ;;  %v6022_v30 = vpack.c.bf16 %v1495_v22, %v1480_v21  ;;  %v5971_v33 = vpack.c.bf16 %v754_v24, %v738_v23  ;;  %v1464_v17 = vld [vmem:[%s8236_s4 + $0x90] sm:$0xff]  ;;  %v1463_v24 = vld [vmem:[%s8236_s4 + $0x88] sm:$0xff] }
 0x487   :  { %1013 = vmatprep.mubr.f32.mxu0 %v6881_v1  ;;  %1368 = vmatprep.mubr.f32.mxu1 %v6881_v1  ;;  %v6035_v36 = vpack.c.bf16 %v1470_v28, %v1455_v25  ;;  %v1522_v18 = vld [vmem:[%s8238_s7 + $0x80] sm:$0xff]  ;;  %v1448_v23 = vld [vmem:[%s8236_s4 + $0x10] sm:$0xff]  ;;  %v1479_v25 = vld [vmem:[%s8236_s4 + $0x108] sm:$0xff] }
 0x489   :  { %5946 = vmatpush1.bf16.msra.mxu0 %v5945_v39  ;;  %5986 = vmatpush1.bf16.msra.mxu1 %v5985_v40  ;;  %v1469_v39 = vld [vmem:[%s8236_s4 + $0xb8] sm:$0xff] }
 0x48a   :  { %5948 = vmatprep.subr.bf16.mxu0 %v5947_v43  ;;  %5996 = vmatprep.subr.bf16.mxu1 %v5995_v44  ;;  %v770_v40 = vld [vmem:[%s8233_s3 + $0x158] sm:$0xff]  ;;  %v1500_v43 = vld [vmem:[%s8236_s4 + $0x1b0] sm:$0x3f]  ;;  %v5973_v44 = vpack.c.bf16 %v753_v32, %v737_v31  ;;  %v6037_v45 = vpack.c.bf16 %v1469_v39, %v1454_v38  ;;  %v1507_v31 = vld [vmem:[%s8238_s7 + $0x8] sm:$0xff] }
 0x48b   :  { %v5975_v48 = vpack.c.bf16 %v786_v41, %v770_v40  ;;  %v6039_v49 = vpack.c.bf16 %v1500_v43, %v1485_v42  ;;  %v1524_v32 = vld [vmem:[%s8238_s7 + $0x90] sm:$0xff]  ;;  %v1478_v39 = vld [vmem:[%s8236_s4 + $0x100] sm:$0xff]  ;;  %v1493_v40 = vld [vmem:[%s8236_s4 + $0x178] sm:$0x3f] }
 0x48c   :  { %5069 = vmatmul.mubr.msk.f32.vlgmr.msra.gmra.mrb[8].mxu0 %vm446_vm5, %v7341_v26  ;;  %5074 = vmatmul.mubr.msk.f32.vlgmr.msra.gmra.mrb[4].mxu1 %vm446_vm5, %v7341_v26  ;;  %v1453_v41 = vld [vmem:[%s8236_s4 + $0x38] sm:$0xff]  ;;  %v1468_v43 = vld [vmem:[%s8236_s4 + $0xb0] sm:$0xff] }
 0x48d   :  { %5950 = vmatpush1.bf16.msra.mxu0 %v5949_v51  ;;  %5998 = vmatpush1.bf16.msra.mxu1 %v5997_v52  ;;  %v1499_v51 = vld [vmem:[%s8236_s4 + $0x1a8] sm:$0x3f]  ;;  %v742_v52 = vld [vmem:[%s8233_s3 + $0x78] sm:$0xff] }
 0x48e   :  { %5952 = vmatprep.subr.bf16.mxu0 %v5951_v55  ;;  %6001 = vmatprep.subr.msk.bf16.mxu1 %vm7232_vm3, %v5999_v56  ;;  %v1474_v55 = vld [vmem:[%s8236_s4 + $0xe0] sm:$0xff]  ;;  %v5977_v56 = vpack.c.bf16 %v785_v47, %v769_v46  ;;  %v6042_v57 = vpack.c.bf16 %v1499_v51, %v1484_v50  ;;  %v5987_v60 = vpack.c.bf16 %v758_v53, %v742_v52  ;;  %v1509_v46 = vld [vmem:[%s8238_s7 + $0x18] sm:$0xff]  ;;  %v1452_v51 = vld [vmem:[%s8236_s4 + $0x30] sm:$0xff] }
 0x48f   :  { %1084 = vmatprep.mubr.f32.mxu0 %v6881_v1  ;;  %1868 = vmatprep.mubr.f32.mxu1 %v6881_v1  ;;  %v6055_v61 = vpack.c.bf16 %v1474_v55, %v1459_v54  ;;  %v1526_v47 = vld [vmem:[%s8238_s7 + $0xa0] sm:$0xff]  ;;  %v6025_v50 = vpack.c.bf16 %v1468_v43, %v1453_v41  ;;  %v1483_v52 = vld [vmem:[%s8236_s4 + $0x128] sm:$0xff]  ;;  %v1517_v41 = vld [vmem:[%s8238_s7 + $0x58] sm:$0xff] }
 0x490   :  { %v1498_v54 = vld [vmem:[%s8236_s4 + $0x1a0] sm:$0x3f] }
 0x491   :  { %5954 = vmatpush1.bf16.msra.mxu0 %v5953_v63  ;;  %6004 = vmatpush1.bf16.msk.msra.mxu1 %vm7232_vm3, %v6002_v2  ;;  %v1473_v63 = vld [vmem:[%s8236_s4 + $0xd8] sm:$0xff]  ;;  %v1534_v43 = vld [vmem:[%s8238_s7 + $0xe0] sm:$0xff] }
 0x492   :  { %5956 = vmatprep.subr.bf16.mxu0 %v5955_v5  ;;  %6016 = vmatprep.subr.bf16.mxu1 %v6015_v6  ;;  %v774_v2 = vld [vmem:[%s8233_s3 + $0x178] sm:$0xff]  ;;  %v1504_v5 = vld [vmem:[%s8236_s4 + $0x1d0] sm:$0x3f]  ;;  %v5989_v6 = vpack.c.bf16 %v757_v59, %v741_v58  ;;  %v6057_v7 = vpack.c.bf16 %v1473_v63, %v1458_v62  ;;  %v1482_v62 = vld [vmem:[%s8236_s4 + $0x120] sm:$0xff]  ;;  %s8260_s3 = sld [smem:[#allocation56_spill]] }
 0x493   :  { %v5991_v11 = vpack.c.bf16 %v790_v3, %v774_v2  ;;  %v6059_v12 = vpack.c.bf16 %v1504_v5, %v1489_v4  ;;  %v1528_v58 = vld [vmem:[%s8238_s7 + $0xb0] sm:$0xff]  ;;  %v1529_v59 = vld [vmem:[%s8238_s7 + $0xb8] sm:$0xff] }
 0x494   :  { %5070 = vmatmul.mubr.msk.f32.vlgmr.msra.gmra.mrb[10].mxu0 %vm446_vm5, %v7341_v26  ;;  %5078 = vmatmul.mubr.msk.f32.vlgmr.msra.gmra.mrb[6].mxu1 %vm355_vm4, %v7390_v14  ;;  %v1497_v63 = vld [vmem:[%s8236_s4 + $0x198] sm:$0x3f]  ;;  %v1472_v4 = vld [vmem:[%s8236_s4 + $0xd0] sm:$0xff]  ;;  %v6084_v5 = vpack.c.bf16 %v1529_v59, %v1528_v58  ;;  %v1587_v58 = vld [vmem:[%s8238_s7 + $0x288] sm:$0xff] }
 0x495   :  { %5958 = vmatpush1.bf16.msra.mxu0 %v5957_v15  ;;  %6018 = vmatpush1.bf16.msra.mxu1 %v6017_v16  ;;  %v1503_v15 = vld [vmem:[%s8236_s4 + $0x1c8] sm:$0x3f]  ;;  %v1449_v16 = vld [vmem:[%s8236_s4 + $0x18] sm:$0xff]  ;;  %v1538_v59 = vld [vmem:[%s8238_s7 + $0x100] sm:$0xff] }
 0x496   :  { %5960 = vmatprep.subr.bf16.mxu0 %v5959_v19  ;;  %6021 = vmatprep.subr.msk.bf16.mxu1 %vm7232_vm3, %v6019_v20  ;;  %v1523_v19 = vld [vmem:[%s8238_s7 + $0x88] sm:$0xff]  ;;  %v5993_v20 = vpack.c.bf16 %v789_v10, %v773_v9  ;;  %v6062_v21 = vpack.c.bf16 %v1503_v15, %v1488_v13  ;;  %v6005_v22 = vpack.c.bf16 %v1464_v17, %v1449_v16  ;;  %v1457_v3 = vld [vmem:[%s8236_s4 + $0x58] sm:$0xff]  ;;  %v1456_v9 = vld [vmem:[%s8236_s4 + $0x50] sm:$0xff] }
 0x497   :  { %1155 = vmatprep.mubr.f32.mxu0 %v6881_v1  ;;  %2010 = vmatprep.mubr.f32.mxu1 %v6881_v1  ;;  %v6072_v28 = vpack.c.bf16 %v1523_v19, %v1522_v18  ;;  %v1471_v10 = vld [vmem:[%s8236_s4 + $0xc8] sm:$0xff]  ;;  %v1486_v16 = vld [vmem:[%s8236_s4 + $0x140] sm:$0xff]  ;;  %v1501_v17 = vld [vmem:[%s8236_s4 + $0x1b8] sm:$0x3f] }
 0x498   :  { %v6047_v13 = vpack.c.bf16 %v1471_v10, %v1456_v9  ;;  %v6052_v18 = vpack.c.bf16 %v1501_v17, %v1486_v16  ;;  %v1460_v19 = vld [vmem:[%s8236_s4 + $0x70] sm:$0xff]  ;;  %v1559_v9 = vld [vmem:[%s8238_s7 + $0x1a8] sm:$0xff]  ;;  %v1561_v16 = vld [vmem:[%s8238_s7 + $0x1b8] sm:$0xff] }
 0x499   :  { %5962 = vmatpush1.bf16.msra.mxu0 %v5961_v29  ;;  %6024 = vmatpush1.bf16.msk.msra.mxu1 %vm7232_vm3, %v6022_v30  ;;  %v1494_v29 = vld [vmem:[%s8236_s4 + $0x180] sm:$0x3f] }
 0x49a   :  { %5972 = vmatprep.subr.bf16.mxu0 %v5971_v33  ;;  %6036 = vmatprep.subr.bf16.mxu1 %v6035_v36  ;;  %v1506_v30 = vld [vmem:[%s8238_s7] sm:$0xff]  ;;  %v1525_v33 = vld [vmem:[%s8238_s7 + $0x98] sm:$0xff]  ;;  %v6007_v36 = vpack.c.bf16 %v1463_v24, %v1448_v23  ;;  %v6009_v38 = vpack.c.bf16 %v1494_v29, %v1479_v25  ;;  %v1512_v25 = vld [vmem:[%s8238_s7 + $0x30] sm:$0xff] }
 0x49b   :  { %v6074_v42 = vpack.c.bf16 %v1507_v31, %v1506_v30  ;;  %v1505_v23 = vld [vmem:[%s8236_s4 + $0x1d8] sm:$0x3f]  ;;  %v1530_v30 = vld [vmem:[%s8238_s7 + $0xc0] sm:$0xff]  ;;  %v1531_v31 = vld [vmem:[%s8238_s7 + $0xc8] sm:$0xff] }
 0x49c   :  { %5071 = vmatmul.mubr.msk.f32.vlgmr.msra.gmra.mrb[12].mxu0 %vm446_vm5, %v7341_v26  ;;  %5084 = vmatmul.mubr.msk.f32.vlgmr.msra.gmra.mrb[8].mxu1 %vm355_vm4, %v7390_v14 }
 0x49d   :  { %5974 = vmatpush1.bf16.msra.mxu0 %v5973_v44  ;;  %6038 = vmatpush1.bf16.msra.mxu1 %v6037_v45  ;;  %v6076_v44 = vpack.c.bf16 %v1525_v33, %v1524_v32  ;;  %v1508_v45 = vld [vmem:[%s8238_s7 + $0x10] sm:$0xff]  ;;  %v6088_v32 = vpack.c.bf16 %v1531_v31, %v1530_v30  ;;  %v1514_v33 = vld [vmem:[%s8238_s7 + $0x40] sm:$0xff]  ;;  %v7575_v30 = vld [vmem:[%s8239_s6 + $0x8] sm:$0xff] }
 0x49e   :  { %5976 = vmatprep.subr.bf16.mxu0 %v5975_v48  ;;  %6041 = vmatprep.subr.msk.bf16.mxu1 %vm7232_vm3, %v6039_v49  ;;  %v1527_v48 = vld [vmem:[%s8238_s7 + $0xa8] sm:$0xff]  ;;  %v6012_v49 = vpack.c.bf16 %v1493_v40, %v1478_v39  ;;  %v6078_v53 = vpack.c.bf16 %v1509_v46, %v1508_v45  ;;  %v1516_v40 = vld [vmem:[%s8238_s7 + $0x50] sm:$0xff]  ;;  %v1518_v46 = vld [vmem:[%s8238_s7 + $0x60] sm:$0xff] }
 0x49f   :  { %1297 = vmatprep.mubr.f32.mxu0 %v6881_v1  ;;  %2152 = vmatprep.mubr.f32.mxu1 %v6881_v1  ;;  %v6080_v55 = vpack.c.bf16 %v1527_v48, %v1526_v47  ;;  %v1519_v47 = vld [vmem:[%s8238_s7 + $0x68] sm:$0xff] }
 0x4a0   :  { %v6098_v48 = vpack.c.bf16 %v1519_v47, %v1518_v46  ;;  %v1568_v47 = vld [vmem:[%s8238_s7 + $0x1f0] sm:$0xff] }
 0x4a1   :  { %5978 = vmatpush1.bf16.msra.mxu0 %v5977_v56  ;;  %6044 = vmatpush1.bf16.msk.msra.mxu1 %vm7232_vm3, %v6042_v57  ;;  %v1510_v56 = vld [vmem:[%s8238_s7 + $0x20] sm:$0xff]  ;;  %v1511_v57 = vld [vmem:[%s8238_s7 + $0x28] sm:$0xff] }
 0x4a2   :  { %5988 = vmatprep.subr.bf16.mxu0 %v5987_v60  ;;  %6056 = vmatprep.subr.bf16.mxu1 %v6055_v61  ;;  %v6029_v61 = vpack.c.bf16 %v1498_v54, %v1483_v52  ;;  %v6082_v2 = vpack.c.bf16 %v1511_v57, %v1510_v56  ;;  %v1521_v52 = vld [vmem:[%s8238_s7 + $0x78] sm:$0xff]  ;;  %v1554_v54 = vld [vmem:[%s8238_s7 + $0x180] sm:$0xff] }
 0x4a3   :  { %v1586_v56 = vld [vmem:[%s8238_s7 + $0x280] sm:$0xff] }
 0x4a4   :  { %5073 = vmatmul.mubr.msk.f32.vlgmr.msra.gmra.mrb[14].mxu0 %vm446_vm5, %v7341_v26  ;;  %5090 = vmatmul.mubr.msk.f32.vlgmr.msra.gmra.mrb[10].mxu1 %vm355_vm4, %v7390_v14 }
 0x4a5   :  { %5990 = vmatpush1.bf16.msra.mxu0 %v5989_v6  ;;  %6058 = vmatpush1.bf16.msra.mxu1 %v6057_v7  ;;  %v6032_v6 = vpack.c.bf16 %v1497_v63, %v1482_v62  ;;  %v6045_v7 = vpack.c.bf16 %v1472_v4, %v1457_v3  ;;  %v1556_v63 = vld [vmem:[%s8238_s7 + $0x190] sm:$0xff] }
 0x4a6   :  { %5992 = vmatprep.subr.bf16.mxu0 %v5991_v11  ;;  %6061 = vmatprep.subr.msk.bf16.mxu1 %vm7232_vm3, %v6059_v12  ;;  %v1487_v11 = vld [vmem:[%s8236_s4 + $0x148] sm:$0xff]  ;;  %v1502_v12 = vld [vmem:[%s8236_s4 + $0x1c0] sm:$0x3f]  ;;  %v1540_v4 = vld [vmem:[%s8238_s7 + $0x110] sm:$0xff] }
 0x4a7   :  { %1439 = vmatprep.mubr.f32.mxu0 %v6881_v1  ;;  %2294 = vmatprep.mubr.f32.mxu1 %v6881_v1  ;;  %v6049_v15 = vpack.c.bf16 %v1502_v12, %v1487_v11  ;;  %v1542_v11 = vld [vmem:[%s8238_s7 + $0x120] sm:$0xff]  ;;  %v1543_v12 = vld [vmem:[%s8238_s7 + $0x128] sm:$0xff] }
 0x4a9   :  { %5994 = vmatpush1.bf16.msra.mxu0 %v5993_v20  ;;  %6064 = vmatpush1.bf16.msk.msra.mxu1 %vm7232_vm3, %v6062_v21  ;;  %v1475_v20 = vld [vmem:[%s8236_s4 + $0xe8] sm:$0xff] }
 0x4aa   :  { %6006 = vmatprep.subr.bf16.mxu0 %v6005_v22  ;;  %6073 = vmatprep.subr.bf16.mxu1 %v6072_v28  ;;  %v6066_v21 = vpack.c.bf16 %v1475_v20, %v1460_v19  ;;  %v1490_v22 = vld [vmem:[%s8236_s4 + $0x160] sm:$0xff]  ;;  %v1513_v28 = vld [vmem:[%s8238_s7 + $0x38] sm:$0xff] }
 0x4ab   :  { %v6069_v24 = vpack.c.bf16 %v1505_v23, %v1490_v22  ;;  %v6086_v29 = vpack.c.bf16 %v1513_v28, %v1512_v25  ;;  %v1545_v19 = vld [vmem:[%s8238_s7 + $0x138] sm:$0xff]  ;;  %v1563_v22 = vld [vmem:[%s8238_s7 + $0x1c8] sm:$0xff]  ;;  %v821_v28 = vsub.s32 6, %v7302_v34 }
 0x4ac   :  { %5075 = vmatmul.mubr.msk.f32.vlgmr.msra.gmra.mrb[16].mxu0 %vm446_vm5, %v7341_v26  ;;  %5096 = vmatmul.mubr.msk.f32.vlgmr.msra.gmra.mrb[12].mxu1 %vm355_vm4, %v7390_v14  ;;  %v1467_v26 = vld [vmem:[%s8236_s4 + $0xa8] sm:$0xff]  ;;  %s8263_s4 = sld [smem:[#allocation60_spill]] }
 0x4ad   :  { %6008 = vmatpush1.bf16.msra.mxu0 %v6007_v36  ;;  %1939 = vmatprep.mubr.f32.mxu0 %v6881_v1  ;;  %v6027_v60 = vpack.c.bf16 %v1467_v26, %v1452_v51  ;;  %v1515_v36 = vld [vmem:[%s8238_s7 + $0x48] sm:$0xff]  ;;  %v1520_v26 = vld [vmem:[%s8238_s7 + $0x70] sm:$0xff]  ;;  %v7580_v31 = vrot.slane %v7575_v30, %v821_v28 }
 0x4ae   :  { %6011 = vmatprep.subr.msk.bf16.mxu0 %vm7232_vm3, %v6009_v38  ;;  %6075 = vmatpush3.bf16.msra.mxu1 %v6074_v42  ;;  %v6090_v8 = vpack.c.bf16 %v1515_v36, %v1514_v33  ;;  %v1532_v38 = vld [vmem:[%s8238_s7 + $0xd0] sm:$0xff]  ;;  %v6094_v42 = vpack.c.bf16 %v1517_v41, %v1516_v40  ;;  %v1547_v25 = vld [vmem:[%s8238_s7 + $0x148] sm:$0xff]  ;;  %v1565_v33 = vld [vmem:[%s8238_s7 + $0x1d8] sm:$0xff]  ;;  %v825_v36 = vsub.s32 7, %v7302_v34 }
 0x4af   :  { %6077 = vmatprep.subr.bf16.mxu1 %v6076_v44  ;;  %v1535_v44 = vld [vmem:[%s8238_s7 + $0xe8] sm:$0xff]  ;;  %v1566_v41 = vld [vmem:[%s8238_s7 + $0x1e0] sm:$0xff] }
 0x4b0   :  { %v6096_v45 = vpack.c.bf16 %v1535_v44, %v1534_v43  ;;  %v7590_v40 = vrot.slane %v7575_v30, %v825_v36  ;;  %v1550_v44 = vld [vmem:[%s8238_s7 + $0x160] sm:$0xff] }
 0x4b1   :  { %6014 = vmatpush1.bf16.msk.msra.mxu0 %vm7232_vm3, %v6012_v49  ;;  %v1536_v49 = vld [vmem:[%s8238_s7 + $0xf0] sm:$0xff] }
 0x4b2   :  { %6026 = vmatprep.subr.bf16.mxu0 %v6025_v50  ;;  %6079 = vmatpush3.bf16.msra.mxu1 %v6078_v53  ;;  %v1537_v50 = vld [vmem:[%s8238_s7 + $0xf8] sm:$0xff]  ;;  %v6102_v53 = vpack.c.bf16 %v1521_v52, %v1520_v26  ;;  %v1618_v52 = vld [vmem:[%s8238_s7 + $0x380] sm:$0xff] }
 0x4b3   :  { %6081 = vmatprep.subr.bf16.mxu1 %v6080_v55  ;;  %v6100_v51 = vpack.c.bf16 %v1537_v50, %v1536_v49  ;;  %v1555_v55 = vld [vmem:[%s8238_s7 + $0x188] sm:$0xff]  ;;  %v1552_v50 = vld [vmem:[%s8238_s7 + $0x170] sm:$0xff] }
 0x4b4   :  { %5081 = vmatmul.mubr.msk.f32.vlgmr.msra.gmra.mrb[18].mxu0 %vm355_vm4, %v7390_v14  ;;  %v6104_v57 = vpack.c.bf16 %v1555_v55, %v1554_v54 }
 0x4b5   :  { %6028 = vmatpush1.bf16.msra.mxu0 %v6027_v60  ;;  %2081 = vmatprep.mubr.f32.mxu0 %v6881_v1  ;;  %v1539_v60 = vld [vmem:[%s8238_s7 + $0x108] sm:$0xff] }
 0x4b6   :  { %6031 = vmatprep.subr.msk.bf16.mxu0 %vm7232_vm3, %v6029_v61  ;;  %6083 = vmatpush3.bf16.msra.mxu1 %v6082_v2  ;;  %v6136_v61 = vpack.c.bf16 %v1587_v58, %v1586_v56  ;;  %v6106_v62 = vpack.c.bf16 %v1539_v60, %v1538_v59  ;;  %v1557_v2 = vld [vmem:[%s8238_s7 + $0x198] sm:$0xff]  ;;  %v813_v59 = vsub.s32 4, %v7302_v34 }
 0x4b7   :  { %6085 = vmatprep.subr.bf16.mxu1 %v6084_v5  ;;  %v6108_v3 = vpack.c.bf16 %v1557_v2, %v1556_v63  ;;  %v1541_v5 = vld [vmem:[%s8238_s7 + $0x118] sm:$0xff] }
 0x4b8   :  { %v846_v60 = vrot.slane %v7575_v30, %v813_v59 }
 0x4b9   :  { %6034 = vmatpush1.bf16.msk.msra.mxu0 %vm7232_vm3, %v6032_v6  ;;  %v6110_v6 = vpack.c.bf16 %v1541_v5, %v1540_v4 }
 0x4ba   :  { %6046 = vmatprep.subr.bf16.mxu0 %v6045_v7  ;;  %6087 = vmatpush3.bf16.msra.mxu1 %v6086_v29  ;;  %v1558_v7 = vld [vmem:[%s8238_s7 + $0x1a0] sm:$0xff] }
 0x4bb   :  { %6089 = vmatprep.subr.bf16.mxu1 %v6088_v32  ;;  %v6112_v10 = vpack.c.bf16 %v1559_v9, %v1558_v7  ;;  %v1564_v32 = vld [vmem:[%s8238_s7 + $0x1d0] sm:$0xff]  ;;  %v1570_v9 = vld [vmem:[%s8238_s7 + $0x200] sm:$0xff] }
 0x4bc   :  { %5087 = vmatmul.mubr.msk.f32.vlgmr.msra.gmra.mrb[20].mxu0 %vm355_vm4, %v7390_v14 }
 0x4bd   :  { %6048 = vmatpush1.bf16.msra.mxu0 %v6047_v13  ;;  %2223 = vmatprep.mubr.f32.mxu0 %v6881_v1  ;;  %v6114_v13 = vpack.c.bf16 %v1543_v12, %v1542_v11 }
 0x4be   :  { %6051 = vmatprep.subr.msk.bf16.mxu0 %vm7232_vm3, %v6049_v15  ;;  %6091 = vmatpush3.bf16.msra.mxu1 %v6090_v8  ;;  %v1560_v15 = vld [vmem:[%s8238_s7 + $0x1b0] sm:$0xff]  ;;  %v6124_v8 = vpack.c.bf16 %v1565_v33, %v1564_v32  ;;  %v1590_v33 = vld [vmem:[%s8238_s7 + $0x2a0] sm:$0xff] }
 0x4bf   :  { %v6116_v17 = vpack.c.bf16 %v1561_v16, %v1560_v15  ;;  %v1588_v15 = vld [vmem:[%s8238_s7 + $0x290] sm:$0xff]  ;;  %v1589_v16 = vld [vmem:[%s8238_s7 + $0x298] sm:$0xff] }
 0x4c1   :  { %6054 = vmatpush1.bf16.msk.msra.mxu0 %vm7232_vm3, %v6052_v18  ;;  %v1544_v18 = vld [vmem:[%s8238_s7 + $0x130] sm:$0xff] }
 0x4c2   :  { %6065 = vmatprep.subr.bf16.mxu0 %v6879_v0  ;;  %v6118_v20 = vpack.c.bf16 %v1545_v19, %v1544_v18 }
 0x4c4   :  { %5093 = vmatmul.mubr.msk.f32.vlgmr.msra.gmra.mrb[22].mxu0 %vm355_vm4, %v7390_v14 }
 0x4c5   :  { %6067 = vmatpush3.bf16.msra.mxu0 %v6066_v21  ;;  %5595 = vmatprep.mubr.msk.f32.mxu0 %vm6880_vm0, %v6881_v1  ;;  %v1562_v21 = vld [vmem:[%s8238_s7 + $0x1c0] sm:$0xff] }
 0x4c6   :  { %6068 = vmatprep.subr.bf16.mxu0 %v6879_v0  ;;  %v6120_v23 = vpack.c.bf16 %v1563_v22, %v1562_v21 }
 0x4c9   :  { %6071 = vmatpush3.bf16.msk.msra.mxu0 %vm7232_vm3, %v6069_v24  ;;  %v1546_v24 = vld [vmem:[%s8238_s7 + $0x140] sm:$0xff] }
 0x4ca   :  { %6105 = vmatprep.subr.bf16.mxu0 %v6104_v57  ;;  %v6122_v29 = vpack.c.bf16 %v1547_v25, %v1546_v24  ;;  %v6140_v24 = vpack.c.bf16 %v1589_v16, %v1588_v15  ;;  %v1572_v25 = vld [vmem:[%s8238_s7 + $0x210] sm:$0xff] }
 0x4cb   :  { %v1596_v16 = vld [vmem:[%s8238_s7 + $0x2d0] sm:$0xff] }
 0x4cc   :  { %5596 = vmatmul.mubr.msk.f32.vlgmr.msra.gmra.mrb[24].mxu0 %vm355_vm4, %v7390_v14  ;;  %v1533_v14 = vld [vmem:[%s8238_s7 + $0xd8] sm:$0xff] }
 0x4cd   :  { %v6092_v39 = vpack.c.bf16 %v1533_v14, %v1532_v38  ;;  %6107 = vmatpush3.bf16.msra.mxu0 %v6106_v62  ;;  %v1548_v38 = vld [vmem:[%s8238_s7 + $0x150] sm:$0xff]  ;;  %v1549_v14 = vld [vmem:[%s8238_s7 + $0x158] sm:$0xff] }
 0x4ce   :  { %6109 = vmatprep.subr.bf16.mxu0 %v6108_v3 }
 0x4cf   :  { %6093 = vmatprep.subr.bf16.mxu1 %v6092_v39  ;;  %v6126_v39 = vpack.c.bf16 %v1549_v14, %v1548_v38 }
 0x4d0   :  { %6095 = vmatpush3.bf16.msra.mxu1 %v6094_v42  ;;  %v1567_v42 = vld [vmem:[%s8238_s7 + $0x1e8] sm:$0xff] }
 0x4d1   :  { %6097 = vmatprep.subr.bf16.mxu1 %v6096_v45  ;;  %6111 = vmatpush3.bf16.msra.mxu0 %v6110_v6  ;;  %v6128_v43 = vpack.c.bf16 %v1567_v42, %v1566_v41  ;;  %v1551_v45 = vld [vmem:[%s8238_s7 + $0x168] sm:$0xff]  ;;  %v1574_v41 = vld [vmem:[%s8238_s7 + $0x220] sm:$0xff] }
 0x4d2   :  { %6113 = vmatprep.subr.bf16.mxu0 %v6112_v10  ;;  %v6130_v46 = vpack.c.bf16 %v1551_v45, %v1550_v44  ;;  %v1571_v10 = vld [vmem:[%s8238_s7 + $0x208] sm:$0xff] }
 0x4d3   :  { %v6138_v22 = vpack.c.bf16 %v1571_v10, %v1570_v9  ;;  %v1575_v42 = vld [vmem:[%s8238_s7 + $0x228] sm:$0xff]  ;;  %v1578_v10 = vld [vmem:[%s8238_s7 + $0x240] sm:$0xff] }
 0x4d4   :  { %6099 = vmatpush3.bf16.msra.mxu1 %v6098_v48  ;;  %v1569_v48 = vld [vmem:[%s8238_s7 + $0x1f8] sm:$0xff] }
 0x4d5   :  { %6101 = vmatprep.subr.bf16.mxu1 %v6100_v51  ;;  %6115 = vmatpush3.bf16.msra.mxu0 %v6114_v13  ;;  %v6132_v49 = vpack.c.bf16 %v1569_v48, %v1568_v47  ;;  %v1553_v51 = vld [vmem:[%s8238_s7 + $0x178] sm:$0xff] }
 0x4d6   :  { %6117 = vmatprep.subr.bf16.mxu0 %v6116_v17  ;;  %v6134_v26 = vpack.c.bf16 %v1553_v51, %v1552_v50  ;;  %v1593_v47 = vld [vmem:[%s8238_s7 + $0x2b8] sm:$0xff] }
 0x4d8   :  { %6103 = vmatpush3.bf16.msra.mxu1 %v6102_v53  ;;  %v1619_v53 = vld [vmem:[%s8238_s7 + $0x388] sm:$0xff] }
 0x4d9   :  { %6137 = vmatprep.subr.bf16.mxu1 %v6136_v61  ;;  %6119 = vmatpush3.bf16.msra.mxu0 %v6118_v20  ;;  %v6168_v54 = vpack.c.bf16 %v1619_v53, %v1618_v52  ;;  %v7609_v61 = vld [vmem:[%s8239_s6] sm:$0xff]  ;;  %v817_v20 = vsub.s32 5, %v7302_v34  ;;  %v830_v52 = vrot.slane %v7575_v30, %v7305_v35  ;;  %v805_v53 = vsub.s32 2, %v7302_v34  ;;  %s6883_s6 = smov 64  }
 0x4da   :  { %6121 = vmatprep.subr.bf16.mxu0 %v6120_v23  ;;  %v798_v5 = vrot.slane %v7609_v61, %v7305_v35  ;;  %v802_v6 = vrot.slane %v7609_v61, %v7309_v37  ;;  %v814_v23 = vrot.slane %v7609_v61, %v813_v59  ;;  %v834_v59 = vrot.slane %v7575_v30, %v7309_v37 }
 0x4db   :  { %v818_v32 = vrot.slane %v7609_v61, %v817_v20 }
 0x4dd   :  { %6123 = vmatpush3.bf16.msra.mxu0 %v6122_v29  ;;  %v1573_v29 = vld [vmem:[%s8238_s7 + $0x218] sm:$0xff] }
 0x4de   :  { %6125 = vmatprep.subr.bf16.mxu0 %v6124_v8  ;;  %v1591_v8 = vld [vmem:[%s8238_s7 + $0x2a8] sm:$0xff]  ;;  %v6142_v38 = vpack.c.bf16 %v1573_v29, %v1572_v25  ;;  %v1581_v25 = vld [vmem:[%s8238_s7 + $0x258] sm:$0xff]  ;;  %v850_v29 = vrot.slane %v7575_v30, %v817_v20 }
 0x4e1   :  { %6127 = vmatpush3.bf16.msra.mxu0 %v6126_v39  ;;  %v6144_v39 = vpack.c.bf16 %v1591_v8, %v1590_v33  ;;  %v1599_v33 = vld [vmem:[%s8238_s7 + $0x2e8] sm:$0xff] }
 0x4e2   :  { %6129 = vmatprep.subr.bf16.mxu0 %v6128_v43 }
 0x4e5   :  { %6131 = vmatpush3.bf16.msra.mxu0 %v6130_v46  ;;  %v1592_v46 = vld [vmem:[%s8238_s7 + $0x2b0] sm:$0xff] }
 0x4e6   :  { %6133 = vmatprep.subr.bf16.mxu0 %v6132_v49 }
 0x4e9   :  { %6135 = vmatpush3.bf16.msra.mxu0 %v6134_v26  ;;  %v6146_v26 = vpack.c.bf16 %v1575_v42, %v1574_v41  ;;  %v809_v41 = vsub.s32 3, %v7302_v34 }
 0x4ea   :  { %6169 = vmatprep.subr.bf16.mxu0 %v6168_v54  ;;  %v6148_v54 = vpack.c.bf16 %v1593_v47, %v1592_v46  ;;  %v1600_v46 = vld [vmem:[%s8238_s7 + $0x2f0] sm:$0xff]  ;;  %v1601_v47 = vld [vmem:[%s8238_s7 + $0x2f8] sm:$0xff] }
 0x557   :  { %v944_v55 = vpop.f32.mrb[6].mxu0  ;;  %v7602_v56 = vpop.f32.mrb[2].mxu1 }
 0x558   :  { %v946_v57 = vpop.f32.mrb[7].mxu0  ;;  %v7604_v58 = vpop.f32.mrb[3].mxu1  ;;  %v945_v7 = vadd.f32 %v944_v55, %v798_v5  ;;  %v1576_v55 = vld [vmem:[%s8238_s7 + $0x230] sm:$0xff]  ;;  %v838_v5 = vrot.slane %v7575_v30, %v805_v53 }
 0x559   :  { %v947_v11 = vadd.f32 %v946_v57, %v802_v6  ;;  %v1577_v57 = vld [vmem:[%s8238_s7 + $0x238] sm:$0xff] }
 0x55a   :  { %v6150_v6 = vpack.c.bf16 %v1577_v57, %v1576_v55  ;;  %v806_v55 = vrot.slane %v7609_v61, %v805_v53  ;;  %v1584_v57 = vld [vmem:[%s8238_s7 + $0x270] sm:$0xff] }
 0x55f   :  { %v7611_v62 = vpop.f32.mrb[8].mxu0  ;;  %v1370_v63 = vpop.f32.mrb[4].mxu1 }
 0x560   :  { %v7613_v2 = vadd.f32 %v1370_v63, %v846_v60  ;;  %v7615_v3 = vpop.f32.mrb[9].mxu0  ;;  %v7617_v4 = vpop.f32.mrb[5].mxu1  ;;  %v1594_v60 = vld [vmem:[%s8238_s7 + $0x2c0] sm:$0xff]  ;;  %v1595_v63 = vld [vmem:[%s8238_s7 + $0x2c8] sm:$0xff]  ;;  %v1016_v53 = vadd.f32 %v7611_v62, %v806_v55  ;;  %v1624_v55 = vld [vmem:[%s8238_s7 + $0x3b0] sm:$0xff] }
 0x561   :  { %v6152_v9 = vpack.c.bf16 %v1595_v63, %v1594_v60  ;;  %v1373_v42 = vadd.f32 %v7617_v4, %v850_v29  ;;  %v1651_v60 = vld [vmem:[%s8238_s7 + $0x488] sm:$0xff]  ;;  %v1605_v29 = vld [vmem:[%s8238_s7 + $0x318] sm:$0xff] }
 0x567   :  { %v1086_v12 = vpop.f32.mrb[10].mxu0  ;;  %v1870_v13 = vpop.f32.mrb[6].mxu1 }
 0x568   :  { %v2371_v17 = vmul.f32 %v1870_v13, %v945_v7  ;;  %v1088_v18 = vpop.f32.mrb[11].mxu0  ;;  %v1872_v19 = vpop.f32.mrb[7].mxu1  ;;  %v1087_v14 = vadd.f32 %v1086_v12, %v814_v23  ;;  %v1229_v7 = vadd.f32 %v7602_v56, %v830_v52  ;;  %v1231_v12 = vadd.f32 %v7604_v58, %v834_v59  ;;  %v1650_v59 = vld [vmem:[%s8238_s7 + $0x480] sm:$0xff] }
 0x569   :  { %v2372_v21 = vmul.f32 %v1872_v19, %v947_v11  ;;  %v1089_v43 = vadd.f32 %v1088_v18, %v818_v32  ;;  %v1579_v11 = vld [vmem:[%s8238_s7 + $0x248] sm:$0xff]  ;;  %v1598_v32 = vld [vmem:[%s8238_s7 + $0x2e0] sm:$0xff] }
 0x56a   :  { %v6154_v23 = vpack.c.bf16 %v1579_v11, %v1578_v10  ;;  %v1635_v10 = vld [vmem:[%s8238_s7 + $0x408] sm:$0xff] }
 0x56b   :  { %2450 = vmatprep.mubr.f32.mxu1 %v2372_v21 }
 0x56c   :  { %2451 = vmatmul.mubr.f32.vlgmr.msra.gmra.mrb[14].mxu1 %v2371_v17  ;;  %v1597_v17 = vld [vmem:[%s8238_s7 + $0x2d8] sm:$0xff] }
 0x56d   :  { %6139 = vmatpush3.bf16.msra.mxu1 %v6138_v22  ;;  %v6156_v58 = vpack.c.bf16 %v1597_v17, %v1596_v16 }
 0x56e   :  { %6141 = vmatprep.subr.bf16.mxu1 %v6140_v24  ;;  %v1580_v24 = vld [vmem:[%s8238_s7 + $0x250] sm:$0xff] }
 0x56f   :  { %v7638_v44 = vpop.f32.mrb[12].mxu0  ;;  %v2012_v45 = vpop.f32.mrb[8].mxu1  ;;  %v6158_v8 = vpack.c.bf16 %v1581_v25, %v1580_v24  ;;  %v1604_v25 = vld [vmem:[%s8238_s7 + $0x310] sm:$0xff] }
 0x570   :  { %v7642_v48 = vmul.f32 %v2012_v45, %v1087_v14  ;;  %v7644_v49 = vpop.f32.mrb[13].mxu0  ;;  %v2014_v50 = vpop.f32.mrb[9].mxu1  ;;  %v1582_v14 = vld [vmem:[%s8238_s7 + $0x260] sm:$0xff] }
 0x571   :  { %v2376_v51 = vmul.f32 %v2014_v50, %v1089_v43  ;;  %6143 = vmatpush3.bf16.msra.mxu1 %v6142_v38  ;;  %v6160_v38 = vpack.c.bf16 %v1599_v33, %v1598_v32  ;;  %v1636_v33 = vld [vmem:[%s8238_s7 + $0x410] sm:$0xff] }
 0x572   :  { %6145 = vmatprep.subr.bf16.mxu1 %v6144_v39  ;;  %v1583_v39 = vld [vmem:[%s8238_s7 + $0x268] sm:$0xff] }
 0x573   :  { %2590 = vmatprep.mubr.f32.mxu1 %v2376_v51 }
 0x575   :  { %6147 = vmatpush3.bf16.msra.mxu1 %v6146_v26 }
 0x576   :  { %6149 = vmatprep.subr.bf16.mxu1 %v6148_v54  ;;  %v6162_v54 = vpack.c.bf16 %v1583_v39, %v1582_v14  ;;  %v826_v14 = vrot.slane %v7609_v61, %v825_v36  ;;  %v1607_v36 = vld [vmem:[%s8238_s7 + $0x328] sm:$0xff] }
 0x577   :  { %v1299_v13 = vpop.f32.mrb[14].mxu0  ;;  %v2154_v15 = vpop.f32.mrb[10].mxu1 }
 0x578   :  { %v7662_v18 = vadd.f32 %v1299_v13, %v838_v5  ;;  %v7664_v19 = vmul.f32 %v2154_v15, %v1229_v7  ;;  %v7666_v21 = vpop.f32.mrb[15].mxu0  ;;  %v2156_v56 = vpop.f32.mrb[11].mxu1  ;;  %v1602_v5 = vld [vmem:[%s8238_s7 + $0x300] sm:$0xff]  ;;  %v1603_v7 = vld [vmem:[%s8238_s7 + $0x308] sm:$0xff]  ;;  %v1620_v13 = vld [vmem:[%s8238_s7 + $0x390] sm:$0xff] }
 0x579   :  { %v7668_v22 = vmul.f32 %v2156_v56, %v1231_v12  ;;  %6151 = vmatpush3.bf16.msra.mxu1 %v6150_v6  ;;  %v6200_v6 = vpack.c.bf16 %v1651_v60, %v1650_v59  ;;  %v1621_v15 = vld [vmem:[%s8238_s7 + $0x398] sm:$0xff]  ;;  %v1652_v56 = vld [vmem:[%s8238_s7 + $0x490] sm:$0xff] }
 0x57a   :  { %6153 = vmatprep.subr.bf16.mxu1 %v6152_v9  ;;  %v1634_v9 = vld [vmem:[%s8238_s7 + $0x400] sm:$0xff]  ;;  %v6172_v32 = vpack.c.bf16 %v1621_v15, %v1620_v13  ;;  %v1657_v59 = vld [vmem:[%s8238_s7 + $0x4b8] sm:$0xff]  ;;  %v1627_v13 = vld [vmem:[%s8238_s7 + $0x3c8] sm:$0xff] }
 0x57b   :  { %v6202_v24 = vpack.c.bf16 %v1635_v10, %v1634_v9  ;;  %v1640_v9 = vld [vmem:[%s8238_s7 + $0x430] sm:$0xff]  ;;  %v1641_v10 = vld [vmem:[%s8238_s7 + $0x438] sm:$0xff]  ;;  %v1658_v15 = vld [vmem:[%s8238_s7 + $0x4c0] sm:$0xff] }
 0x57d   :  { %6155 = vmatpush3.bf16.msra.mxu1 %v6154_v23  ;;  %v1653_v23 = vld [vmem:[%s8238_s7 + $0x498] sm:$0xff] }
 0x57e   :  { %6157 = vmatprep.subr.bf16.mxu1 %v6156_v58  ;;  %v6170_v58 = vpack.c.bf16 %v1603_v7, %v1602_v5  ;;  %v6204_v39 = vpack.c.bf16 %v1653_v23, %v1652_v56  ;;  %v6214_v56 = vpack.c.bf16 %v1641_v10, %v1640_v9  ;;  %v1610_v23 = vld [vmem:[%s8238_s7 + $0x340] sm:$0xff]  ;;  %v1616_v9 = vld [vmem:[%s8238_s7 + $0x370] sm:$0xff]  ;;  %v1617_v10 = vld [vmem:[%s8238_s7 + $0x378] sm:$0xff] }
 0x57f   :  { %v1441_v43 = vpop.f32.mrb[16].mxu0  ;;  %v2296_v45 = vpop.f32.mrb[12].mxu1 }
 0x580   :  { %v7684_v20 = vadd.f32 %v1441_v43, %v7580_v31  ;;  %v7687_v50 = vmul.f32 %v2296_v45, %v7613_v2  ;;  %v1443_v51 = vpop.f32.mrb[17].mxu0  ;;  %v2298_v26 = vpop.f32.mrb[13].mxu1  ;;  %v6164_v31 = vpack.c.bf16 %v1601_v47, %v1600_v46  ;;  %v1585_v2 = vld [vmem:[%s8238_s7 + $0x278] sm:$0xff]  ;;  %v1654_v43 = vld [vmem:[%s8238_s7 + $0x4a0] sm:$0xff]  ;;  %v1655_v45 = vld [vmem:[%s8238_s7 + $0x4a8] sm:$0xff] }
 0x581   :  { %v7690_v52 = vadd.f32 %v1443_v51, %v7590_v40  ;;  %v7692_v4 = vmul.f32 %v2298_v26, %v1373_v42  ;;  %6159 = vmatpush3.bf16.msra.mxu1 %v6158_v8  ;;  %v810_v40 = vrot.slane %v7609_v61, %v809_v41  ;;  %v6166_v63 = vpack.c.bf16 %v1585_v2, %v1584_v57  ;;  %v1637_v8 = vld [vmem:[%s8238_s7 + $0x418] sm:$0xff]  ;;  %v1623_v42 = vld [vmem:[%s8238_s7 + $0x3a8] sm:$0xff]  ;;  %v1606_v47 = vld [vmem:[%s8238_s7 + $0x320] sm:$0xff] }
 0x582   :  { %6161 = vmatprep.subr.bf16.mxu1 %v6160_v38  ;;  %v1622_v38 = vld [vmem:[%s8238_s7 + $0x3a0] sm:$0xff]  ;;  %v6206_v46 = vpack.c.bf16 %v1637_v8, %v1636_v33  ;;  %v6208_v26 = vpack.c.bf16 %v1655_v45, %v1654_v43  ;;  %v1625_v2 = vld [vmem:[%s8238_s7 + $0x3b8] sm:$0xff] }
 0x583   :  { %v1018_v11 = vadd.f32 %v7615_v3, %v810_v40  ;;  %v822_v3 = vrot.slane %v7609_v61, %v821_v28  ;;  %v6174_v28 = vpack.c.bf16 %v1605_v29, %v1604_v25  ;;  %v6176_v51 = vpack.c.bf16 %v1623_v42, %v1622_v38  ;;  %v1656_v40 = vld [vmem:[%s8238_s7 + $0x4b0] sm:$0xff]  ;;  %v1661_v33 = vld [vmem:[%s8238_s7 + $0x4d8] sm:$0xff] }
 0x584   :  { %v6212_v7 = vpack.c.bf16 %v1657_v59, %v1656_v40  ;;  %v1612_v42 = vld [vmem:[%s8238_s7 + $0x350] sm:$0xff]  ;;  %v1613_v43 = vld [vmem:[%s8238_s7 + $0x358] sm:$0xff]  ;;  %v1647_v40 = vld [vmem:[%s8238_s7 + $0x468] sm:$0xff] }
 0x585   :  { %6163 = vmatpush3.bf16.msra.mxu1 %v6162_v54  ;;  %v1158_v61 = vadd.f32 %v7638_v44, %v822_v3  ;;  %v1638_v54 = vld [vmem:[%s8238_s7 + $0x420] sm:$0xff]  ;;  %v1629_v3 = vld [vmem:[%s8238_s7 + $0x3d8] sm:$0xff]  ;;  %v1632_v59 = vld [vmem:[%s8238_s7 + $0x3f0] sm:$0xff] }
 0x586   :  { %6165 = vmatprep.subr.bf16.mxu1 %v6164_v31  ;;  %v1160_v31 = vadd.f32 %v7644_v49, %v826_v14  ;;  %v1608_v49 = vld [vmem:[%s8238_s7 + $0x330] sm:$0xff] }
 0x587   :  { %v1941_v12 = vpop.f32.mrb[18].mxu0 }
 0x588   :  { %v2373_v16 = vmul.f32 %v1941_v12, %v1016_v53  ;;  %v1943_v17 = vpop.f32.mrb[19].mxu0  ;;  %v1609_v53 = vld [vmem:[%s8238_s7 + $0x338] sm:$0xff]  ;;  %v842_v12 = vrot.slane %v7575_v30, %v809_v41  ;;  %v1642_v30 = vld [vmem:[%s8238_s7 + $0x440] sm:$0xff]  ;;  %v1643_v41 = vld [vmem:[%s8238_s7 + $0x448] sm:$0xff] }
 0x589   :  { %v2374_v62 = vmul.f32 %v1943_v17, %v1018_v11  ;;  %6167 = vmatpush3.bf16.msra.mxu1 %v6166_v63  ;;  %v6178_v63 = vpack.c.bf16 %v1607_v36, %v1606_v47  ;;  %v1626_v11 = vld [vmem:[%s8238_s7 + $0x3c0] sm:$0xff]  ;;  %v6182_v17 = vpack.c.bf16 %v1609_v53, %v1608_v49  ;;  %v1631_v36 = vld [vmem:[%s8238_s7 + $0x3e8] sm:$0xff] }
 0x58a   :  { %6201 = vmatprep.subr.bf16.mxu1 %v6200_v6  ;;  %v6180_v6 = vpack.c.bf16 %v1625_v2, %v1624_v55  ;;  %v6184_v34 = vpack.c.bf16 %v1627_v13, %v1626_v11  ;;  %v1302_v25 = vadd.f32 %v7666_v21, %v842_v12  ;;  %v6218_v21 = vpack.c.bf16 %v1643_v41, %v1642_v30  ;;  %v1630_v47 = vld [vmem:[%s8238_s7 + $0x3e0] sm:$0xff]  ;;  %v1615_v55 = vld [vmem:[%s8238_s7 + $0x368] sm:$0xff]  ;;  %v1648_v13 = vld [vmem:[%s8238_s7 + $0x470] sm:$0xff] }
 0x58b   :  { %2520 = vmatprep.mubr.f32.mxu0 %v2374_v62  ;;  %v1611_v62 = vld [vmem:[%s8238_s7 + $0x348] sm:$0xff]  ;;  %v1646_v2 = vld [vmem:[%s8238_s7 + $0x460] sm:$0xff] }
 0x58c   :  { %2591 = vmatmul.mubr.f32.vlgmr.msra.gmra.mrb[16].mxu1 %v7642_v48  ;;  %2521 = vmatmul.mubr.f32.vlgmr.msra.gmra.mrb[26].mxu0 %v2373_v16  ;;  %v1639_v48 = vld [vmem:[%s8238_s7 + $0x428] sm:$0xff]  ;;  %v1666_v30 = vld [vmem:[%s8238_s7 + $0x500] sm:$0xff] }
 0x58d   :  { %6171 = vmatpush3.bf16.msra.mxu0 %v6170_v58  ;;  %6203 = vmatpush3.bf16.msra.mxu1 %v6202_v24  ;;  %v6210_v5 = vpack.c.bf16 %v1639_v48, %v1638_v54  ;;  %v1659_v16 = vld [vmem:[%s8238_s7 + $0x4c8] sm:$0xff]  ;;  %v1628_v24 = vld [vmem:[%s8238_s7 + $0x3d0] sm:$0xff]  ;;  %v1614_v48 = vld [vmem:[%s8238_s7 + $0x360] sm:$0xff] }
 0x58e   :  { %2730 = vmatprep.mubr.f32.mxu1 %v7668_v22  ;;  %6173 = vmatprep.subr.bf16.mxu0 %v6172_v32  ;;  %v6216_v58 = vpack.c.bf16 %v1659_v16, %v1658_v15  ;;  %v1660_v32 = vld [vmem:[%s8238_s7 + $0x4d0] sm:$0xff]  ;;  %v6188_v45 = vpack.c.bf16 %v1629_v3, %v1628_v24  ;;  %v1649_v15 = vld [vmem:[%s8238_s7 + $0x478] sm:$0xff]  ;;  %v1683_v16 = vld [vmem:[%s8238_s7 + $0x588] sm:$0xff] }
 0x58f   :  { %v2083_v57 = vpop.f32.mrb[20].mxu0  ;;  %6205 = vmatprep.subr.bf16.mxu1 %v6204_v39  ;;  %v6186_v39 = vpack.c.bf16 %v1611_v62, %v1610_v23  ;;  %v6198_v23 = vpack.c.bf16 %v1617_v10, %v1616_v9  ;;  %v6230_v62 = vpack.c.bf16 %v1649_v15, %v1648_v13  ;;  %v1667_v41 = vld [vmem:[%s8238_s7 + $0x508] sm:$0xff]  ;;  %v1698_v24 = vld [vmem:[%s8238_s7 + $0x600] sm:$0xff]  ;;  %v1685_v3 = vld [vmem:[%s8238_s7 + $0x598] sm:$0xff] }
 0x590   :  { %v7738_v44 = vmul.f32 %v2083_v57, %v1158_v61  ;;  %v2085_v22 = vpop.f32.mrb[21].mxu0  ;;  %v1662_v61 = vld [vmem:[%s8238_s7 + $0x4e0] sm:$0xff]  ;;  %v1691_v9 = vld [vmem:[%s8238_s7 + $0x5c8] sm:$0xff] }
 0x591   :  { %v2378_v60 = vmul.f32 %v2085_v22, %v1160_v31  ;;  %6175 = vmatpush3.bf16.msra.mxu0 %v6174_v28  ;;  %6207 = vmatpush3.bf16.msra.mxu1 %v6206_v46  ;;  %v6220_v28 = vpack.c.bf16 %v1661_v33, %v1660_v32  ;;  %v1645_v46 = vld [vmem:[%s8238_s7 + $0x458] sm:$0xff]  ;;  %v6192_v31 = vpack.c.bf16 %v1631_v36, %v1630_v47  ;;  %v1716_v32 = vld [vmem:[%s8238_s7 + $0x690] sm:$0xff]  ;;  %v1687_v47 = vld [vmem:[%s8238_s7 + $0x5a8] sm:$0xff] }
 0x592   :  { %6177 = vmatprep.subr.bf16.mxu0 %v6176_v51  ;;  %6209 = vmatprep.subr.bf16.mxu1 %v6208_v26  ;;  %v1663_v51 = vld [vmem:[%s8238_s7 + $0x4e8] sm:$0xff]  ;;  %v6190_v26 = vpack.c.bf16 %v1613_v43, %v1612_v42  ;;  %v1717_v33 = vld [vmem:[%s8238_s7 + $0x698] sm:$0xff]  ;;  %v1700_v43 = vld [vmem:[%s8238_s7 + $0x610] sm:$0xff] }
 0x593   :  { %2660 = vmatprep.mubr.f32.mxu0 %v2378_v60  ;;  %v6224_v57 = vpack.c.bf16 %v1663_v51, %v1662_v61  ;;  %v1633_v60 = vld [vmem:[%s8238_s7 + $0x3f8] sm:$0xff]  ;;  %v1718_v36 = vld [vmem:[%s8238_s7 + $0x6a0] sm:$0xff]  ;;  %v1719_v61 = vld [vmem:[%s8238_s7 + $0x6a8] sm:$0xff] }
 0x594   :  { %v6196_v11 = vpack.c.bf16 %v1633_v60, %v1632_v59  ;;  %v1669_v42 = vld [vmem:[%s8238_s7 + $0x518] sm:$0xff]  ;;  %v1672_v60 = vld [vmem:[%s8238_s7 + $0x530] sm:$0xff]  ;;  %v1722_v10 = vld [vmem:[%s8238_s7 + $0x6c0] sm:$0xff] }
 0x595   :  { %6179 = vmatpush3.bf16.msra.mxu0 %v6178_v63  ;;  %6211 = vmatpush3.bf16.msra.mxu1 %v6210_v5  ;;  %v1664_v63 = vld [vmem:[%s8238_s7 + $0x4f0] sm:$0xff]  ;;  %v1665_v5 = vld [vmem:[%s8238_s7 + $0x4f8] sm:$0xff] }
 0x596   :  { %6181 = vmatprep.subr.bf16.mxu0 %v6180_v6  ;;  %6213 = vmatprep.subr.bf16.mxu1 %v6212_v7  ;;  %v6194_v6 = vpack.c.bf16 %v1615_v55, %v1614_v48  ;;  %v6226_v7 = vpack.c.bf16 %v1647_v40, %v1646_v2  ;;  %v6228_v12 = vpack.c.bf16 %v1665_v5, %v1664_v63  ;;  %v1670_v48 = vld [vmem:[%s8238_s7 + $0x520] sm:$0xff]  ;;  %v1720_v2 = vld [vmem:[%s8238_s7 + $0x6b0] sm:$0xff]  ;;  %v1673_v63 = vld [vmem:[%s8238_s7 + $0x538] sm:$0xff] }
 0x597   :  { %v2225_v29 = vpop.f32.mrb[22].mxu0  ;;  %v6272_v55 = vpack.c.bf16 %v1719_v61, %v1718_v36  ;;  %v1704_v5 = vld [vmem:[%s8238_s7 + $0x630] sm:$0xff]  ;;  %v1710_v36 = vld [vmem:[%s8238_s7 + $0x660] sm:$0xff] }
 0x598   :  { %v7761_v8 = vmul.f32 %v2225_v29, %v7662_v18  ;;  %v2227_v38 = vpop.f32.mrb[23].mxu0  ;;  %v1644_v18 = vld [vmem:[%s8238_s7 + $0x450] sm:$0xff] }
 0x599   :  { %v7763_v14 = vmul.f32 %v2227_v38, %v1302_v25  ;;  %6183 = vmatpush3.bf16.msra.mxu0 %v6182_v17  ;;  %6215 = vmatpush3.bf16.msra.mxu1 %v6214_v56  ;;  %v6222_v54 = vpack.c.bf16 %v1645_v46, %v1644_v18  ;;  %v1714_v17 = vld [vmem:[%s8238_s7 + $0x680] sm:$0xff]  ;;  %v1715_v56 = vld [vmem:[%s8238_s7 + $0x688] sm:$0xff]  ;;  %v1684_v29 = vld [vmem:[%s8238_s7 + $0x590] sm:$0xff]  ;;  %v6234_v38 = vpack.c.bf16 %v1667_v41, %v1666_v30 }
 0x59a   :  { %6185 = vmatprep.subr.bf16.mxu0 %v6184_v34  ;;  %6217 = vmatprep.subr.bf16.mxu1 %v6216_v58  ;;  %v6264_v58 = vpack.c.bf16 %v1715_v56, %v1714_v17  ;;  %v1699_v25 = vld [vmem:[%s8238_s7 + $0x608] sm:$0xff]  ;;  %v1701_v18 = vld [vmem:[%s8238_s7 + $0x618] sm:$0xff]  ;;  %v1686_v46 = vld [vmem:[%s8238_s7 + $0x5a0] sm:$0xff] }
 0x59b   :  { %v1706_v17 = vld [vmem:[%s8238_s7 + $0x640] sm:$0xff]  ;;  %v1725_v30 = vld [vmem:[%s8238_s7 + $0x6d8] sm:$0xff] }
 0x59d   :  { %6187 = vmatpush3.bf16.msra.mxu0 %v6186_v39  ;;  %6219 = vmatpush3.bf16.msra.mxu1 %v6218_v21  ;;  %v6266_v39 = vpack.c.bf16 %v1699_v25, %v1698_v24  ;;  %v1668_v21 = vld [vmem:[%s8238_s7 + $0x510] sm:$0xff] }
 0x59e   :  { %6189 = vmatprep.subr.bf16.mxu0 %v6188_v45  ;;  %6221 = vmatprep.subr.bf16.mxu1 %v6220_v28  ;;  %v6236_v45 = vpack.c.bf16 %v1685_v3, %v1684_v29  ;;  %v6268_v28 = vpack.c.bf16 %v1717_v33, %v1716_v32  ;;  %v6238_v51 = vpack.c.bf16 %v1669_v42, %v1668_v21  ;;  %v1676_v29 = vld [vmem:[%s8238_s7 + $0x550] sm:$0xff]  ;;  %v1677_v3 = vld [vmem:[%s8238_s7 + $0x558] sm:$0xff]  ;;  %v1695_v21 = vld [vmem:[%s8238_s7 + $0x5e8] sm:$0xff] }
 0x59f   :  { %v2367_v22 = vpop.f32.mrb[24].mxu0  ;;  %v1708_v32 = vld [vmem:[%s8238_s7 + $0x650] sm:$0xff]  ;;  %v1726_v42 = vld [vmem:[%s8238_s7 + $0x6e0] sm:$0xff] }
 0x5a0   :  { %v7782_v49 = vmul.f32 %v2367_v22, %v7684_v20  ;;  %v5597_v53 = vpop.f32.mrb[25].mxu0  ;;  %v1682_v20 = vld [vmem:[%s8238_s7 + $0x580] sm:$0xff] }
 0x5a1   :  { %6191 = vmatpush3.bf16.msra.mxu0 %v6190_v26  ;;  %6223 = vmatpush3.bf16.msra.mxu1 %v6222_v54  ;;  %v6232_v34 = vpack.c.bf16 %v1683_v16, %v1682_v20  ;;  %v6270_v26 = vpack.c.bf16 %v1701_v18, %v1700_v43  ;;  %v6240_v54 = vpack.c.bf16 %v1687_v47, %v1686_v46  ;;  %v1674_v20 = vld [vmem:[%s8238_s7 + $0x540] sm:$0xff]  ;;  %v1675_v16 = vld [vmem:[%s8238_s7 + $0x548] sm:$0xff] }
 0x5a2   :  { %6193 = vmatprep.subr.bf16.mxu0 %v6192_v31  ;;  %6225 = vmatprep.subr.bf16.mxu1 %v6224_v57  ;;  %v1703_v31 = vld [vmem:[%s8238_s7 + $0x628] sm:$0xff]  ;;  %v1688_v57 = vld [vmem:[%s8238_s7 + $0x5b0] sm:$0xff]  ;;  %v6250_v41 = vpack.c.bf16 %v1675_v16, %v1674_v20  ;;  %v1678_v46 = vld [vmem:[%s8238_s7 + $0x560] sm:$0xff] }
 0x5a3   :  { %v1727_v43 = vld [vmem:[%s8238_s7 + $0x6e8] sm:$0xff]  ;;  %v1740_v16 = vld [vmem:[%s8238_s7 + $0x750] sm:$0xff] }
 0x5a4   :  { %v1679_v47 = vld [vmem:[%s8238_s7 + $0x568] sm:$0xff]  ;;  %v6288_v61 = vpack.c.bf16 %v1727_v43, %v1726_v42  ;;  %v1753_v42 = vld [vmem:[%s8240_s13 + $0x30] sm:$0xff]  ;;  %v1754_v43 = vld [vmem:[%s8240_s13 + $0x38] sm:$0xff] }
 0x5a5   :  { %6195 = vmatpush3.bf16.msra.mxu0 %v6194_v6  ;;  %6227 = vmatpush3.bf16.msra.mxu1 %v6226_v7  ;;  %v1705_v6 = vld [vmem:[%s8238_s7 + $0x638] sm:$0xff]  ;;  %v1690_v7 = vld [vmem:[%s8238_s7 + $0x5c0] sm:$0xff] }
 0x5a6   :  { %6197 = vmatprep.subr.bf16.mxu0 %v6196_v11  ;;  %6229 = vmatprep.subr.bf16.mxu1 %v6228_v12  ;;  %v1723_v11 = vld [vmem:[%s8238_s7 + $0x6c8] sm:$0xff]  ;;  %v6246_v12 = vpack.c.bf16 %v1673_v63, %v1672_v60  ;;  %v6278_v13 = vpack.c.bf16 %v1705_v6, %v1704_v5  ;;  %v6248_v15 = vpack.c.bf16 %v1691_v9, %v1690_v7  ;;  %v1730_v60 = vld [vmem:[%s8238_s7 + $0x700] sm:$0xff]  ;;  %v1733_v6 = vld [vmem:[%s8238_s7 + $0x718] sm:$0xff] }
 0x5a7   :  { %v6280_v56 = vpack.c.bf16 %v1723_v11, %v1722_v10  ;;  %v1731_v63 = vld [vmem:[%s8238_s7 + $0x708] sm:$0xff]  ;;  %v1734_v9 = vld [vmem:[%s8238_s7 + $0x720] sm:$0xff]  ;;  %v1737_v11 = vld [vmem:[%s8238_s7 + $0x738] sm:$0xff] }
 0x5a8   :  { %v6297_v5 = vpack.c.bf16 %v1731_v63, %v1730_v60  ;;  %v1735_v10 = vld [vmem:[%s8238_s7 + $0x728] sm:$0xff] }
 0x5a9   :  { %6199 = vmatpush3.bf16.msra.mxu0 %v6198_v23  ;;  %6231 = vmatpush3.bf16.msra.mxu1 %v6230_v62  ;;  %v1707_v23 = vld [vmem:[%s8238_s7 + $0x648] sm:$0xff]  ;;  %v1692_v62 = vld [vmem:[%s8238_s7 + $0x5d0] sm:$0xff] }
 0x5aa   :  { %6233 = vmatprep.subr.bf16.mxu0 %v6232_v34  ;;  %6265 = vmatprep.subr.bf16.mxu1 %v6264_v58  ;;  %v1693_v34 = vld [vmem:[%s8238_s7 + $0x5d8] sm:$0xff]  ;;  %v1724_v58 = vld [vmem:[%s8238_s7 + $0x6d0] sm:$0xff]  ;;  %v6282_v24 = vpack.c.bf16 %v1707_v23, %v1706_v17  ;;  %v1742_v23 = vld [vmem:[%s8238_s7 + $0x760] sm:$0xff] }
 0x5ab   :  { %v6252_v25 = vpack.c.bf16 %v1693_v34, %v1692_v62  ;;  %v6284_v33 = vpack.c.bf16 %v1725_v30, %v1724_v58  ;;  %v1741_v17 = vld [vmem:[%s8238_s7 + $0x758] sm:$0xff]  ;;  %v1743_v62 = vld [vmem:[%s8238_s7 + $0x768] sm:$0xff]  ;;  %v1744_v58 = vld [vmem:[%s8238_s7 + $0x770] sm:$0xff] }
 0x5ac   :  { %2661 = vmatmul.mubr.f32.vlgmr.msra.gmra.mrb[28].mxu0 %v7738_v44  ;;  %2731 = vmatmul.mubr.f32.vlgmr.msra.gmra.mrb[18].mxu1 %v7664_v19  ;;  %v1671_v44 = vld [vmem:[%s8238_s7 + $0x528] sm:$0xff]  ;;  %v1702_v19 = vld [vmem:[%s8238_s7 + $0x620] sm:$0xff]  ;;  %v6315_v34 = vpack.c.bf16 %v1743_v62, %v1742_v23  ;;  %v1745_v30 = vld [vmem:[%s8238_s7 + $0x778] sm:$0xff] }
 0x5ad   :  { %6235 = vmatpush3.bf16.msra.mxu0 %v6234_v38  ;;  %2800 = vmatprep.mubr.f32.mxu0 %v7763_v14  ;;  %v1689_v14 = vld [vmem:[%s8238_s7 + $0x5b8] sm:$0xff]  ;;  %v6242_v40 = vpack.c.bf16 %v1671_v44, %v1670_v48  ;;  %v6274_v59 = vpack.c.bf16 %v1703_v31, %v1702_v19  ;;  %v1728_v48 = vld [vmem:[%s8238_s7 + $0x6f0] sm:$0xff]  ;;  %v6258_v19 = vpack.c.bf16 %v1679_v47, %v1678_v46  ;;  %v3027_v47 = vld [vmem:[%s8241_s10] sm:$0xff] }
 0x5ae   :  { %6267 = vmatpush3.bf16.msra.mxu1 %v6266_v39  ;;  %2870 = vmatprep.mubr.f32.mxu1 %v7692_v4  ;;  %v1721_v4 = vld [vmem:[%s8238_s7 + $0x6b8] sm:$0xff]  ;;  %v6244_v22 = vpack.c.bf16 %v1689_v14, %v1688_v57  ;;  %v1694_v39 = vld [vmem:[%s8238_s7 + $0x5e0] sm:$0xff]  ;;  %v1680_v57 = vld [vmem:[%s8238_s7 + $0x570] sm:$0xff] }
 0x5af   :  { %6237 = vmatprep.subr.bf16.mxu0 %v6236_v45  ;;  %6269 = vmatprep.subr.bf16.mxu1 %v6268_v28  ;;  %v6276_v53 = vpack.c.bf16 %v1721_v4, %v1720_v2  ;;  %v1709_v38 = vld [vmem:[%s8238_s7 + $0x658] sm:$0xff]  ;;  %v6254_v45 = vpack.c.bf16 %v1677_v3, %v1676_v29  ;;  %v6256_v18 = vpack.c.bf16 %v1695_v21, %v1694_v39  ;;  %v1712_v4 = vld [vmem:[%s8238_s7 + $0x670] sm:$0xff]  ;;  %v1752_v39 = vld [vmem:[%s8240_s13 + $0x28] sm:$0xff] }
 0x5b0   :  { %v6286_v28 = vpack.c.bf16 %v1709_v38, %v1708_v32  ;;  %v1729_v44 = vld [vmem:[%s8238_s7 + $0x6f8] sm:$0xff]  ;;  %v1749_v29 = vld [vmem:[%s8240_s13 + $0x10] sm:$0xff]  ;;  %v1751_v38 = vld [vmem:[%s8240_s13 + $0x20] sm:$0xff] }
 0x5b1   :  { %6239 = vmatpush3.bf16.msra.mxu0 %v6238_v51  ;;  %v1711_v51 = vld [vmem:[%s8238_s7 + $0x668] sm:$0xff]  ;;  %v1681_v14 = vld [vmem:[%s8238_s7 + $0x578] sm:$0xff]  ;;  %v6292_v2 = vpack.c.bf16 %v1729_v44, %v1728_v48 }
 0x5b2   :  { %6271 = vmatpush3.bf16.msra.mxu1 %v6270_v26  ;;  %6241 = vmatprep.subr.bf16.mxu0 %v6240_v54  ;;  %v1696_v26 = vld [vmem:[%s8238_s7 + $0x5f0] sm:$0xff]  ;;  %v1697_v54 = vld [vmem:[%s8238_s7 + $0x5f8] sm:$0xff] }
 0x5b3   :  { %6273 = vmatprep.subr.bf16.mxu1 %v6272_v55  ;;  %v6290_v55 = vpack.c.bf16 %v1711_v51, %v1710_v36  ;;  %v6260_v31 = vpack.c.bf16 %v1697_v54, %v1696_v26  ;;  %v1750_v32 = vld [vmem:[%s8240_s13 + $0x18] sm:$0xff]  ;;  %v3028_v36 = vld [vmem:[%s8241_s10 + $0x8] sm:$0xff] }
 0x5b4   :  { %v6333_v51 = vpack.c.bf16 %v3028_v36, %v3027_v47  ;;  %v3030_v26 = vld [vmem:[%s8241_s10 + $0x18] sm:$0xff]  ;;  %v3288_v36 = vld [vmem:[%s8246_s18] sm:$0xff] }
 0x5b5   :  { %6243 = vmatpush3.bf16.msra.mxu0 %v6242_v40  ;;  %v1713_v40 = vld [vmem:[%s8238_s7 + $0x678] sm:$0xff] }
 0x5b6   :  { %6275 = vmatpush3.bf16.msra.mxu1 %v6274_v59  ;;  %6245 = vmatprep.subr.bf16.mxu0 %v6244_v22  ;;  %v6262_v59 = vpack.c.bf16 %v1681_v14, %v1680_v57  ;;  %v6294_v22 = vpack.c.bf16 %v1713_v40, %v1712_v4 }
 0x5b7   :  { %6277 = vmatprep.subr.bf16.mxu1 %v6276_v53  ;;  %v1732_v53 = vld [vmem:[%s8238_s7 + $0x710] sm:$0xff] }
 0x5b8   :  { %v6300_v7 = vpack.c.bf16 %v1733_v6, %v1732_v53 }
 0x5b9   :  { %6247 = vmatpush3.bf16.msra.mxu0 %v6246_v12 }
 0x5ba   :  { %6279 = vmatpush3.bf16.msra.mxu1 %v6278_v13  ;;  %6249 = vmatprep.subr.bf16.mxu0 %v6248_v15  ;;  %v1738_v13 = vld [vmem:[%s8238_s7 + $0x740] sm:$0xff]  ;;  %v1739_v15 = vld [vmem:[%s8238_s7 + $0x748] sm:$0xff] }
 0x5bb   :  { %6281 = vmatprep.subr.bf16.mxu1 %v6280_v56  ;;  %v6309_v20 = vpack.c.bf16 %v1739_v15, %v1738_v13  ;;  %v6312_v56 = vpack.c.bf16 %v1741_v17, %v1740_v16  ;;  %v3112_v17 = vld [vmem:[%s8243_s12] sm:$0xff] }
 0x5bd   :  { %6251 = vmatpush3.bf16.msra.mxu0 %v6250_v41  ;;  %v6318_v41 = vpack.c.bf16 %v1745_v30, %v1744_v58  ;;  %v3114_v58 = vld [vmem:[%s8243_s12 + $0x10] sm:$0xff]  ;;  %v3115_v30 = vld [vmem:[%s8243_s12 + $0x18] sm:$0xff] }
 0x5be   :  { %6283 = vmatpush3.bf16.msra.mxu1 %v6282_v24  ;;  %6253 = vmatprep.subr.bf16.mxu0 %v6252_v25  ;;  %v1747_v24 = vld [vmem:[%s8240_s13] sm:$0xff]  ;;  %v1748_v25 = vld [vmem:[%s8240_s13 + $0x8] sm:$0xff]  ;;  %s8266_s13 = sld [smem:[#allocation59_spill]] }
 0x5bf   :  { %6285 = vmatprep.subr.bf16.mxu1 %v6284_v33  ;;  %v6321_v3 = vpack.c.bf16 %v1748_v25, %v1747_v24  ;;  %v6324_v33 = vpack.c.bf16 %v1750_v32, %v1749_v29  ;;  %v3199_v24 = vld [vmem:[%s8244_s15] sm:$0xff]  ;;  %v3200_v25 = vld [vmem:[%s8244_s15 + $0x8] sm:$0xff]  ;;  %v3201_v29 = vld [vmem:[%s8244_s15 + $0x10] sm:$0xff] }
 0x5c0   :  { %v3202_v32 = vld [vmem:[%s8244_s15 + $0x18] sm:$0xff] }
 0x5c1   :  { %6255 = vmatpush3.bf16.msra.mxu0 %v6254_v45 }
 0x5c2   :  { %6287 = vmatpush3.bf16.msra.mxu1 %v6286_v28  ;;  %6257 = vmatprep.subr.bf16.mxu0 %v6256_v18  ;;  %v6330_v28 = vpack.c.bf16 %v1754_v43, %v1753_v42 }
 0x5c3   :  { %6289 = vmatprep.subr.bf16.mxu1 %v6288_v61  ;;  %v3029_v61 = vld [vmem:[%s8241_s10 + $0x10] sm:$0xff]  ;;  %s6884_s10 = smov 96  }
 0x5c4   :  { %v6336_v54 = vpack.c.bf16 %v3030_v26, %v3029_v61  ;;  %v3289_v61 = vld [vmem:[%s8246_s18 + $0x8] sm:$0xff]  ;;  %v5103_v26 = vld [vmem:[%s8247_s21] ss:$0 sm:$0xff] }
 0x5c5   :  { %6259 = vmatpush3.bf16.msra.mxu0 %v6258_v19 }
 0x5c6   :  { %6291 = vmatpush3.bf16.msra.mxu1 %v6290_v55  ;;  %6261 = vmatprep.subr.bf16.mxu0 %v6260_v31 }
 0x5c7   :  { %6293 = vmatprep.subr.bf16.mxu1 %v6292_v2 }
 0x5c9   :  { %6263 = vmatpush3.bf16.msra.mxu0 %v6262_v59 }
 0x5ca   :  { %6295 = vmatpush3.bf16.msra.mxu1 %v6294_v22  ;;  %6296 = vmatprep.subr.bf16.mxu0 %v6879_v0 }
 0x5cb   :  { %6320 = vmatprep.subr.bf16.mxu1 %v6879_v0 }
 0x5cc   :  { %2801 = vmatmul.mubr.f32.vlgmr.msra.gmra.mrb[30].mxu0 %v7761_v8  ;;  %v6303_v8 = vpack.c.bf16 %v1735_v10, %v1734_v9 }
 0x5cd   :  { %2871 = vmatmul.mubr.f32.vlgmr.msra.gmra.mrb[20].mxu1 %v7687_v50  ;;  %6298 = vmatpush3.bf16.msra.mxu0 %v6297_v5  ;;  %v1736_v50 = vld [vmem:[%s8238_s7 + $0x730] sm:$0xff]  ;;  %s8265_s7 = sld [smem:[#allocation25_spill]] }
 0x5ce   :  { %6299 = vmatprep.subr.bf16.mxu0 %v6879_v0  ;;  %5630 = vmatprep.mubr.msk.f32.mxu0 %vm6880_vm0, %v6881_v1  ;;  %v6306_v12 = vpack.c.bf16 %v1737_v11, %v1736_v50 }
 0x5cf   :  { %5649 = vmatprep.mubr.msk.f32.mxu1 %vm6880_vm0, %v6881_v1  ;;  %6322 = vmatpush3.bf16.msra.mxu1 %v6321_v3  ;;  %v6345_v3 = vpack.c.bf16 %v3200_v25, %v3199_v24  ;;  %v3553_v24 = vld [vmem:[%s8253_s20 + $0x8] sm:$0xff] }
 0x5d0   :  { %6323 = vmatprep.subr.bf16.mxu1 %v6879_v0 }
 0x5d1   :  { %6301 = vmatpush3.bf16.msra.mxu0 %v6300_v7 }
 0x5d2   :  { %6302 = vmatprep.subr.bf16.mxu0 %v6879_v0 }
 0x5d3   :  { %6325 = vmatpush3.bf16.msra.mxu1 %v6324_v33  ;;  %v6348_v33 = vpack.c.bf16 %v3202_v32, %v3201_v29 }
 0x5d4   :  { %6326 = vmatprep.subr.bf16.mxu1 %v6879_v0 }
 0x5d5   :  { %6304 = vmatpush3.bf16.msra.mxu0 %v6303_v8 }
 0x5d6   :  { %6305 = vmatprep.subr.bf16.mxu0 %v6879_v0 }
 0x5d9   :  { %6307 = vmatpush3.bf16.msra.mxu0 %v6306_v12  ;;  %v5099_v12 = vld [vmem:[%s8242_s11] ss:$0 sm:$0xff]  ;;  %s8267_s11 = sld [smem:[#allocation61_spill]] }
 0x5da   :  { %6308 = vmatprep.subr.bf16.mxu0 %v6879_v0 }
 0x5dd   :  { %6310 = vmatpush3.bf16.msra.mxu0 %v6309_v20 }
 0x5de   :  { %6311 = vmatprep.subr.bf16.mxu0 %v6879_v0 }
 0x5e1   :  { %6313 = vmatpush3.bf16.msra.mxu0 %v6312_v56  ;;  %v3113_v56 = vld [vmem:[%s8243_s12 + $0x8] sm:$0xff]  ;;  %s6885_s12 = smov 32  }
 0x5e2   :  { %6314 = vmatprep.subr.bf16.mxu0 %v6879_v0  ;;  %v6339_v23 = vpack.c.bf16 %v3113_v56, %v3112_v17  ;;  %v3549_v56 = vld [vmem:[%s8251_s0 + $0x8] sm:$0xff] }
 0x5e5   :  { %6316 = vmatpush3.bf16.msra.mxu0 %v6315_v34 }
 0x5e6   :  { %6317 = vmatprep.subr.bf16.mxu0 %v6879_v0 }
 0x5e9   :  { %6319 = vmatpush3.bf16.msra.mxu0 %v6318_v41  ;;  %v6342_v41 = vpack.c.bf16 %v3115_v30, %v3114_v58  ;;  %v3550_v58 = vld [vmem:[%s8251_s0 + $0x10] sm:$0xff]  ;;  %v5107_v30 = vld [vmem:[%s8252_s30] ss:$0 sm:$0xff] }
 0x5ea   :  { %6332 = vmatprep.subr.bf16.mxu0 %v6879_v0 }
 0x5ec   :  { %5631 = vmatmul.mubr.f32.vlgmr.msra.gmra.mrb[32].mxu0 %v7782_v49  ;;  %v6327_v49 = vpack.c.bf16 %v1752_v39, %v1751_v38  ;;  %v3203_v38 = vld [vmem:[%s8244_s15 + $0x20] sm:$0xff]  ;;  %v3204_v39 = vld [vmem:[%s8244_s15 + $0x28] sm:$0xff] }
 0x5ed   :  { %5660 = vmatprep.mubr.msk.f32.mxu0 %vm6880_vm0, %v6881_v1  ;;  %6334 = vmatpush3.bf16.msra.mxu0 %v6333_v51  ;;  %v6357_v51 = vpack.c.bf16 %v3289_v61, %v3288_v36 }
 0x5ee   :  { %6328 = vmatpush3.bf16.msra.mxu1 %v6327_v49  ;;  %6335 = vmatprep.subr.bf16.mxu0 %v6879_v0  ;;  %v6351_v49 = vpack.c.bf16 %v3204_v39, %v3203_v38  ;;  %v3723_v38 = vld [vmem:[%s8254_s26 + $0x8] sm:$0xff] }
 0x5ef   :  { %6329 = vmatprep.subr.bf16.mxu1 %v6879_v0 }
 0x5f1   :  { %6337 = vmatpush3.bf16.msra.mxu0 %v6336_v54 }
 0x5f2   :  { %6331 = vmatpush3.bf16.msra.mxu1 %v6330_v28  ;;  %6338 = vmatprep.subr.bf16.mxu0 %v6879_v0 }
 0x5f3   :  { %6344 = vmatprep.subr.bf16.mxu1 %v6879_v0 }
 0x63f   :  { %v5223_v21 = vpop.f32.mrb[14].mxu1 }
 0x640   :  { %v5224_v45 = vpop.f32.mrb[15].mxu1 }
 0x641   :  { %v5225_v18 = vadd.f32 %v5224_v45, %v5223_v21  ;;  %v5101_v21 = vld [vmem:[%s8245_s16] ss:$0 sm:$0xff]  ;;  %s8269_s16 = sld [smem:[#allocation63_spill]] }
 0x643   :  { %v2453_v46 = vadd.f32 %v5225_v18, %v7690_v52  ;;  %v3205_v18 = vld [vmem:[%s8244_s15 + $0x30] sm:$0xff] }
 0x65f   :  { %v5293_v48 = vpop.f32.mrb[16].mxu1  ;;  %v5258_v44 = vpop.f32.mrb[26].mxu0 }
 0x660   :  { %v5294_v19 = vpop.f32.mrb[17].mxu1  ;;  %v5259_v55 = vpop.f32.mrb[27].mxu0 }
 0x661   :  { %v5295_v31 = vadd.f32 %v5294_v19, %v5293_v48  ;;  %v5260_v52 = vadd.f32 %v5259_v55, %v5258_v44 }
 0x663   :  { %v2523_v57 = vadd.f32 %v5260_v52, %v2453_v46  ;;  %v3206_v46 = vld [vmem:[%s8244_s15 + $0x38] sm:$0xff]  ;;  %s8268_s15 = sld [smem:[#allocation62_spill]] }
 0x664   :  { %v6354_v47 = vpack.c.bf16 %v3206_v46, %v3205_v18  ;;  %v3291_v52 = vld [vmem:[%s8246_s18 + $0x18] sm:$0xff]  ;;  %v3556_v46 = vld [vmem:[%s8253_s20 + $0x20] sm:$0xff] }
 0x665   :  { %v2593_v14 = vadd.f32 %v5295_v31, %v2523_v57  ;;  %v3290_v31 = vld [vmem:[%s8246_s18 + $0x10] sm:$0xff]  ;;  %s8270_s18 = sld [smem:[#allocation64_spill]] }
 0x666   :  { %v6360_v57 = vpack.c.bf16 %v3291_v52, %v3290_v31  ;;  %v3563_v31 = vld [vmem:[%s8253_s20 + $0x58] sm:$0xff] }
 0x67f   :  { %v5328_v2 = vpop.f32.mrb[28].mxu0  ;;  %v5363_v4 = vpop.f32.mrb[18].mxu1 }
 0x680   :  { %v5329_v40 = vpop.f32.mrb[29].mxu0  ;;  %v5364_v59 = vpop.f32.mrb[19].mxu1 }
 0x681   :  { %v5330_v22 = vadd.f32 %v5329_v40, %v5328_v2  ;;  %v5365_v60 = vadd.f32 %v5364_v59, %v5363_v4  ;;  %v3460_v2 = vld [vmem:[%s8248_s22 + $0x18] sm:$0xff]  ;;  %v3457_v4 = vld [vmem:[%s8248_s22] sm:$0xff]  ;;  %v3459_v59 = vld [vmem:[%s8248_s22 + $0x10] sm:$0xff] }
 0x683   :  { %v2663_v63 = vadd.f32 %v5330_v22, %v2593_v14  ;;  %v3458_v14 = vld [vmem:[%s8248_s22 + $0x8] sm:$0xff]  ;;  %v6370_v22 = vpack.c.bf16 %v3459_v59, %v3457_v4  ;;  %v3566_v4 = vld [vmem:[%s8253_s20 + $0x70] sm:$0xff] }
 0x684   :  { %v6368_v40 = vpack.c.bf16 %v3460_v2, %v3458_v14  ;;  %v3565_v14 = vld [vmem:[%s8253_s20 + $0x68] sm:$0xff] }
 0x685   :  { %v2733_v5 = vadd.f32 %v5365_v60, %v2663_v63  ;;  %v3462_v60 = vld [vmem:[%s8248_s22 + $0x28] sm:$0xff]  ;;  %v3464_v63 = vld [vmem:[%s8248_s22 + $0x38] sm:$0xff] }
 0x69f   :  { %v5398_v53 = vpop.f32.mrb[30].mxu0 }
 0x6a0   :  { %v5433_v6 = vpop.f32.mrb[20].mxu1  ;;  %v5399_v7 = vpop.f32.mrb[31].mxu0 }
 0x6a1   :  { %v5400_v9 = vadd.f32 %v5399_v7, %v5398_v53  ;;  %v5434_v10 = vpop.f32.mrb[21].mxu1  ;;  %v5105_v53 = vld [vmem:[%s8249_s27] ss:$0 sm:$0xff]  ;;  %v3373_v7 = vld [vmem:[%s8250_s23 + $0x8] sm:$0xff] }
 0x6a2   :  { %v5435_v8 = vadd.f32 %v5434_v10, %v5433_v6  ;;  %v3372_v6 = vld [vmem:[%s8250_s23] sm:$0xff] }
 0x6a3   :  { %v2803_v50 = vadd.f32 %v5400_v9, %v2733_v5  ;;  %v6372_v5 = vpack.c.bf16 %v3464_v63, %v3462_v60  ;;  %v3804_v60 = vld [vmem:[%s8256_s1] sm:$0xff]  ;;  %v3805_v63 = vld [vmem:[%s8256_s1 + $0x8] sm:$0xff] }
 0x6a5   :  { %v2873_v11 = vadd.f32 %v5435_v8, %v2803_v50  ;;  %v6363_v50 = vpack.c.bf16 %v3373_v7, %v3372_v6  ;;  %v3807_v6 = vld [vmem:[%s8256_s1 + $0x18] sm:$0xff] }
 0x6bf   :  { %v2942_v13 = vpop.f32.mrb[32].mxu0 }
 0x6c0   :  { %v2943_v15 = vadd.f32 %v2942_v13, %v2873_v11  ;;  %v5632_v20 = vpop.f32.mrb[33].mxu0  ;;  %v3375_v13 = vld [vmem:[%s8250_s23 + $0x18] sm:$0xff] }
 0x6c1   :  { %v3461_v20 = vld [vmem:[%s8248_s22 + $0x20] sm:$0xff] }
 0x6c2   :  { %v2952_v16 = vmul.f32 %v5099_v12, %v2943_v15  ;;  %v3374_v12 = vld [vmem:[%s8250_s23 + $0x10] sm:$0xff] }
 0x6c3   :  { %v6366_v15 = vpack.c.bf16 %v3375_v13, %v3374_v12 }
 0x6c4   :  { %5650 = vmatmul.mubr.msk.f32.vlgmr.msra.gmra.mrb[22].mxu1 %vm2953_vm6, %v2952_v16  ;;  %v3463_v16 = vld [vmem:[%s8248_s22 + $0x30] sm:$0xff] }
 0x6c5   :  { %5690 = vmatprep.mubr.msk.f32.mxu1 %vm6880_vm0, %v6881_v1  ;;  %6346 = vmatpush3.bf16.msra.mxu1 %v6345_v3  ;;  %v6374_v17 = vpack.c.bf16 %v3463_v16, %v3461_v20 }
 0x6c6   :  { %6347 = vmatprep.subr.bf16.mxu1 %v6879_v0 }
 0x6c9   :  { %6349 = vmatpush3.bf16.msra.mxu1 %v6348_v33  ;;  %v3722_v33 = vld [vmem:[%s8254_s26] sm:$0xff] }
 0x6ca   :  { %6350 = vmatprep.subr.bf16.mxu1 %v6879_v0 }
 0x6cd   :  { %6352 = vmatpush3.bf16.msra.mxu1 %v6351_v49  ;;  %v3554_v49 = vld [vmem:[%s8253_s20 + $0x10] sm:$0xff] }
 0x6ce   :  { %6353 = vmatprep.subr.bf16.mxu1 %v6879_v0 }
 0x6d1   :  { %6355 = vmatpush3.bf16.msra.mxu1 %v6354_v47  ;;  %v3557_v47 = vld [vmem:[%s8253_s20 + $0x28] sm:$0xff] }
 0x6d2   :  { %6369 = vmatprep.subr.bf16.mxu1 %v6368_v40  ;;  %v6387_v61 = vpack.c.bf16 %v3557_v47, %v3556_v46  ;;  %v3567_v40 = vld [vmem:[%s8253_s20 + $0x78] sm:$0xff] }
 0x6d3   :  { %v6402_v59 = vpack.c.bf16 %v3567_v40, %v3566_v4  ;;  %v4263_v4 = vld [vmem:[%s8263_s4] sm:$0xff]  ;;  %v4264_v40 = vld [vmem:[%s8263_s4 + $0x8] sm:$0xff] }
 0x797   :  { %v3023_v62 = vpop.f32.mrb[22].mxu1 }
 0x798   :  { %v5651_v34 = vpop.f32.mrb[23].mxu1  ;;  %5661 = vmatmul.mubr.msk.f32.vlgmr.msra.gmra.mrb[34].mxu0 %vm446_vm5, %v3023_v62 }
 0x799   :  { %6340 = vmatpush3.bf16.msra.mxu0 %v6339_v23  ;;  %5671 = vmatprep.mubr.msk.f32.mxu0 %vm6880_vm0, %v6881_v1  ;;  %v3551_v23 = vld [vmem:[%s8251_s0 + $0x18] sm:$0xff]  ;;  %v3548_v34 = vld [vmem:[%s8251_s0] sm:$0xff] }
 0x79a   :  { %6341 = vmatprep.subr.bf16.mxu0 %v6879_v0  ;;  %v6376_v62 = vpack.c.bf16 %v3551_v23, %v3549_v56  ;;  %v6378_v29 = vpack.c.bf16 %v3550_v58, %v3548_v34 }
 0x79d   :  { %6343 = vmatpush3.bf16.msra.mxu0 %v6342_v41  ;;  %v3552_v41 = vld [vmem:[%s8253_s20] sm:$0xff] }
 0x79e   :  { %6356 = vmatprep.subr.bf16.mxu0 %v6879_v0  ;;  %v6381_v39 = vpack.c.bf16 %v3553_v24, %v3552_v41 }
 0x86b   :  { %v3107_v42 = vpop.f32.mrb[34].mxu0 }
 0x86c   :  { %v3108_v43 = vadd.f32 %v5101_v21, %v3107_v42  ;;  %v5662_v45 = vpop.f32.mrb[35].mxu0  ;;  %v3555_v21 = vld [vmem:[%s8253_s20 + $0x18] sm:$0xff]  ;;  %v3569_v42 = vld [vmem:[%s8255_s28] sm:$0xff] }
 0x86d   :  { %v3724_v45 = vld [vmem:[%s8254_s26 + $0x10] sm:$0xff]  ;;  %v6384_v18 = vpack.c.bf16 %v3555_v21, %v3554_v49  ;;  %v3898_v49 = vld [vmem:[%s8259_s29 + $0x38] sm:$0xff] }
 0x86e   :  { %v3111_v28 = vmax.f32 %v3108_v43, 0.0  ;;  %v6405_v43 = vpack.c.bf16 %v3723_v38, %v3722_v33  ;;  %v3896_v33 = vld [vmem:[%s8259_s29 + $0x28] sm:$0xff] }
 0x870   :  { %5672 = vmatmul.mubr.msk.f32.vlgmr.msra.gmra.mrb[36].mxu0 %vm446_vm5, %v3111_v28  ;;  %v3725_v28 = vld [vmem:[%s8254_s26 + $0x18] sm:$0xff] }
 0x871   :  { %5701 = vmatprep.mubr.msk.f32.mxu0 %vm6880_vm0, %v6881_v1  ;;  %6358 = vmatpush3.bf16.msra.mxu0 %v6357_v51  ;;  %v6408_v36 = vpack.c.bf16 %v3725_v28, %v3724_v45  ;;  %v3558_v51 = vld [vmem:[%s8253_s20 + $0x30] sm:$0xff]  ;;  %v5109_v28 = vld [vmem:[%s8261_s8] ss:$0 sm:$0xff] }
 0x872   :  { %6359 = vmatprep.subr.bf16.mxu0 %v6879_v0 }
 0x875   :  { %6361 = vmatpush3.bf16.msra.mxu0 %v6360_v57  ;;  %v3564_v57 = vld [vmem:[%s8253_s20 + $0x60] sm:$0xff] }
 0x876   :  { %6362 = vmatprep.subr.bf16.mxu0 %v6879_v0  ;;  %v6399_v2 = vpack.c.bf16 %v3565_v14, %v3564_v57  ;;  %v4067_v57 = vld [vmem:[%s8262_s14 + $0x18] sm:$0xff] }
 0x943   :  { %v3192_v54 = vpop.f32.mrb[36].mxu0 }
 0x944   :  { %v3193_v48 = vadd.f32 %v5103_v26, %v3192_v54  ;;  %v5673_v44 = vpop.f32.mrb[37].mxu0  ;;  %v3559_v26 = vld [vmem:[%s8253_s20 + $0x38] sm:$0xff] }
 0x945   :  { %v6390_v54 = vpack.c.bf16 %v3559_v26, %v3558_v51  ;;  %v3561_v44 = vld [vmem:[%s8253_s20 + $0x48] sm:$0xff]  ;;  %v5116_v51 = vld [vmem:[#allocation2] ss:$0 sm:$0xff] }
 0x946   :  { %vm3196_vm7 = vcmp.ge.f32.partialorder %v3193_v48, 0.0  ;;  %v3197_v19 = vmul.f32 0.01, %v3193_v48 }
 0x948   :  { %v3198_v55 = vsel %vm3196_vm7, %v3193_v48, %v3197_v19  ;;  %v3560_v48 = vld [vmem:[%s8253_s20 + $0x40] sm:$0xff] }
 0x949   :  { %5691 = vmatmul.mubr.msk.f32.vlgmr.msra.gmra.mrb[24].mxu1 %vm2953_vm6, %v3198_v55  ;;  %v6393_v19 = vpack.c.bf16 %v3561_v44, %v3560_v48  ;;  %v3562_v55 = vld [vmem:[%s8253_s20 + $0x50] sm:$0xff]  ;;  %v4065_v48 = vld [vmem:[%s8262_s14 + $0x8] sm:$0xff] }
 0x94a   :  { %3541 = vmatprep.mubr.f32.mxu1 %v6881_v1  ;;  %6371 = vmatpush1.bf16.msra.mxu1 %v6370_v22  ;;  %v6396_v52 = vpack.c.bf16 %v3563_v31, %v3562_v55  ;;  %v3568_v22 = vld [vmem:[%s8253_s20 + $0x80] sm:$0xff] }
 0x94b   :  { %6373 = vmatprep.subr.bf16.mxu1 %v6372_v5  ;;  %v6411_v5 = vpack.c.bf16 %v3805_v63, %v3804_v60  ;;  %v3983_v60 = vld [vmem:[%s8260_s3 + $0x18] sm:$0xff] }
 0x94e   :  { %6375 = vmatpush1.bf16.msra.mxu1 %v6374_v17 }
 0x94f   :  { %6380 = vmatprep.subr.bf16.mxu1 %v6879_v0 }
 0xa1c   :  { %v3283_v9 = vpop.f32.mrb[24].mxu1 }
 0xa1d   :  { %v3284_v10 = vadd.f32 %v5105_v53, %v3283_v9  ;;  %v5692_v8 = vpop.f32.mrb[25].mxu1  ;;  %v3806_v53 = vld [vmem:[%s8256_s1 + $0x10] sm:$0xff]  ;;  %v3465_v9 = vld [vmem:[%s8257_s25] sm:$0x3] }
 0xa1e   :  { %v6414_v7 = vpack.c.bf16 %v3807_v6, %v3806_v53  ;;  %v4069_v53 = vld [vmem:[%s8264_s2 + $0x8] sm:$0xff] }
 0xa1f   :  { %v3287_v11 = vmax.f32 %v3284_v10, 0.0  ;;  %v3470_v10 = vrot.slane %v3465_v9, %v7305_v35  ;;  %v5114_v35 = vld [vmem:[%s8258_s5] ss:$0 sm:$0xff] }
 0xa21   :  { %5702 = vmatmul.mubr.msk.f32.vlgmr.msra.gmra.mrb[38].mxu0 %vm446_vm5, %v3287_v11  ;;  %v3474_v11 = vrot.slane %v3465_v9, %v7309_v37  ;;  %v3891_v37 = vld [vmem:[%s8259_s29] sm:$0xff] }
 0xa22   :  { %6364 = vmatpush3.bf16.msra.mxu0 %v6363_v50  ;;  %5712 = vmatprep.mubr.msk.f32.mxu0 %vm6880_vm0, %v6881_v1 }
 0xa23   :  { %6365 = vmatprep.subr.bf16.mxu0 %v6879_v0 }
 0xa26   :  { %6367 = vmatpush3.bf16.msra.mxu0 %v6366_v15 }
 0xa27   :  { %6377 = vmatprep.subr.bf16.mxu0 %v6376_v62  ;;  %v3892_v62 = vld [vmem:[%s8259_s29 + $0x8] sm:$0xff] }
 0xa28   :  { %v6417_v41 = vpack.c.bf16 %v3892_v62, %v3891_v37 }
 0xaf4   :  { %v3368_v25 = vpop.f32.mrb[38].mxu0 }
 0xaf5   :  { %v3369_v3 = vadd.f32 %v5107_v30, %v3368_v25  ;;  %v5703_v32 = vpop.f32.mrb[39].mxu0  ;;  %v3893_v25 = vld [vmem:[%s8259_s29 + $0x10] sm:$0xff] }
 0xaf6   :  { %v3895_v32 = vld [vmem:[%s8259_s29 + $0x20] sm:$0xff] }
 0xaf7   :  { %5713 = vmatmul.mubr.msk.f32.vlgmr.msra.gmra.mrb[40].mxu0 %vm446_vm5, %v3369_v3  ;;  %5111 = vmatmul.mubr.msk.f32.vlgmr.msra.gmra.mrb[26].mxu1 %vm446_vm5, %v3369_v3  ;;  %v6423_v38 = vpack.c.bf16 %v3896_v33, %v3895_v32 }
 0xaf8   :  { %6379 = vmatpush1.bf16.msra.mxu0 %v6378_v29  ;;  %3638 = vmatprep.mubr.f32.mxu0 %v6881_v1  ;;  %v3894_v29 = vld [vmem:[%s8259_s29 + $0x18] sm:$0xff] }
 0xaf9   :  { %6404 = vmatprep.subr.bf16.mxu0 %v6879_v0  ;;  %6382 = vmatpush1.bf16.msra.mxu1 %v6381_v39  ;;  %v6420_v3 = vpack.c.bf16 %v3894_v29, %v3893_v25  ;;  %v3897_v39 = vld [vmem:[%s8259_s29 + $0x30] sm:$0xff] }
 0xafa   :  { %6383 = vmatprep.subr.bf16.mxu1 %v6879_v0  ;;  %v6426_v21 = vpack.c.bf16 %v3898_v49, %v3897_v39  ;;  %v4259_v49 = vld [vmem:[%s8266_s13] sm:$0xff] }
 0xafb   :  { %5112 = vmatmul.mubr.msk.f32.vlgmr.msra.gmra.mrb[42].mxu0 %vm3570_vm8, %v3569_v42  ;;  %v3980_v42 = vld [vmem:[%s8260_s3] sm:$0xff] }
 0xafc   :  { %6406 = vmatpush3.bf16.msra.mxu0 %v6405_v43  ;;  %5723 = vmatprep.mubr.msk.f32.mxu0 %vm6880_vm0, %v6881_v1  ;;  %v3981_v43 = vld [vmem:[%s8260_s3 + $0x8] sm:$0xff] }
 0xafd   :  { %6407 = vmatprep.subr.bf16.mxu0 %v6879_v0  ;;  %6385 = vmatpush1.bf16.msra.mxu1 %v6384_v18  ;;  %v6429_v45 = vpack.c.bf16 %v3981_v43, %v3980_v42  ;;  %v4261_v42 = vld [vmem:[%s8266_s13 + $0x10] sm:$0xff] }
 0xafe   :  { %6386 = vmatprep.subr.bf16.mxu1 %v6879_v0 }
 0xb00   :  { %6409 = vmatpush3.bf16.msra.mxu0 %v6408_v36 }
 0xb01   :  { %6388 = vmatpush1.bf16.msra.mxu1 %v6387_v61  ;;  %6410 = vmatprep.subr.bf16.mxu0 %v6879_v0 }
 0xb02   :  { %6389 = vmatprep.subr.bf16.mxu1 %v6879_v0 }
 0xb03   :  { %5724 = vmatmul.mubr.msk.f32.vlgmr.msra.gmra.mrb[44].mxu0 %vm446_vm5, %v7254_v27 }
 0xb04   :  { %5734 = vmatprep.mubr.msk.f32.mxu0 %vm6880_vm0, %v6881_v1  ;;  %6412 = vmatpush3.bf16.msra.mxu0 %v6411_v5  ;;  %v4068_v5 = vld [vmem:[%s8264_s2] sm:$0xff] }
 0xb05   :  { %6391 = vmatpush1.bf16.msra.mxu1 %v6390_v54  ;;  %6413 = vmatprep.subr.bf16.mxu0 %v6879_v0  ;;  %v4064_v54 = vld [vmem:[%s8262_s14] sm:$0xff] }
 0xb06   :  { %6392 = vmatprep.subr.bf16.mxu1 %v6879_v0  ;;  %v6435_v31 = vpack.c.bf16 %v4065_v48, %v4064_v54 }
 0xb08   :  { %6415 = vmatpush3.bf16.msra.mxu0 %v6414_v7 }
 0xb09   :  { %6394 = vmatpush1.bf16.msra.mxu1 %v6393_v19  ;;  %6416 = vmatprep.subr.bf16.mxu0 %v6879_v0 }
 0xb0a   :  { %6395 = vmatprep.subr.bf16.mxu1 %v6879_v0 }
 0xb0d   :  { %6397 = vmatpush1.bf16.msra.mxu1 %v6396_v52  ;;  %v4066_v52 = vld [vmem:[%s8262_s14 + $0x10] sm:$0xff] }
 0xb0e   :  { %6398 = vmatprep.subr.bf16.mxu1 %v6879_v0 }
 0xb11   :  { %6400 = vmatpush1.bf16.msra.mxu1 %v6399_v2  ;;  %v6438_v2 = vpack.c.bf16 %v4067_v57, %v4066_v52  ;;  %v4425_v52 = vld [vmem:[%s8267_s11 + $0x18] sm:$0xff] }
 0xb12   :  { %6401 = vmatprep.subr.bf16.mxu1 %v6879_v0 }
 0xb15   :  { %6403 = vmatpush1.bf16.msra.mxu1 %v6402_v59  ;;  %v6447_v59 = vpack.c.bf16 %v4264_v40, %v4263_v4  ;;  %v4511_v4 = vld [vmem:[%s8268_s15 + $0x10] sm:$0xff] }
 0xb16   :  { %3683 = vmatprep.subr.mxu1 %v6881_v1 }
 0xb19   :  { %3684 = vmatpush1.msra.mxu1 %v3568_v22  ;;  %v3982_v22 = vld [vmem:[%s8260_s3 + $0x10] sm:$0xff] }
 0xb1a   :  { %6428 = vmatprep.subr.bf16.mxu1 %v6879_v0  ;;  %v6432_v63 = vpack.c.bf16 %v3983_v60, %v3982_v22  ;;  %v4513_v60 = vld [vmem:[%s8268_s15 + $0x20] sm:$0xff] }
 0xbca   :  { %v3452_v8 = vpop.f32.mrb[40].mxu0  ;;  %v3543_v50 = vpop.f32.mrb[26].mxu1 }
 0xbcb   :  { %v5714_v12 = vpop.f32.mrb[41].mxu0  ;;  %v3545_v13 = vpop.f32.mrb[27].mxu1  ;;  %v3544_v15 = vadd.f32 %v3543_v50, %v3470_v10  ;;  %v3453_v18 = vadd.f32 %v5109_v28, %v3452_v8  ;;  %v6441_v10 = vpack.c.bf16 %v4069_v53, %v4068_v5  ;;  %v4070_v50 = vld [vmem:[%s8264_s2 + $0x10] sm:$0xff]  ;;  %v5129_v5 = vld [vmem:[#allocation11] ss:$0 sm:$0xff] }
 0xbcc   :  { %v3546_v20 = vadd.f32 %v3545_v13, %v3474_v11  ;;  %v4071_v11 = vld [vmem:[%s8264_s2 + $0x18] sm:$0xff] }
 0xbcd   :  { %6572 = vtanh.f32 %v3453_v18  ;;  %v6444_v12 = vpack.c.bf16 %v4071_v11, %v4070_v50  ;;  %v4516_v50 = vld [vmem:[%s8268_s15 + $0x38] sm:$0xff] }
 0xbce   :  { %v3640_v16 = vpop.f32.mrb[42].mxu0 }
 0xbcf   :  { %v3645_v17 = vmul.f32 %v3640_v16, %v3544_v15  ;;  %v3642_v56 = vpop.f32.mrb[43].mxu0 }
 0xbd0   :  { %v3646_v23 = vmul.f32 %v3642_v56, %v3546_v20  ;;  %v4150_v20 = vld [vmem:[%s8265_s7] sm:$0xff] }
 0xbd2   :  { %5113 = vmatprep.mubr.msk.f32.mxu1 %vm3647_vm9, %v3646_v23 }
 0xbd3   :  { %3716 = vmatmul.mubr.f32.vlgmr.msra.gmra.mrb[28].mxu1 %v3645_v17 }
 0xbd4   :  { %5764 = vmatprep.mubr.msk.f32.mxu1 %vm6880_vm0, %v6881_v1  ;;  %6430 = vmatpush3.bf16.msra.mxu1 %v6429_v45  ;;  %v4262_v45 = vld [vmem:[%s8266_s13 + $0x18] sm:$0xff] }
 0xbd5   :  { %6431 = vmatprep.subr.bf16.mxu1 %v6879_v0  ;;  %v6453_v28 = vpack.c.bf16 %v4262_v45, %v4261_v42  ;;  %v4685_v42 = vld [vmem:[%s8270_s18 + $0x18] sm:$0xff]  ;;  %v4688_v45 = vld [vmem:[%s7175_s19] sm:$0xff] }
 0xbd6   :  { %v3799_v34 = vpop.f32.mrb[44].mxu0 }
 0xbd7   :  { %v3800_v58 = vadd.f32 %v5114_v35, %v3799_v34  ;;  %v5725_v30 = vpop.f32.mrb[45].mxu0  ;;  %v6573_v46 = vpop.eup %6572  ;;  %v5124_v35 = vld [vmem:[#allocation10] ss:$0 sm:$0xff] }
 0xbd8   :  { %6433 = vmatpush3.bf16.msra.mxu1 %v6432_v63  ;;  %v4514_v63 = vld [vmem:[%s8268_s15 + $0x28] sm:$0xff] }
 0xbd9   :  { %v3803_v24 = vmax.f32 %v3800_v58, 0.0  ;;  %6440 = vmatprep.subr.bf16.mxu1 %v6879_v0  ;;  %v5122_v58 = vld [vmem:[#allocation8] ss:$0 sm:$0xff] }
 0xbdb   :  { %5735 = vmatmul.mubr.msk.f32.vlgmr.msra.gmra.mrb[46].mxu0 %vm446_vm5, %v3803_v24 }
 0xbdc   :  { %6418 = vmatpush3.bf16.msra.mxu0 %v6417_v41  ;;  %5753 = vmatprep.mubr.msk.f32.mxu0 %vm6880_vm0, %v6881_v1 }
 0xbdd   :  { %6419 = vmatprep.subr.bf16.mxu0 %v6879_v0 }
 0xbe0   :  { %6421 = vmatpush3.bf16.msra.mxu0 %v6420_v3 }
 0xbe1   :  { %6422 = vmatprep.subr.bf16.mxu0 %v6879_v0 }
 0xbe4   :  { %6424 = vmatpush3.bf16.msra.mxu0 %v6423_v38 }
 0xbe5   :  { %6425 = vmatprep.subr.bf16.mxu0 %v6879_v0 }
 0xbe8   :  { %6427 = vmatpush3.bf16.msra.mxu0 %v6426_v21  ;;  %v4260_v21 = vld [vmem:[%s8266_s13 + $0x8] sm:$0xff] }
 0xbe9   :  { %6434 = vmatprep.subr.bf16.mxu0 %v6879_v0  ;;  %v6450_v43 = vpack.c.bf16 %v4260_v21, %v4259_v49  ;;  %v4684_v21 = vld [vmem:[%s8270_s18 + $0x10] sm:$0xff] }
 0xca6   :  { %v3717_v47 = vpop.f32.mrb[28].mxu1 }
 0xca7   :  { %v8045_v36 = vadd.f32 %v6573_v46, %v3717_v47  ;;  %v3719_v61 = vpop.f32.mrb[29].mxu1 }
 0xcae   :  { %v3884_v26 = vpop.f32.mrb[46].mxu0 }
 0xcaf   :  { %v3885_v44 = vadd.f32 %v5116_v51, %v3884_v26  ;;  %v5736_v19 = vpop.f32.mrb[47].mxu0 }
 0xcb0   :  { %v4423_v19 = vld [vmem:[%s8267_s11 + $0x8] sm:$0xff] }
 0xcb1   :  { %vm3888_vm10 = vcmp.ge.f32.partialorder %v3885_v44, 0.0  ;;  %v3889_v55 = vmul.f32 0.01, %v3885_v44 }
 0xcb3   :  { %v3890_v14 = vsel %vm3888_vm10, %v3885_v44, %v3889_v55  ;;  %v4422_v44 = vld [vmem:[%s8267_s11] sm:$0xff] }
 0xcb4   :  { %5754 = vmatmul.mubr.msk.f32.vlgmr.msra.gmra.mrb[48].mxu0 %vm2953_vm6, %v3890_v14  ;;  %v6456_v55 = vpack.c.bf16 %v4423_v19, %v4422_v44  ;;  %v4509_v14 = vld [vmem:[%s8268_s15] sm:$0xff] }
 0xcb5   :  { %6436 = vmatpush3.bf16.msra.mxu0 %v6435_v31  ;;  %5775 = vmatprep.mubr.msk.f32.mxu0 %vm6880_vm0, %v6881_v1  ;;  %v4424_v31 = vld [vmem:[%s8267_s11 + $0x10] sm:$0xff] }
 0xcb6   :  { %6437 = vmatprep.subr.bf16.mxu0 %v6879_v0  ;;  %v6459_v57 = vpack.c.bf16 %v4425_v52, %v4424_v31 }
 0xcb9   :  { %6439 = vmatpush3.bf16.msra.mxu0 %v6438_v2  ;;  %v4510_v2 = vld [vmem:[%s8268_s15 + $0x8] sm:$0xff] }
 0xcba   :  { %6446 = vmatprep.subr.bf16.mxu0 %v6879_v0  ;;  %v6462_v40 = vpack.c.bf16 %v4510_v2, %v4509_v14 }
 0xcbc   :  { %5776 = vmatmul.mubr.msk.f32.vlgmr.msra.gmra.mrb[50].mxu0 %vm446_vm5, %v7254_v27  ;;  %v5118_v27 = vld [vmem:[#allocation5] ss:$0 sm:$0xff] }
 0xcbd   :  { %6448 = vmatpush3.bf16.msra.mxu0 %v6447_v59  ;;  %5793 = vmatprep.mubr.msk.f32.mxu0 %vm6880_vm0, %v6881_v1  ;;  %v4512_v59 = vld [vmem:[%s8268_s15 + $0x18] sm:$0xff] }
 0xcbe   :  { %6449 = vmatprep.subr.bf16.mxu0 %v6879_v0  ;;  %v6465_v22 = vpack.c.bf16 %v4512_v59, %v4511_v4 }
 0xcc0   :  { %5794 = vmatmul.mubr.msk.f32.vlgmr.msra.gmra.mrb[52].mxu0 %vm3570_vm8, %v8045_v36 }
 0xcc1   :  { %5804 = vmatprep.mubr.msk.f32.mxu0 %vm6880_vm0, %v6881_v1  ;;  %6451 = vmatpush3.bf16.msra.mxu0 %v6450_v43  ;;  %v6486_v43 = vpack.c.bf16 %v4685_v42, %v4684_v21 }
 0xcc2   :  { %6452 = vmatprep.subr.bf16.mxu0 %v6879_v0 }
 0xcc5   :  { %6454 = vmatpush3.bf16.msra.mxu0 %v6453_v28  ;;  %v4689_v28 = vld [vmem:[%s7175_s19 + $0x8] sm:$0xff]  ;;  %s6886_s19 = smov [#allocation17]  }
 0xcc6   :  { %6461 = vmatprep.subr.bf16.mxu0 %v6879_v0 }
 0xd87   :  { %v3975_v6 = vpop.f32.mrb[48].mxu0 }
 0xd88   :  { %v3976_v7 = vadd.f32 %v5118_v27, %v3975_v6  ;;  %v5755_v9 = vpop.f32.mrb[49].mxu0  ;;  %v6468_v27 = vpack.c.bf16 %v4514_v63, %v4513_v60 }
 0xd8a   :  { %v3979_v8 = vmax.f32 %v3976_v7, 0.0 }
 0xd8c   :  { %5765 = vmatmul.mubr.msk.f32.vlgmr.msra.gmra.mrb[30].mxu1 %vm446_vm5, %v3979_v8  ;;  %v4515_v8 = vld [vmem:[%s8268_s15 + $0x30] sm:$0xff] }
 0xd8d   :  { %6442 = vmatpush3.bf16.msra.mxu1 %v6441_v10  ;;  %5786 = vmatprep.mubr.msk.f32.mxu1 %vm6880_vm0, %v6881_v1  ;;  %v6471_v11 = vpack.c.bf16 %v4516_v50, %v4515_v8 }
 0xd8e   :  { %6443 = vmatprep.subr.bf16.mxu1 %v6879_v0 }
 0xd8f   :  { %v4146_v13 = vpop.f32.mrb[50].mxu0 }
 0xd90   :  { %v5777_v15 = vpop.f32.mrb[51].mxu0  ;;  %v4147_v30 = vadd.f32 %v5122_v58, %v4146_v13  ;;  %v4599_v13 = vld [vmem:[%s8269_s16 + $0x8] sm:$0xff] }
 0xd91   :  { %6445 = vmatpush3.bf16.msra.mxu1 %v6444_v12  ;;  %v4598_v12 = vld [vmem:[%s8269_s16] sm:$0xff] }
 0xd92   :  { %6455 = vmatprep.subr.bf16.mxu1 %v6879_v0  ;;  %v6474_v15 = vpack.c.bf16 %v4599_v13, %v4598_v12 }
 0xd93   :  { %v8080_v16 = vpop.f32.mrb[52].mxu0 }
 0xd94   :  { %5787 = vmatmul.mubr.msk.f32.vlgmr.msra.gmra.mrb[32].mxu1 %vm446_vm5, %v4150_v20  ;;  %v5795_v17 = vpop.f32.mrb[53].mxu0 }
 0xd95   :  { %5815 = vmatprep.mubr.msk.f32.mxu1 %vm6880_vm0, %v6881_v1  ;;  %6457 = vmatpush3.bf16.msra.mxu1 %v6456_v55 }
 0xd96   :  { %6458 = vmatprep.subr.bf16.mxu1 %v6879_v0 }
 0xd99   :  { %6460 = vmatpush3.bf16.msra.mxu1 %v6459_v57 }
 0xd9a   :  { %6473 = vmatprep.subr.bf16.mxu1 %v6879_v0 }
 0xe5f   :  { %v8085_v56 = vpop.f32.mrb[30].mxu1 }
 0xe60   :  { %v5766_v23 = vpop.f32.mrb[31].mxu1 }
 0xe67   :  { %v4226_v37 = vpop.f32.mrb[32].mxu1 }
 0xe68   :  { %v4227_v62 = vadd.f32 %v5124_v35, %v4226_v37  ;;  %v5788_v34 = vpop.f32.mrb[33].mxu1 }
 0xe69   :  { %v4601_v34 = vld [vmem:[%s8269_s16 + $0x18] sm:$0xff] }
 0xe6a   :  { %4238 = vrot.lane.b32.xlu0 %v4227_v62, %s6883_s6  ;;  %v4230_v41 = vadd.f32 %v4227_v62, %v4147_v30  ;;  %v4600_v62 = vld [vmem:[%s8269_s16 + $0x10] sm:$0xff] }
 0xe6b   :  { %v6477_v58 = vpack.c.bf16 %v4601_v34, %v4600_v62 }
 0xe6c   :  { %v5126_v24 = vmul.f32 -1.442695, %v4230_v41  ;;  %v4686_v41 = vld [vmem:[%s7170_s24] sm:$0xff] }
 0xe6e   :  { %6574 = vpow2.f32 %v5126_v24  ;;  %v4687_v24 = vld [vmem:[%s7170_s24 + $0x8] sm:$0xff]  ;;  %s4990_s24 = sshll.u32 %s6886_s19, 4  ;;  %s4991_s24 = int_to_ptr.vmem [resolvable:$true] %s4990_s24 }
 0xe6f   :  { %p6783_p3 = scmp.lt.s32.totalorder %s4991_s24, %s4991_s24 }
 0xe78   :  { %v6575_v25 = vpop.eup %6574 }
 0xe79   :  { %v4234_v29 = vadd.f32 1.0, %v6575_v25 }
 0xe7b   :  { %6576 = vrcp.f32 %v4234_v29 }
 0xe85   :  { %v6577_v3 = vpop.eup %6576 }
 0xe86   :  { %v4248_v47 = vsub.f32 1.0, %v6577_v3 }
 0xedc   :  { %v4239_v32 = vpop.permute.xlu0 %4238 }
 0xedd   :  { %v4241_v33 = vmul.f32 %v6577_v3, %v4239_v32  ;;  %v6480_v32 = vpack.c.bf16 %v4687_v24, %v4686_v41 }
 0xedf   :  { %4243 = vrot.lane.b32.xlu0 %v4241_v33, %s6883_s6 }
 0xf51   :  { %v4244_v38 = vpop.permute.xlu0 %4243 }
 0xf52   :  { %v4246_v39 = vadd.f32 %v4244_v38, %v4147_v30  ;;  %v5132_v30 = vld [vmem:[#allocation14] ss:$0 sm:$0xff]  ;;  %v4682_v38 = vld [vmem:[%s8270_s18] sm:$0xff] }
 0xf54   :  { %6578 = vtanh.f32 %v4246_v39  ;;  %v4683_v39 = vld [vmem:[%s8270_s18 + $0x8] sm:$0xff] }
 0xf55   :  { %v6483_v49 = vpack.c.bf16 %v4683_v39, %v4682_v38 }
 0xf5e   :  { %v6579_v18 = vpop.eup %6578 }
 0xf5f   :  { %4250 = vrot.lane.b32.xlu1 %v6579_v18, %s6884_s10  ;;  %v6489_v18 = vpack.c.bf16 %v4689_v28, %v4688_v45 }
 0xf63   :  { %4254 = vrot.lane.b32.xlu1 %v4150_v20, %s6885_s12  ;;  %v5130_v20 = vld [vmem:[#allocation13] ss:$0 sm:$0xff] }
 0xfd1   :  { %v4251_v46 = vpop.permute.xlu1 %4250 }
 0xfd2   :  { %v4253_v51 = vmul.f32 %v4251_v46, %v4248_v47  ;;  %v4690_v47 = vld [vmem:[%s7180_s9] sm:$0x3f]  ;;  %s6778_s9 = scalar_lea.vmem %s4991_s24, 128 }
 0xfd3   :  { %p6779_p2 = scmp.ne.s32.totalorder %s4991_s24, %s6778_s9  ;;  %p6784_p4 = scmp.lt.s32.totalorder %s6778_s9, %s6778_s9 }
 0xfd5   :  { %v4255_v61 = vpop.permute.xlu1 %4254  ;;  %p6785_p5 = por %p6784_p4, %p6783_p3 }
 0xfd6   :  { %v4257_v26 = vmul.f32 %v6577_v3, %v4255_v61 }
 0xfd7   :  { %p6786_p6 = pnand %p6785_p5, %p6779_p2 }
 0xfd8   :  { %v4258_v54 = vadd.f32 %v4257_v26, %v4253_v51 }
 0xfda   :  { %4340 = vrot.lane.b32.xlu0 %v4258_v54, %s6884_s10 }
0x104c   :  { %v8093_v48 = vpop.permute.xlu0 %4340 }
0x104d   :  { %5805 = vmatmul.mubr.msk.f32.vlgmr.msra.gmra.mrb[54].mxu0 %vm446_vm5, %v8093_v48 }
0x104e   :  { %5834 = vmatprep.mubr.msk.f32.mxu0 %vm6880_vm0, %v6881_v1  ;;  %6463 = vmatpush3.bf16.msra.mxu0 %v6462_v40 }
0x104f   :  { %6464 = vmatprep.subr.bf16.mxu0 %v6879_v0 }
0x1052   :  { %6466 = vmatpush3.bf16.msra.mxu0 %v6465_v22 }
0x1053   :  { %6467 = vmatprep.subr.bf16.mxu0 %v6879_v0 }
0x1056   :  { %6469 = vmatpush3.bf16.msra.mxu0 %v6468_v27 }
0x1057   :  { %6470 = vmatprep.subr.bf16.mxu0 %v6879_v0 }
0x105a   :  { %6472 = vmatpush3.bf16.msra.mxu0 %v6471_v11 }
0x1120   :  { %v4410_v53 = vpop.f32.mrb[54].mxu0 }
0x1121   :  { %v4411_v6 = vadd.f32 %v4410_v53, %v8080_v16  ;;  %v5806_v7 = vpop.f32.mrb[55].mxu0 }
0x1123   :  { %v4420_v9 = vadd.f32 %v5129_v5, %v4411_v6 }
0x1125   :  { %v4421_v10 = vmax.f32 %v4420_v9, 0.0 }
0x1127   :  { %5816 = vmatmul.mubr.msk.f32.vlgmr.msra.gmra.mrb[34].mxu1 %vm446_vm5, %v4421_v10 }
0x1128   :  { %5845 = vmatprep.mubr.msk.f32.mxu1 %vm6880_vm0, %v6881_v1  ;;  %6475 = vmatpush3.bf16.msra.mxu1 %v6474_v15 }
0x1129   :  { %6476 = vmatprep.subr.bf16.mxu1 %v6879_v0 }
0x112c   :  { %6478 = vmatpush3.bf16.msra.mxu1 %v6477_v58 }
0x112d   :  { %6479 = vmatprep.subr.bf16.mxu1 %v6879_v0 }
0x11fa   :  { %v4502_v16 = vpop.f32.mrb[34].mxu1 }
0x11fb   :  { %v4503_v17 = vadd.f32 %v5130_v20, %v4502_v16  ;;  %v5817_v23 = vpop.f32.mrb[35].mxu1 }
0x11fd   :  { %vm4506_vm11 = vcmp.ge.f32.partialorder %v4503_v17, 0.0  ;;  %v4507_v35 = vmul.f32 0.01, %v4503_v17 }
0x11ff   :  { %v4508_v37 = vsel %vm4506_vm11, %v4503_v17, %v4507_v35 }
0x1200   :  { %5835 = vmatmul.mubr.msk.f32.vlgmr.msra.gmra.mrb[56].mxu0 %vm2953_vm6, %v4508_v37 }
0x12d3   :  { %v4593_v25 = vpop.f32.mrb[56].mxu0 }
0x12d4   :  { %v4594_v29 = vadd.f32 %v5132_v30, %v4593_v25  ;;  %v5836_v3 = vpop.f32.mrb[57].mxu0 }
0x12d6   :  { %v4597_v33 = vmax.f32 %v4594_v29, 0.0 }
0x12d8   :  { %5846 = vmatmul.mubr.msk.f32.vlgmr.msra.gmra.mrb[36].mxu1 %vm446_vm5, %v4597_v33 }
0x12d9   :  { %6481 = vmatpush3.bf16.msra.mxu1 %v6480_v32  ;;  %5852 = vmatprep.mubr.msk.f32.mxu1 %vm6880_vm0, %v6881_v1 }
0x12da   :  { %6482 = vmatprep.subr.bf16.mxu1 %v6879_v0 }
0x12dc   :  { %5853 = vmatmul.mubr.msk.f32.vlgmr.msra.gmra.mrb[38].mxu1 %vm3570_vm8, %v8045_v36  ;;  %v5120_v36 = vld [vmem:[#allocation7] ss:$0 sm:$0xff] }
0x12dd   :  { %6484 = vmatpush3.bf16.msra.mxu1 %v6483_v49  ;;  %5863 = vmatprep.mubr.msk.f32.mxu1 %vm6880_vm0, %v6881_v1  ;;  %v4061_v46 = vadd.f32 %v5120_v36, %v8085_v56 }
0x12de   :  { %6485 = vmatprep.subr.bf16.mxu1 %v6879_v0 }
0x12e1   :  { %6487 = vmatpush3.bf16.msra.mxu1 %v6486_v43 }
0x12e2   :  { %6488 = vmatprep.subr.bf16.mxu1 %v6879_v0  ;;  %v5134_v0 = vld [vmem:[#allocation16] ss:$0 sm:$0xff] }
0x12e4   :  { %5864 = vmatmul.mubr.msk.f32.vlgmr.msra.gmra.mrb[38].mxu1 %vm446_vm5, %v8093_v48 }
0x12e5   :  { %6490 = vmatpush3.bf16.msra.mxu1 %v6489_v18  ;;  %5870 = vmatprep.mubr.msk.f32.mxu1 %vm6880_vm0, %v6881_v1 }
0x12e6   :  { %5873 = vmatprep.subr.mxu1 %v6881_v1 }
0x12ec   :  { %5871 = vmatmul.mubr.msk.f32.vlgmr.msra.gmra.mrb[38].mxu1 %vm3570_vm8, %v4061_v46 }
0x12ed   :  { %5874 = vmatpush3.msk.msra.mxu1 %vm359_vm1, %v4690_v47  ;;  %5875 = vmatprep.mubr.msk.f32.mxu1 %vm6880_vm0, %v6881_v1 }
0x13ab   :  { %v4678_v61 = vpop.f32.mrb[36].mxu1 }
0x13ac   :  { %v4679_v51 = vadd.f32 %v5134_v0, %v4678_v61  ;;  %v5847_v26 = vpop.f32.mrb[37].mxu1 }
0x13ae   :  { %5876 = vmatmul.mubr.msk.f32.vlgmr.msra.gmra.mrb[38].mxu1 %vm4905_vm12, %v4679_v51 }
0x1481   :  { %v4978_v54 = vpop.f32.mrb[38].mxu1 }
0x1482   :  { %4983 = vst [vmem:[#allocation17] sm:$0xff] %v4978_v54  ;;  %v5877_v56 = vpop.f32.mrb[39].mxu1 }
0x1483   :  { %6789 = shalt.err (!%p6786_p6)
}
0x1484   :  { %s6790_s21 = scalar_lea.hbm %s7185_s17, 128 }
0x1485   :  { %p6791_p7 = scmp.ne.s32.totalorder %s7185_s17, %s6790_s21  ;;  %p6794_p8 = scmp.lt.u32.totalorder %s6790_s21, %s7185_s17 }
0x1487   :  { %p6796_p9 = pnand %p6794_p8, %p6791_p7 }
0x1489   :  { %6799 = shalt.err (!%p6796_p9)
}
0x148a   :  { %4993 = dma.vmem_to_hbm [thread:$0]  %s4991_s24, 128, %s7185_s17, [#allocation4]  }
0x148b   :  { %6810 = dma.done.wait [#allocation4], 128  }
0x148c   :  { %6811 = vsyncadd [#allocation4], 4294967168 }
0x148d   :  { %4997 = vsyncpa [#allocation3], 1 }
0x148e   :  { %4998 = vsyncpa [#allocation6], 1 }
0x148f   :  { %4999 = vsyncpa [#allocation9], 1 }
0x1490   :  { %5000 = vsyncpa [#allocation12], 1 }
0x1491   :  { %5001 = vsyncpa [#allocation15], 1 }
0x1492   :  { %5002 = vsyncpa [#allocation4], 1 }

</bundles_post_ra>
